<compile_context>
chip_gen: v7x
topology: tpu7x:2x2x1
jax: 0.10.0
libtpu: 0.0.40
codegen_flags: <defaults>
</compile_context>

<pallas_src>
import jax
import jax.numpy as jnp
import numpy as np
from jax.experimental import pallas as pl
from jax.experimental.pallas import tpu as pltpu

CONTAINER_W = 5               # engine.nb_actions / container_width implied by lin1
BLOCK_DIM = 2
L = CONTAINER_W + BLOCK_DIM   # 7 positions after torch.cat((state, block), dim=-1)
C1, C2, C3 = 128, 256, 256
HID = 512
N_ACT = CONTAINER_W
HEAD_PAD = 128                # lane-dense padded head width
BN_EPS = 1e-5


def dqn_kernel(sb_ref, w1_ref, b1_ref, w2_ref, b2_ref, w3_ref, b3_ref,
               wl1_ref, bl1_ref, wh_ref, bh_ref, out_ref, x_ref, acc_ref):
    TB = out_ref.shape[0]          # batch rows in this tile (multiple of 16)

    # --- layer 1: the two input 1x1 convs (state positions l<5, block l>=5),
    # BN1 folded host-side.  Static per-position weight pick (trace-time branch),
    # (TB,1) column lane-broadcast against the (1,C1) weight row, result stored
    # straight into a bf16 VMEM scratch, position-major: row = l*TB + b.
    sb = sb_ref[...]                                              # (TB, L) f32
    for l in range(L):
        idx = 0 if l < CONTAINER_W else 1
        w_row = w1_ref[idx:idx + 1, :]                            # (1, C1)
        b_row = b1_ref[idx:idx + 1, :]
        v = sb[:, l:l + 1]                                        # (TB, 1)
        x_ref[l * TB:(l + 1) * TB, :] = jnp.maximum(
            v * w_row + b_row, 0.0).astype(jnp.bfloat16)          # conv1+bn1+relu

    # --- conv2 / conv3 (1x1 == channel matmul), BN folded, bf16 x bf16 -> f32 acc
    h = jnp.dot(x_ref[...], w2_ref[...],
                preferred_element_type=jnp.float32) + b2_ref[...]
    h = jnp.maximum(h, 0.0)
    h = jnp.dot(h.astype(jnp.bfloat16), w3_ref[...],
                preferred_element_type=jnp.float32) + b3_ref[...]
    h = jnp.maximum(h, 0.0).astype(jnp.bfloat16)                  # (L*TB, C3)

    # --- lin1: channel-major flatten (c*L + l) == sum over positions l of
    # (TB, C3) x (C3, HID) matmuls; accumulate into a VMEM scratch ref so the
    # (TB, HID) accumulator never monopolizes the register file.
    acc_ref[...] = jnp.dot(h[0:TB, :], wl1_ref[0],
                           preferred_element_type=jnp.float32)
    for l in range(1, L):
        acc_ref[...] += jnp.dot(h[l * TB:(l + 1) * TB, :], wl1_ref[l],
                                preferred_element_type=jnp.float32)
    feat = jnp.maximum(acc_ref[...] + bl1_ref[...], 0.0)          # relu(lin1)

    # --- head (padded to 128 lanes) + softmax, fully batched f32 epilogue.
    logits = jnp.dot(feat.astype(jnp.bfloat16), wh_ref[...],
                     preferred_element_type=jnp.float32) + bh_ref[...]
    m = jnp.max(logits, axis=-1, keepdims=True)
    e = jnp.exp(logits - m)                                       # pad lanes -> 0
    out_ref[...] = e * pl.reciprocal(jnp.sum(e, axis=-1, keepdims=True),
                                     approx=True)


def _bn_scale_shift(params, name):
    g, beta = params[name + '_gamma'], params[name + '_beta']
    mu, var = params[name + '_mean'], params[name + '_var']
    scale = g / jnp.sqrt(var + BN_EPS)
    return scale, beta - mu * scale


def _round_up(x, m):
    return (x + m - 1) // m * m


def _pick_tb(B):
    # Multiple of 16 (bf16 sublane packing for the h / x slabs); for larger
    # batches split into >= 2 tiles so v7x's two TensorCores both get work;
    # cap at 256 so the tile fits every generation's default scoped VMEM.
    if B > 16:
        return min(256, _round_up(-(-B // 2), 16))
    return _round_up(max(B, 1), 16)


def dqn_forward(state, block, params):
    """state: (B, 1, CONTAINER_W), block: (B, 1, 2)  -- PyTorch NCL layout."""
    B = state.shape[0]
    TB = _pick_tb(B)
    Bp = _round_up(B, TB)
    G = Bp // TB

    # ---- host-side glue: fold eval-mode BN into the adjacent weights ----
    s1, t1 = _bn_scale_shift(params, 'bn1')
    s2, t2 = _bn_scale_shift(params, 'bn2')
    s3, t3 = _bn_scale_shift(params, 'bn3')

    w_s = params['conv_state_w'][:, 0, 0] * s1
    b_s = params['conv_state_b'] * s1 + t1
    w_b = params['conv_block_w'][:, 0, 0] * s1
    b_b = params['conv_block_b'] * s1 + t1
    w1 = jnp.stack([w_s, w_b], axis=0)                            # (2, C1)
    b1 = jnp.stack([b_s, b_b], axis=0)                            # (2, C1)

    w2 = (params['conv2_w'][:, :, 0] * s2[:, None]).T.astype(jnp.bfloat16)  # (C1, C2)
    b2 = (params['conv2_b'] * s2 + t2).reshape(1, C2)
    w3 = (params['conv3_w'][:, :, 0] * s3[:, None]).T.astype(jnp.bfloat16)  # (C2, C3)
    b3 = (params['conv3_b'] * s3 + t3).reshape(1, C3)

    # lin1 weight repacked to match PyTorch channel-major flatten (c*L + l):
    wl1 = jnp.transpose(params['lin1_w'].reshape(HID, C3, L),
                        (2, 1, 0)).astype(jnp.bfloat16)           # (L, C3, HID)
    bl1 = params['lin1_b'].reshape(1, HID)

    # head padded to 128 lanes: zero weight columns, -1e30 bias -> softmax pad = 0
    wh = jnp.zeros((HID, HEAD_PAD), jnp.float32)
    wh = wh.at[:, :N_ACT].set(params['head_w'].T).astype(jnp.bfloat16)
    bh = jnp.full((1, HEAD_PAD), -1e30, jnp.float32)
    bh = bh.at[0, :N_ACT].set(params['head_b'])

    # activations: lane-dense (Bp, L), one (TB, L) block per grid step
    sb = jnp.concatenate([state[:, 0, :], block[:, 0, :]], axis=-1)   # (B, L)
    sb = jnp.zeros((Bp, L), jnp.float32).at[:B].set(sb.astype(jnp.float32))

    flops = 2 * Bp * L * (C1 * C2 + C2 * C3) + 2 * Bp * (L * C3 * HID + HID * HEAD_PAD)
    bytes_accessed = (sb.size * 4 + w1.size * 4 + b1.size * 4
                      + w2.size * 2 + b2.size * 4 + w3.size * 2 + b3.size * 4
                      + wl1.size * 2 + bl1.size * 4 + wh.size * 2 + bh.size * 4
                      + Bp * HEAD_PAD * 4)

    def const(shape):
        return pl.BlockSpec(shape, lambda i, _s=shape: (0,) * len(_s))

    out = pl.pallas_call(
        dqn_kernel,
        out_shape=jax.ShapeDtypeStruct((Bp, HEAD_PAD), jnp.float32),
        grid_spec=pltpu.PrefetchScalarGridSpec(
            num_scalar_prefetch=0,
            grid=(G,),
            in_specs=[pl.BlockSpec((TB, L), lambda i: (i, 0)),       # activations
                      const((2, C1)), const((2, C1)),                # folded conv1
                      const((C1, C2)), const((1, C2)),               # folded conv2
                      const((C2, C3)), const((1, C3)),               # folded conv3
                      const((L, C3, HID)), const((1, HID)),          # lin1
                      const((HID, HEAD_PAD)), const((1, HEAD_PAD))], # head (padded)
            out_specs=pl.BlockSpec((TB, HEAD_PAD), lambda i: (i, 0)),
            scratch_shapes=[pltpu.VMEM((L * TB, C1), jnp.bfloat16),  # layer-1 out
                            pltpu.VMEM((TB, HID), jnp.float32)]),    # lin1 acc
        compiler_params=pltpu.CompilerParams(
            dimension_semantics=("parallel",)),
        cost_estimate=pl.CostEstimate(flops=flops,
                                      transcendentals=Bp * (HEAD_PAD + 1),
                                      bytes_accessed=bytes_accessed),
    )(sb, w1, b1, w2, b2, w3, b3, wl1, bl1, wh, bh)

    return out[:B, :N_ACT]


def dqn_reference(state, block, params):
    """Pure-JAX (f32, HIGHEST) mirror of the PyTorch forward (eval-mode BN)."""
    prec = jax.lax.Precision.HIGHEST

    def conv1x1(x, w, b):
        return jnp.einsum('oik,bil->bol', w, x, precision=prec) + b[None, :, None]

    def bn(x, name):
        g, beta = params[name + '_gamma'], params[name + '_beta']
        mu, var = params[name + '_mean'], params[name + '_var']
        return ((x - mu[None, :, None]) / jnp.sqrt(var[None, :, None] + BN_EPS)
                * g[None, :, None] + beta[None, :, None])

    es = conv1x1(state, params['conv_state_w'], params['conv_state_b'])
    eb = conv1x1(block, params['conv_block_w'], params['conv_block_b'])
    x = jnp.concatenate([es, eb], axis=-1)
    x = jax.nn.relu(bn(x, 'bn1'))
    x = jax.nn.relu(bn(conv1x1(x, params['conv2_w'], params['conv2_b']), 'bn2'))
    x = jax.nn.relu(bn(conv1x1(x, params['conv3_w'], params['conv3_b']), 'bn3'))
    flat = x.reshape(x.shape[0], -1)                       # channel-major flatten
    h = jax.nn.relu(jnp.dot(flat, params['lin1_w'].T, precision=prec)
                    + params['lin1_b'])
    logits = jnp.dot(h, params['head_w'].T, precision=prec) + params['head_b']
    return jax.nn.softmax(logits, axis=1)


def init_params(key):
    ks = list(jax.random.split(key, 32))

    def nrm(k, shape, s=0.05):
        return jax.random.normal(k, shape, jnp.float32) * s

    p = {
        'conv_state_w': nrm(ks[0], (C1, 1, 1)), 'conv_state_b': nrm(ks[1], (C1,)),
        'conv_block_w': nrm(ks[2], (C1, 1, 1)), 'conv_block_b': nrm(ks[3], (C1,)),
        'conv2_w': nrm(ks[4], (C2, C1, 1)),     'conv2_b': nrm(ks[5], (C2,)),
        'conv3_w': nrm(ks[6], (C3, C2, 1)),     'conv3_b': nrm(ks[7], (C3,)),
        'lin1_w': nrm(ks[8], (HID, C3 * L)),    'lin1_b': nrm(ks[9], (HID,)),
        'head_w': nrm(ks[10], (N_ACT, HID)),    'head_b': nrm(ks[11], (N_ACT,)),
    }
    for i, (name, c) in enumerate([('bn1', C1), ('bn2', C2), ('bn3', C3)]):
        p[name + '_gamma'] = 1.0 + nrm(ks[12 + 4 * i], (c,), 0.1)
        p[name + '_beta'] = nrm(ks[13 + 4 * i], (c,), 0.1)
        p[name + '_mean'] = nrm(ks[14 + 4 * i], (c,), 0.1)
        p[name + '_var'] = 1.0 + jnp.abs(nrm(ks[15 + 4 * i], (c,), 0.1))
    return p


if __name__ == "__main__":
    key = jax.random.PRNGKey(0)
    kp, k_state, k_block = jax.random.split(key, 3)
    params = init_params(kp)

    B = 2
    state = jax.random.uniform(k_state, (B, 1, CONTAINER_W), jnp.float32, 0.0, 5.0)
    block = jax.random.uniform(k_block, (B, 1, BLOCK_DIM), jnp.float32, 1.0, 3.0)

    out = jax.block_until_ready(dqn_forward(state, block, params))
    ref = dqn_reference(state, block, params)

    assert out.shape == (B, N_ACT)
    # bf16 MXU operands (f32 accumulate) vs f32-HIGHEST reference -> looser tol.
    np.testing.assert_allclose(np.asarray(out), np.asarray(ref), rtol=2e-2, atol=2e-2)
    print("KERNEL_OK")
</pallas_src>

<mosaic_0001>
module attributes {stable_mosaic.version = 11 : i64} {
  func.func @dqn_kernel(%arg0: i32, %arg1: memref<16x7xf32, #tpu.memory_space<vmem>>, %arg2: memref<2x128xf32, #tpu.memory_space<vmem>>, %arg3: memref<2x128xf32, #tpu.memory_space<vmem>>, %arg4: memref<128x256xbf16, #tpu.memory_space<vmem>>, %arg5: memref<1x256xf32, #tpu.memory_space<vmem>>, %arg6: memref<256x256xbf16, #tpu.memory_space<vmem>>, %arg7: memref<1x256xf32, #tpu.memory_space<vmem>>, %arg8: memref<7x256x512xbf16, #tpu.memory_space<vmem>>, %arg9: memref<1x512xf32, #tpu.memory_space<vmem>>, %arg10: memref<512x128xbf16, #tpu.memory_space<vmem>>, %arg11: memref<1x128xf32, #tpu.memory_space<vmem>>, %arg12: memref<16x128xf32, #tpu.memory_space<vmem>>, %arg13: memref<112x128xbf16, #tpu.memory_space<vmem>>, %arg14: memref<16x512xf32, #tpu.memory_space<vmem>>) attributes {dimension_semantics = [#tpu.dimension_semantics<parallel>], iteration_bounds = array<i64: 1>, scalar_prefetch = 0 : i64, scratch_operands = 2 : i64, tpu.core_type = #tpu.core_type<tc>, window_params = [{transform_indices = @transform_0, window_bounds = array<i64: 16, 7>}, {pipeline_mode = #tpu.pipeline_mode<synchronous>, transform_indices = @transform_1, window_bounds = array<i64: 2, 128>}, {pipeline_mode = #tpu.pipeline_mode<synchronous>, transform_indices = @transform_2, window_bounds = array<i64: 2, 128>}, {pipeline_mode = #tpu.pipeline_mode<synchronous>, transform_indices = @transform_3, window_bounds = array<i64: 128, 256>}, {pipeline_mode = #tpu.pipeline_mode<synchronous>, transform_indices = @transform_4, window_bounds = array<i64: 1, 256>}, {pipeline_mode = #tpu.pipeline_mode<synchronous>, transform_indices = @transform_5, window_bounds = array<i64: 256, 256>}, {pipeline_mode = #tpu.pipeline_mode<synchronous>, transform_indices = @transform_6, window_bounds = array<i64: 1, 256>}, {pipeline_mode = #tpu.pipeline_mode<synchronous>, transform_indices = @transform_7, window_bounds = array<i64: 7, 256, 512>}, {pipeline_mode = #tpu.pipeline_mode<synchronous>, transform_indices = @transform_8, window_bounds = array<i64: 1, 512>}, {pipeline_mode = #tpu.pipeline_mode<synchronous>, transform_indices = @transform_9, window_bounds = array<i64: 512, 128>}, {pipeline_mode = #tpu.pipeline_mode<synchronous>, transform_indices = @transform_10, window_bounds = array<i64: 1, 128>}, {transform_indices = @transform_11, window_bounds = array<i64: 16, 128>}]} {
    %c0 = arith.constant 0 : index
    %c0_0 = arith.constant 0 : index
    %0 = vector.load %arg1[%c0, %c0_0] : memref<16x7xf32, #tpu.memory_space<vmem>>, vector<16x7xf32>
    %c0_1 = arith.constant 0 : index
    %c0_2 = arith.constant 0 : index
    %1 = vector.load %arg2[%c0_1, %c0_2] : memref<2x128xf32, #tpu.memory_space<vmem>>, vector<1x128xf32>
    %c0_3 = arith.constant 0 : index
    %c0_4 = arith.constant 0 : index
    %2 = vector.load %arg3[%c0_3, %c0_4] : memref<2x128xf32, #tpu.memory_space<vmem>>, vector<1x128xf32>
    %3 = vector.extract_strided_slice %0 {offsets = [0, 0], sizes = [16, 1], strides = [1, 1]} : vector<16x7xf32> to vector<16x1xf32>
    %4 = vector.broadcast %3 : vector<16x1xf32> to vector<16x128xf32>
    %5 = vector.broadcast %1 : vector<1x128xf32> to vector<16x128xf32>
    %6 = arith.mulf %4, %5 : vector<16x128xf32>
    %7 = vector.broadcast %2 : vector<1x128xf32> to vector<16x128xf32>
    %8 = arith.addf %6, %7 : vector<16x128xf32>
    %cst = arith.constant 0.000000e+00 : f32
    %9 = vector.broadcast %cst : f32 to vector<16x128xf32>
    %10 = arith.maximumf %8, %9 : vector<16x128xf32>
    %11 = arith.truncf %10 : vector<16x128xf32> to vector<16x128xbf16>
    %c0_5 = arith.constant 0 : index
    %c0_6 = arith.constant 0 : index
    %12 = vector.load %arg13[%c0_5, %c0_6] : memref<112x128xbf16, #tpu.memory_space<vmem>>, vector<16x128xbf16>
    tpu.vector_store %arg13[%c0_5, %c0_6], %11 {strides = array<i32>} : memref<112x128xbf16, #tpu.memory_space<vmem>>, vector<16x128xbf16>,
    %c0_7 = arith.constant 0 : index
    %c0_8 = arith.constant 0 : index
    %13 = vector.load %arg2[%c0_7, %c0_8] : memref<2x128xf32, #tpu.memory_space<vmem>>, vector<1x128xf32>
    %c0_9 = arith.constant 0 : index
    %c0_10 = arith.constant 0 : index
    %14 = vector.load %arg3[%c0_9, %c0_10] : memref<2x128xf32, #tpu.memory_space<vmem>>, vector<1x128xf32>
    %15 = vector.extract_strided_slice %0 {offsets = [0, 1], sizes = [16, 1], strides = [1, 1]} : vector<16x7xf32> to vector<16x1xf32>
    %16 = vector.broadcast %15 : vector<16x1xf32> to vector<16x128xf32>
    %17 = vector.broadcast %13 : vector<1x128xf32> to vector<16x128xf32>
    %18 = arith.mulf %16, %17 : vector<16x128xf32>
    %19 = vector.broadcast %14 : vector<1x128xf32> to vector<16x128xf32>
    %20 = arith.addf %18, %19 : vector<16x128xf32>
    %cst_11 = arith.constant 0.000000e+00 : f32
    %21 = vector.broadcast %cst_11 : f32 to vector<16x128xf32>
    %22 = arith.maximumf %20, %21 : vector<16x128xf32>
    %23 = arith.truncf %22 : vector<16x128xf32> to vector<16x128xbf16>
    %c16 = arith.constant 16 : index
    %c0_12 = arith.constant 0 : index
    %24 = vector.load %arg13[%c16, %c0_12] : memref<112x128xbf16, #tpu.memory_space<vmem>>, vector<16x128xbf16>
    tpu.vector_store %arg13[%c16, %c0_12], %23 {strides = array<i32>} : memref<112x128xbf16, #tpu.memory_space<vmem>>, vector<16x128xbf16>,
    %c0_13 = arith.constant 0 : index
    %c0_14 = arith.constant 0 : index
    %25 = vector.load %arg2[%c0_13, %c0_14] : memref<2x128xf32, #tpu.memory_space<vmem>>, vector<1x128xf32>
    %c0_15 = arith.constant 0 : index
    %c0_16 = arith.constant 0 : index
    %26 = vector.load %arg3[%c0_15, %c0_16] : memref<2x128xf32, #tpu.memory_space<vmem>>, vector<1x128xf32>
    %27 = vector.extract_strided_slice %0 {offsets = [0, 2], sizes = [16, 1], strides = [1, 1]} : vector<16x7xf32> to vector<16x1xf32>
    %28 = vector.broadcast %27 : vector<16x1xf32> to vector<16x128xf32>
    %29 = vector.broadcast %25 : vector<1x128xf32> to vector<16x128xf32>
    %30 = arith.mulf %28, %29 : vector<16x128xf32>
    %31 = vector.broadcast %26 : vector<1x128xf32> to vector<16x128xf32>
    %32 = arith.addf %30, %31 : vector<16x128xf32>
    %cst_17 = arith.constant 0.000000e+00 : f32
    %33 = vector.broadcast %cst_17 : f32 to vector<16x128xf32>
    %34 = arith.maximumf %32, %33 : vector<16x128xf32>
    %35 = arith.truncf %34 : vector<16x128xf32> to vector<16x128xbf16>
    %c32 = arith.constant 32 : index
    %c0_18 = arith.constant 0 : index
    %36 = vector.load %arg13[%c32, %c0_18] : memref<112x128xbf16, #tpu.memory_space<vmem>>, vector<16x128xbf16>
    tpu.vector_store %arg13[%c32, %c0_18], %35 {strides = array<i32>} : memref<112x128xbf16, #tpu.memory_space<vmem>>, vector<16x128xbf16>,
    %c0_19 = arith.constant 0 : index
    %c0_20 = arith.constant 0 : index
    %37 = vector.load %arg2[%c0_19, %c0_20] : memref<2x128xf32, #tpu.memory_space<vmem>>, vector<1x128xf32>
    %c0_21 = arith.constant 0 : index
    %c0_22 = arith.constant 0 : index
    %38 = vector.load %arg3[%c0_21, %c0_22] : memref<2x128xf32, #tpu.memory_space<vmem>>, vector<1x128xf32>
    %39 = vector.extract_strided_slice %0 {offsets = [0, 3], sizes = [16, 1], strides = [1, 1]} : vector<16x7xf32> to vector<16x1xf32>
    %40 = vector.broadcast %39 : vector<16x1xf32> to vector<16x128xf32>
    %41 = vector.broadcast %37 : vector<1x128xf32> to vector<16x128xf32>
    %42 = arith.mulf %40, %41 : vector<16x128xf32>
    %43 = vector.broadcast %38 : vector<1x128xf32> to vector<16x128xf32>
    %44 = arith.addf %42, %43 : vector<16x128xf32>
    %cst_23 = arith.constant 0.000000e+00 : f32
    %45 = vector.broadcast %cst_23 : f32 to vector<16x128xf32>
    %46 = arith.maximumf %44, %45 : vector<16x128xf32>
    %47 = arith.truncf %46 : vector<16x128xf32> to vector<16x128xbf16>
    %c48 = arith.constant 48 : index
    %c0_24 = arith.constant 0 : index
    %48 = vector.load %arg13[%c48, %c0_24] : memref<112x128xbf16, #tpu.memory_space<vmem>>, vector<16x128xbf16>
    tpu.vector_store %arg13[%c48, %c0_24], %47 {strides = array<i32>} : memref<112x128xbf16, #tpu.memory_space<vmem>>, vector<16x128xbf16>,
    %c0_25 = arith.constant 0 : index
    %c0_26 = arith.constant 0 : index
    %49 = vector.load %arg2[%c0_25, %c0_26] : memref<2x128xf32, #tpu.memory_space<vmem>>, vector<1x128xf32>
    %c0_27 = arith.constant 0 : index
    %c0_28 = arith.constant 0 : index
    %50 = vector.load %arg3[%c0_27, %c0_28] : memref<2x128xf32, #tpu.memory_space<vmem>>, vector<1x128xf32>
    %51 = vector.extract_strided_slice %0 {offsets = [0, 4], sizes = [16, 1], strides = [1, 1]} : vector<16x7xf32> to vector<16x1xf32>
    %52 = vector.broadcast %51 : vector<16x1xf32> to vector<16x128xf32>
    %53 = vector.broadcast %49 : vector<1x128xf32> to vector<16x128xf32>
    %54 = arith.mulf %52, %53 : vector<16x128xf32>
    %55 = vector.broadcast %50 : vector<1x128xf32> to vector<16x128xf32>
    %56 = arith.addf %54, %55 : vector<16x128xf32>
    %cst_29 = arith.constant 0.000000e+00 : f32
    %57 = vector.broadcast %cst_29 : f32 to vector<16x128xf32>
    %58 = arith.maximumf %56, %57 : vector<16x128xf32>
    %59 = arith.truncf %58 : vector<16x128xf32> to vector<16x128xbf16>
    %c64 = arith.constant 64 : index
    %c0_30 = arith.constant 0 : index
    %60 = vector.load %arg13[%c64, %c0_30] : memref<112x128xbf16, #tpu.memory_space<vmem>>, vector<16x128xbf16>
    tpu.vector_store %arg13[%c64, %c0_30], %59 {strides = array<i32>} : memref<112x128xbf16, #tpu.memory_space<vmem>>, vector<16x128xbf16>,
    %c1 = arith.constant 1 : index
    %c0_31 = arith.constant 0 : index
    %61 = vector.load %arg2[%c1, %c0_31] : memref<2x128xf32, #tpu.memory_space<vmem>>, vector<1x128xf32>
    %c1_32 = arith.constant 1 : index
    %c0_33 = arith.constant 0 : index
    %62 = vector.load %arg3[%c1_32, %c0_33] : memref<2x128xf32, #tpu.memory_space<vmem>>, vector<1x128xf32>
    %63 = vector.extract_strided_slice %0 {offsets = [0, 5], sizes = [16, 1], strides = [1, 1]} : vector<16x7xf32> to vector<16x1xf32>
    %64 = vector.broadcast %63 : vector<16x1xf32> to vector<16x128xf32>
    %65 = vector.broadcast %61 : vector<1x128xf32> to vector<16x128xf32>
    %66 = arith.mulf %64, %65 : vector<16x128xf32>
    %67 = vector.broadcast %62 : vector<1x128xf32> to vector<16x128xf32>
    %68 = arith.addf %66, %67 : vector<16x128xf32>
    %cst_34 = arith.constant 0.000000e+00 : f32
    %69 = vector.broadcast %cst_34 : f32 to vector<16x128xf32>
    %70 = arith.maximumf %68, %69 : vector<16x128xf32>
    %71 = arith.truncf %70 : vector<16x128xf32> to vector<16x128xbf16>
    %c80 = arith.constant 80 : index
    %c0_35 = arith.constant 0 : index
    %72 = vector.load %arg13[%c80, %c0_35] : memref<112x128xbf16, #tpu.memory_space<vmem>>, vector<16x128xbf16>
    tpu.vector_store %arg13[%c80, %c0_35], %71 {strides = array<i32>} : memref<112x128xbf16, #tpu.memory_space<vmem>>, vector<16x128xbf16>,
    %c1_36 = arith.constant 1 : index
    %c0_37 = arith.constant 0 : index
    %73 = vector.load %arg2[%c1_36, %c0_37] : memref<2x128xf32, #tpu.memory_space<vmem>>, vector<1x128xf32>
    %c1_38 = arith.constant 1 : index
    %c0_39 = arith.constant 0 : index
    %74 = vector.load %arg3[%c1_38, %c0_39] : memref<2x128xf32, #tpu.memory_space<vmem>>, vector<1x128xf32>
    %75 = vector.extract_strided_slice %0 {offsets = [0, 6], sizes = [16, 1], strides = [1, 1]} : vector<16x7xf32> to vector<16x1xf32>
    %76 = vector.broadcast %75 : vector<16x1xf32> to vector<16x128xf32>
    %77 = vector.broadcast %73 : vector<1x128xf32> to vector<16x128xf32>
    %78 = arith.mulf %76, %77 : vector<16x128xf32>
    %79 = vector.broadcast %74 : vector<1x128xf32> to vector<16x128xf32>
    %80 = arith.addf %78, %79 : vector<16x128xf32>
    %cst_40 = arith.constant 0.000000e+00 : f32
    %81 = vector.broadcast %cst_40 : f32 to vector<16x128xf32>
    %82 = arith.maximumf %80, %81 : vector<16x128xf32>
    %83 = arith.truncf %82 : vector<16x128xf32> to vector<16x128xbf16>
    %c96 = arith.constant 96 : index
    %c0_41 = arith.constant 0 : index
    %84 = vector.load %arg13[%c96, %c0_41] : memref<112x128xbf16, #tpu.memory_space<vmem>>, vector<16x128xbf16>
    tpu.vector_store %arg13[%c96, %c0_41], %83 {strides = array<i32>} : memref<112x128xbf16, #tpu.memory_space<vmem>>, vector<16x128xbf16>,
    %c0_42 = arith.constant 0 : index
    %c0_43 = arith.constant 0 : index
    %85 = vector.load %arg13[%c0_42, %c0_43] : memref<112x128xbf16, #tpu.memory_space<vmem>>, vector<112x128xbf16>
    %c0_44 = arith.constant 0 : index
    %c0_45 = arith.constant 0 : index
    %86 = vector.load %arg4[%c0_44, %c0_45] : memref<128x256xbf16, #tpu.memory_space<vmem>>, vector<128x256xbf16>
    %cst_46 = arith.constant dense<0.000000e+00> : vector<112x256xf32>
    %87 = tpu.matmul %85, %86, %cst_46 {dimension_numbers = #tpu.dot_dimension_numbers<[1], [0], [0], [1], [0, 0, 1, 1], [], []>} : vector<112x128xbf16>, vector<128x256xbf16>, vector<112x256xf32> -> vector<112x256xf32>
    %c0_47 = arith.constant 0 : index
    %c0_48 = arith.constant 0 : index
    %88 = vector.load %arg5[%c0_47, %c0_48] : memref<1x256xf32, #tpu.memory_space<vmem>>, vector<1x256xf32>
    %89 = vector.broadcast %88 : vector<1x256xf32> to vector<112x256xf32>
    %90 = arith.addf %87, %89 : vector<112x256xf32>
    %cst_49 = arith.constant 0.000000e+00 : f32
    %91 = vector.broadcast %cst_49 : f32 to vector<112x256xf32>
    %92 = arith.maximumf %90, %91 : vector<112x256xf32>
    %93 = arith.truncf %92 : vector<112x256xf32> to vector<112x256xbf16>
    %c0_50 = arith.constant 0 : index
    %c0_51 = arith.constant 0 : index
    %94 = vector.load %arg6[%c0_50, %c0_51] : memref<256x256xbf16, #tpu.memory_space<vmem>>, vector<256x256xbf16>
    %cst_52 = arith.constant dense<0.000000e+00> : vector<112x256xf32>
    %95 = tpu.matmul %93, %94, %cst_52 {dimension_numbers = #tpu.dot_dimension_numbers<[1], [0], [0], [1], [0, 0, 1, 1], [], []>} : vector<112x256xbf16>, vector<256x256xbf16>, vector<112x256xf32> -> vector<112x256xf32>
    %c0_53 = arith.constant 0 : index
    %c0_54 = arith.constant 0 : index
    %96 = vector.load %arg7[%c0_53, %c0_54] : memref<1x256xf32, #tpu.memory_space<vmem>>, vector<1x256xf32>
    %97 = vector.broadcast %96 : vector<1x256xf32> to vector<112x256xf32>
    %98 = arith.addf %95, %97 : vector<112x256xf32>
    %cst_55 = arith.constant 0.000000e+00 : f32
    %99 = vector.broadcast %cst_55 : f32 to vector<112x256xf32>
    %100 = arith.maximumf %98, %99 : vector<112x256xf32>
    %101 = arith.truncf %100 : vector<112x256xf32> to vector<112x256xbf16>
    %102 = vector.extract_strided_slice %101 {offsets = [0, 0], sizes = [16, 256], strides = [1, 1]} : vector<112x256xbf16> to vector<16x256xbf16>
    %c0_56 = arith.constant 0 : index
    %c0_57 = arith.constant 0 : index
    %c0_58 = arith.constant 0 : index
    %103 = vector.load %arg8[%c0_56, %c0_57, %c0_58] : memref<7x256x512xbf16, #tpu.memory_space<vmem>>, vector<1x256x512xbf16>
    %104 = vector.shape_cast %103 : vector<1x256x512xbf16> to vector<256x512xbf16>
    %cst_59 = arith.constant dense<0.000000e+00> : vector<16x512xf32>
    %105 = tpu.matmul %102, %104, %cst_59 {dimension_numbers = #tpu.dot_dimension_numbers<[1], [0], [0], [1], [0, 0, 1, 1], [], []>} : vector<16x256xbf16>, vector<256x512xbf16>, vector<16x512xf32> -> vector<16x512xf32>
    %c0_60 = arith.constant 0 : index
    %c0_61 = arith.constant 0 : index
    %106 = vector.load %arg14[%c0_60, %c0_61] : memref<16x512xf32, #tpu.memory_space<vmem>>, vector<16x512xf32>
    tpu.vector_store %arg14[%c0_60, %c0_61], %105 {strides = array<i32>} : memref<16x512xf32, #tpu.memory_space<vmem>>, vector<16x512xf32>,
    %c0_62 = arith.constant 0 : index
    %c0_63 = arith.constant 0 : index
    %107 = vector.load %arg14[%c0_62, %c0_63] : memref<16x512xf32, #tpu.memory_space<vmem>>, vector<16x512xf32>
    %108 = vector.extract_strided_slice %101 {offsets = [16, 0], sizes = [16, 256], strides = [1, 1]} : vector<112x256xbf16> to vector<16x256xbf16>
    %c1_64 = arith.constant 1 : index
    %c0_65 = arith.constant 0 : index
    %c0_66 = arith.constant 0 : index
    %109 = vector.load %arg8[%c1_64, %c0_65, %c0_66] : memref<7x256x512xbf16, #tpu.memory_space<vmem>>, vector<1x256x512xbf16>
    %110 = vector.shape_cast %109 : vector<1x256x512xbf16> to vector<256x512xbf16>
    %cst_67 = arith.constant dense<0.000000e+00> : vector<16x512xf32>
    %111 = tpu.matmul %108, %110, %cst_67 {dimension_numbers = #tpu.dot_dimension_numbers<[1], [0], [0], [1], [0, 0, 1, 1], [], []>} : vector<16x256xbf16>, vector<256x512xbf16>, vector<16x512xf32> -> vector<16x512xf32>
    %112 = arith.addf %107, %111 : vector<16x512xf32>
    %c0_68 = arith.constant 0 : index
    %c0_69 = arith.constant 0 : index
    %113 = vector.load %arg14[%c0_68, %c0_69] : memref<16x512xf32, #tpu.memory_space<vmem>>, vector<16x512xf32>
    tpu.vector_store %arg14[%c0_68, %c0_69], %112 {strides = array<i32>} : memref<16x512xf32, #tpu.memory_space<vmem>>, vector<16x512xf32>,
    %c0_70 = arith.constant 0 : index
    %c0_71 = arith.constant 0 : index
    %114 = vector.load %arg14[%c0_70, %c0_71] : memref<16x512xf32, #tpu.memory_space<vmem>>, vector<16x512xf32>
    %115 = vector.extract_strided_slice %101 {offsets = [32, 0], sizes = [16, 256], strides = [1, 1]} : vector<112x256xbf16> to vector<16x256xbf16>
    %c2 = arith.constant 2 : index
    %c0_72 = arith.constant 0 : index
    %c0_73 = arith.constant 0 : index
    %116 = vector.load %arg8[%c2, %c0_72, %c0_73] : memref<7x256x512xbf16, #tpu.memory_space<vmem>>, vector<1x256x512xbf16>
    %117 = vector.shape_cast %116 : vector<1x256x512xbf16> to vector<256x512xbf16>
    %cst_74 = arith.constant dense<0.000000e+00> : vector<16x512xf32>
    %118 = tpu.matmul %115, %117, %cst_74 {dimension_numbers = #tpu.dot_dimension_numbers<[1], [0], [0], [1], [0, 0, 1, 1], [], []>} : vector<16x256xbf16>, vector<256x512xbf16>, vector<16x512xf32> -> vector<16x512xf32>
    %119 = arith.addf %114, %118 : vector<16x512xf32>
    %c0_75 = arith.constant 0 : index
    %c0_76 = arith.constant 0 : index
    %120 = vector.load %arg14[%c0_75, %c0_76] : memref<16x512xf32, #tpu.memory_space<vmem>>, vector<16x512xf32>
    tpu.vector_store %arg14[%c0_75, %c0_76], %119 {strides = array<i32>} : memref<16x512xf32, #tpu.memory_space<vmem>>, vector<16x512xf32>,
    %c0_77 = arith.constant 0 : index
    %c0_78 = arith.constant 0 : index
    %121 = vector.load %arg14[%c0_77, %c0_78] : memref<16x512xf32, #tpu.memory_space<vmem>>, vector<16x512xf32>
    %122 = vector.extract_strided_slice %101 {offsets = [48, 0], sizes = [16, 256], strides = [1, 1]} : vector<112x256xbf16> to vector<16x256xbf16>
    %c3 = arith.constant 3 : index
    %c0_79 = arith.constant 0 : index
    %c0_80 = arith.constant 0 : index
    %123 = vector.load %arg8[%c3, %c0_79, %c0_80] : memref<7x256x512xbf16, #tpu.memory_space<vmem>>, vector<1x256x512xbf16>
    %124 = vector.shape_cast %123 : vector<1x256x512xbf16> to vector<256x512xbf16>
    %cst_81 = arith.constant dense<0.000000e+00> : vector<16x512xf32>
    %125 = tpu.matmul %122, %124, %cst_81 {dimension_numbers = #tpu.dot_dimension_numbers<[1], [0], [0], [1], [0, 0, 1, 1], [], []>} : vector<16x256xbf16>, vector<256x512xbf16>, vector<16x512xf32> -> vector<16x512xf32>
    %126 = arith.addf %121, %125 : vector<16x512xf32>
    %c0_82 = arith.constant 0 : index
    %c0_83 = arith.constant 0 : index
    %127 = vector.load %arg14[%c0_82, %c0_83] : memref<16x512xf32, #tpu.memory_space<vmem>>, vector<16x512xf32>
    tpu.vector_store %arg14[%c0_82, %c0_83], %126 {strides = array<i32>} : memref<16x512xf32, #tpu.memory_space<vmem>>, vector<16x512xf32>,
    %c0_84 = arith.constant 0 : index
    %c0_85 = arith.constant 0 : index
    %128 = vector.load %arg14[%c0_84, %c0_85] : memref<16x512xf32, #tpu.memory_space<vmem>>, vector<16x512xf32>
    %129 = vector.extract_strided_slice %101 {offsets = [64, 0], sizes = [16, 256], strides = [1, 1]} : vector<112x256xbf16> to vector<16x256xbf16>
    %c4 = arith.constant 4 : index
    %c0_86 = arith.constant 0 : index
    %c0_87 = arith.constant 0 : index
    %130 = vector.load %arg8[%c4, %c0_86, %c0_87] : memref<7x256x512xbf16, #tpu.memory_space<vmem>>, vector<1x256x512xbf16>
    %131 = vector.shape_cast %130 : vector<1x256x512xbf16> to vector<256x512xbf16>
    %cst_88 = arith.constant dense<0.000000e+00> : vector<16x512xf32>
    %132 = tpu.matmul %129, %131, %cst_88 {dimension_numbers = #tpu.dot_dimension_numbers<[1], [0], [0], [1], [0, 0, 1, 1], [], []>} : vector<16x256xbf16>, vector<256x512xbf16>, vector<16x512xf32> -> vector<16x512xf32>
    %133 = arith.addf %128, %132 : vector<16x512xf32>
    %c0_89 = arith.constant 0 : index
    %c0_90 = arith.constant 0 : index
    %134 = vector.load %arg14[%c0_89, %c0_90] : memref<16x512xf32, #tpu.memory_space<vmem>>, vector<16x512xf32>
    tpu.vector_store %arg14[%c0_89, %c0_90], %133 {strides = array<i32>} : memref<16x512xf32, #tpu.memory_space<vmem>>, vector<16x512xf32>,
    %c0_91 = arith.constant 0 : index
    %c0_92 = arith.constant 0 : index
    %135 = vector.load %arg14[%c0_91, %c0_92] : memref<16x512xf32, #tpu.memory_space<vmem>>, vector<16x512xf32>
    %136 = vector.extract_strided_slice %101 {offsets = [80, 0], sizes = [16, 256], strides = [1, 1]} : vector<112x256xbf16> to vector<16x256xbf16>
    %c5 = arith.constant 5 : index
    %c0_93 = arith.constant 0 : index
    %c0_94 = arith.constant 0 : index
    %137 = vector.load %arg8[%c5, %c0_93, %c0_94] : memref<7x256x512xbf16, #tpu.memory_space<vmem>>, vector<1x256x512xbf16>
    %138 = vector.shape_cast %137 : vector<1x256x512xbf16> to vector<256x512xbf16>
    %cst_95 = arith.constant dense<0.000000e+00> : vector<16x512xf32>
    %139 = tpu.matmul %136, %138, %cst_95 {dimension_numbers = #tpu.dot_dimension_numbers<[1], [0], [0], [1], [0, 0, 1, 1], [], []>} : vector<16x256xbf16>, vector<256x512xbf16>, vector<16x512xf32> -> vector<16x512xf32>
    %140 = arith.addf %135, %139 : vector<16x512xf32>
    %c0_96 = arith.constant 0 : index
    %c0_97 = arith.constant 0 : index
    %141 = vector.load %arg14[%c0_96, %c0_97] : memref<16x512xf32, #tpu.memory_space<vmem>>, vector<16x512xf32>
    tpu.vector_store %arg14[%c0_96, %c0_97], %140 {strides = array<i32>} : memref<16x512xf32, #tpu.memory_space<vmem>>, vector<16x512xf32>,
    %c0_98 = arith.constant 0 : index
    %c0_99 = arith.constant 0 : index
    %142 = vector.load %arg14[%c0_98, %c0_99] : memref<16x512xf32, #tpu.memory_space<vmem>>, vector<16x512xf32>
    %143 = vector.extract_strided_slice %101 {offsets = [96, 0], sizes = [16, 256], strides = [1, 1]} : vector<112x256xbf16> to vector<16x256xbf16>
    %c6 = arith.constant 6 : index
    %c0_100 = arith.constant 0 : index
    %c0_101 = arith.constant 0 : index
    %144 = vector.load %arg8[%c6, %c0_100, %c0_101] : memref<7x256x512xbf16, #tpu.memory_space<vmem>>, vector<1x256x512xbf16>
    %145 = vector.shape_cast %144 : vector<1x256x512xbf16> to vector<256x512xbf16>
    %cst_102 = arith.constant dense<0.000000e+00> : vector<16x512xf32>
    %146 = tpu.matmul %143, %145, %cst_102 {dimension_numbers = #tpu.dot_dimension_numbers<[1], [0], [0], [1], [0, 0, 1, 1], [], []>} : vector<16x256xbf16>, vector<256x512xbf16>, vector<16x512xf32> -> vector<16x512xf32>
    %147 = arith.addf %142, %146 : vector<16x512xf32>
    %c0_103 = arith.constant 0 : index
    %c0_104 = arith.constant 0 : index
    %148 = vector.load %arg14[%c0_103, %c0_104] : memref<16x512xf32, #tpu.memory_space<vmem>>, vector<16x512xf32>
    tpu.vector_store %arg14[%c0_103, %c0_104], %147 {strides = array<i32>} : memref<16x512xf32, #tpu.memory_space<vmem>>, vector<16x512xf32>,
    %c0_105 = arith.constant 0 : index
    %c0_106 = arith.constant 0 : index
    %149 = vector.load %arg14[%c0_105, %c0_106] : memref<16x512xf32, #tpu.memory_space<vmem>>, vector<16x512xf32>
    %c0_107 = arith.constant 0 : index
    %c0_108 = arith.constant 0 : index
    %150 = vector.load %arg9[%c0_107, %c0_108] : memref<1x512xf32, #tpu.memory_space<vmem>>, vector<1x512xf32>
    %151 = vector.broadcast %150 : vector<1x512xf32> to vector<16x512xf32>
    %152 = arith.addf %149, %151 : vector<16x512xf32>
    %cst_109 = arith.constant 0.000000e+00 : f32
    %153 = vector.broadcast %cst_109 : f32 to vector<16x512xf32>
    %154 = arith.maximumf %152, %153 : vector<16x512xf32>
    %155 = arith.truncf %154 : vector<16x512xf32> to vector<16x512xbf16>
    %c0_110 = arith.constant 0 : index
    %c0_111 = arith.constant 0 : index
    %156 = vector.load %arg10[%c0_110, %c0_111] : memref<512x128xbf16, #tpu.memory_space<vmem>>, vector<512x128xbf16>
    %cst_112 = arith.constant dense<0.000000e+00> : vector<16x128xf32>
    %157 = tpu.matmul %155, %156, %cst_112 {dimension_numbers = #tpu.dot_dimension_numbers<[1], [0], [0], [1], [0, 0, 1, 1], [], []>} : vector<16x512xbf16>, vector<512x128xbf16>, vector<16x128xf32> -> vector<16x128xf32>
    %c0_113 = arith.constant 0 : index
    %c0_114 = arith.constant 0 : index
    %158 = vector.load %arg11[%c0_113, %c0_114] : memref<1x128xf32, #tpu.memory_space<vmem>>, vector<1x128xf32>
    %159 = vector.broadcast %158 : vector<1x128xf32> to vector<16x128xf32>
    %160 = arith.addf %157, %159 : vector<16x128xf32>
    %cst_115 = arith.constant dense<0xFF800000> : vector<16xf32>
    %161 = vector.multi_reduction <maximumf>, %160, %cst_115 [1] : vector<16x128xf32> to vector<16xf32>
    %162 = vector.shape_cast %161 : vector<16xf32> to vector<16x1xf32>
    %163 = vector.broadcast %162 : vector<16x1xf32> to vector<16x128xf32>
    %164 = arith.subf %160, %163 : vector<16x128xf32>
    %165 = math.exp %164 : vector<16x128xf32>
    %cst_116 = arith.constant dense<0.000000e+00> : vector<16xf32>
    %166 = vector.multi_reduction <add>, %165, %cst_116 [1] : vector<16x128xf32> to vector<16xf32>
    %167 = vector.shape_cast %166 : vector<16xf32> to vector<16x1xf32>
    %168 = tpu.reciprocal %167 {approx = true} : vector<16x1xf32> -> vector<16x1xf32>
    %169 = vector.broadcast %168 : vector<16x1xf32> to vector<16x128xf32>
    %170 = arith.mulf %165, %169 : vector<16x128xf32>
    %c0_117 = arith.constant 0 : index
    %c0_118 = arith.constant 0 : index
    %171 = vector.load %arg12[%c0_117, %c0_118] : memref<16x128xf32, #tpu.memory_space<vmem>>, vector<16x128xf32>
    tpu.vector_store %arg12[%c0_117, %c0_118], %170 {strides = array<i32>} : memref<16x128xf32, #tpu.memory_space<vmem>>, vector<16x128xf32>,
    return
  }
  func.func @transform_0(%arg0: i32) -> (i32, i32) {
    %c0_i32 = arith.constant 0 : i32
    %c0_i32_0 = arith.constant 0 : i32
    return %arg0, %c0_i32 : i32, i32
  }
  func.func @transform_1(%arg0: i32) -> (i32, i32) {
    %c0_i32 = arith.constant 0 : i32
    %c0_i32_0 = arith.constant 0 : i32
    %c0_i32_1 = arith.constant 0 : i32
    return %c0_i32, %c0_i32_0 : i32, i32
  }
  func.func @transform_2(%arg0: i32) -> (i32, i32) {
    %c0_i32 = arith.constant 0 : i32
    %c0_i32_0 = arith.constant 0 : i32
    %c0_i32_1 = arith.constant 0 : i32
    return %c0_i32, %c0_i32_0 : i32, i32
  }
  func.func @transform_3(%arg0: i32) -> (i32, i32) {
    %c0_i32 = arith.constant 0 : i32
    %c0_i32_0 = arith.constant 0 : i32
    %c0_i32_1 = arith.constant 0 : i32
    return %c0_i32, %c0_i32_0 : i32, i32
  }
  func.func @transform_4(%arg0: i32) -> (i32, i32) {
    %c0_i32 = arith.constant 0 : i32
    %c0_i32_0 = arith.constant 0 : i32
    %c0_i32_1 = arith.constant 0 : i32
    return %c0_i32, %c0_i32_0 : i32, i32
  }
  func.func @transform_5(%arg0: i32) -> (i32, i32) {
    %c0_i32 = arith.constant 0 : i32
    %c0_i32_0 = arith.constant 0 : i32
    %c0_i32_1 = arith.constant 0 : i32
    return %c0_i32, %c0_i32_0 : i32, i32
  }
  func.func @transform_6(%arg0: i32) -> (i32, i32) {
    %c0_i32 = arith.constant 0 : i32
    %c0_i32_0 = arith.constant 0 : i32
    %c0_i32_1 = arith.constant 0 : i32
    return %c0_i32, %c0_i32_0 : i32, i32
  }
  func.func @transform_7(%arg0: i32) -> (i32, i32, i32) {
    %c0_i32 = arith.constant 0 : i32
    %c0_i32_0 = arith.constant 0 : i32
    %c0_i32_1 = arith.constant 0 : i32
    %c0_i32_2 = arith.constant 0 : i32
    return %c0_i32, %c0_i32_0, %c0_i32_1 : i32, i32, i32
  }
  func.func @transform_8(%arg0: i32) -> (i32, i32) {
    %c0_i32 = arith.constant 0 : i32
    %c0_i32_0 = arith.constant 0 : i32
    %c0_i32_1 = arith.constant 0 : i32
    return %c0_i32, %c0_i32_0 : i32, i32
  }
  func.func @transform_9(%arg0: i32) -> (i32, i32) {
    %c0_i32 = arith.constant 0 : i32
    %c0_i32_0 = arith.constant 0 : i32
    %c0_i32_1 = arith.constant 0 : i32
    return %c0_i32, %c0_i32_0 : i32, i32
  }
  func.func @transform_10(%arg0: i32) -> (i32, i32) {
    %c0_i32 = arith.constant 0 : i32
    %c0_i32_0 = arith.constant 0 : i32
    %c0_i32_1 = arith.constant 0 : i32
    return %c0_i32, %c0_i32_0 : i32, i32
  }
  func.func @transform_11(%arg0: i32) -> (i32, i32) {
    %c0_i32 = arith.constant 0 : i32
    %c0_i32_0 = arith.constant 0 : i32
    return %arg0, %c0_i32 : i32, i32
  }
}

</mosaic_0001>

<bundles_post_ra>
// kernel: tpu_custom_call.1
= control target key start
LH: loop header
LB: loop body
LE: loop exit
PB: predicated region body
PF: predicated region fallthrough
CT: control target
= control target key end

     0   :  { %16 = vsyncpa [#allocation5], 0  ;;  %s6940_s0 = inlined_call_operand.vmem [shape: f32[16,7], index: 0, kind: input, shape index: {}]   ;;  %s6941_s1 = inlined_call_operand.hbm [shape: f32[2,128], index: 1, kind: input, shape index: {}]   ;;  %s6942_s2 = inlined_call_operand.hbm [shape: f32[2,128], index: 2, kind: input, shape index: {}]   ;;  %s6943_s3 = inlined_call_operand.hbm [shape: bf16[128,256], index: 3, kind: input, shape index: {}]   ;;  %s6944_s4 = inlined_call_operand.hbm [shape: f32[1,256], index: 4, kind: input, shape index: {}]   ;;  %s6945_s5 = inlined_call_operand.hbm [shape: bf16[256,256], index: 5, kind: input, shape index: {}]   ;;  %s6946_s6 = inlined_call_operand.hbm [shape: f32[1,256], index: 6, kind: input, shape index: {}]   ;;  %s6947_s7 = inlined_call_operand.hbm [shape: bf16[7,256,512], index: 7, kind: input, shape index: {}]   ;;  %s6948_s8 = inlined_call_operand.hbm [shape: f32[1,512], index: 8, kind: input, shape index: {}]   ;;  %s6949_s9 = inlined_call_operand.hbm [shape: bf16[512,128], index: 9, kind: input, shape index: {}]   ;;  %s6950_s10 = inlined_call_operand.hbm [shape: f32[1,128], index: 10, kind: input, shape index: {}]   ;;  %s6951_s11 = inlined_call_operand.hbm [shape: f32[16,128], index: 11, kind: output, shape index: {}]  }
   0x1   :  { %17 = vsyncpa [#allocation8], 0 }
   0x2   :  { %18 = vsyncpa [#allocation11], 0 }
   0x3   :  { %19 = vsyncpa [#allocation14], 0 }
   0x4   :  { %20 = vsyncpa [#allocation17], 0 }
   0x5   :  { %21 = vsyncpa [#allocation20], 0 }
   0x6   :  { %22 = vsyncpa [#allocation6], 0  ;;  %s6554_s17 = smov [#allocation7]   ;;  %s6555_s19 = smov [#allocation10]  }
   0x7   :  { %s41_s18 = sshll.u32 %s6554_s17, 4  ;;  %s63_s20 = sshll.u32 %s6555_s19, 4  ;;  %s42_s18 = int_to_ptr.vmem [resolvable:$true] %s41_s18  ;;  %s64_s20 = int_to_ptr.vmem [resolvable:$true] %s63_s20 }
   0x8   :  { %s6298_s23 = scalar_lea.hbm %s6942_s2, 32 }
   0x9   :  { %p6299_p0 = scmp.ne.s32.totalorder %s6942_s2, %s6298_s23  ;;  %p6302_p1 = scmp.lt.u32.totalorder %s6298_s23, %s6942_s2 }
   0xb   :  { %p6304_p2 = pnand %p6302_p1, %p6299_p0 }
   0xd   :  { %6307 = shalt.err (!%p6304_p2)
}
   0xe   :  { %s6308_s28 = scalar_lea.vmem %s42_s18, 32  ;;  %p6313_p4 = scmp.lt.s32.totalorder %s42_s18, %s42_s18 }
   0xf   :  { %p6309_p3 = scmp.ne.s32.totalorder %s42_s18, %s6308_s28  ;;  %p6314_p5 = scmp.lt.s32.totalorder %s6308_s28, %s6308_s28 }
  0x11   :  { %p6315_p6 = por %p6314_p5, %p6313_p4 }
  0x13   :  { %p6316_p7 = pnand %p6315_p6, %p6309_p3 }
  0x15   :  { %6319 = shalt.err (!%p6316_p7)
}
  0x16   :  { %44 = dma.hbm_to_vmem [thread:$0]  %s6942_s2, 32, %s42_s18, [#allocation8]  }
  0x17   :  { %s6320_s14 = scalar_lea.hbm %s6944_s4, 32 }
  0x18   :  { %p6321_p8 = scmp.ne.s32.totalorder %s6944_s4, %s6320_s14  ;;  %p6324_p9 = scmp.lt.u32.totalorder %s6320_s14, %s6944_s4 }
  0x1a   :  { %p6326_p10 = pnand %p6324_p9, %p6321_p8 }
  0x1c   :  { %6329 = shalt.err (!%p6326_p10)
}
  0x1d   :  { %s6330_s21 = scalar_lea.vmem %s64_s20, 32  ;;  %p6335_p12 = scmp.lt.s32.totalorder %s64_s20, %s64_s20 }
  0x1e   :  { %p6331_p11 = scmp.ne.s32.totalorder %s64_s20, %s6330_s21  ;;  %p6336_p13 = scmp.lt.s32.totalorder %s6330_s21, %s6330_s21 }
  0x20   :  { %p6337_p0 = por %p6336_p13, %p6335_p12 }
  0x22   :  { %p6338_p1 = pnand %p6337_p0, %p6331_p11 }
  0x24   :  { %6341 = shalt.err (!%p6338_p1)
}
  0x25   :  { %66 = dma.hbm_to_vmem [thread:$0]  %s6944_s4, 32, %s64_s20, [#allocation11]  }
  0x26   :  { %s6556_s22 = smov [#allocation13]   ;;  %s6557_s24 = smov [#allocation16]  }
  0x27   :  { %s85_s23 = sshll.u32 %s6556_s22, 4  ;;  %s107_s25 = sshll.u32 %s6557_s24, 4  ;;  %s86_s23 = int_to_ptr.vmem [resolvable:$true] %s85_s23  ;;  %s108_s25 = int_to_ptr.vmem [resolvable:$true] %s107_s25 }
  0x28   :  { %s6342_s28 = scalar_lea.hbm %s6946_s6, 32 }
  0x29   :  { %p6343_p2 = scmp.ne.s32.totalorder %s6946_s6, %s6342_s28  ;;  %p6346_p3 = scmp.lt.u32.totalorder %s6342_s28, %s6946_s6 }
  0x2b   :  { %p6348_p4 = pnand %p6346_p3, %p6343_p2 }
  0x2d   :  { %6351 = shalt.err (!%p6348_p4)
}
  0x2e   :  { %s6352_s4 = scalar_lea.vmem %s86_s23, 32  ;;  %p6357_p6 = scmp.lt.s32.totalorder %s86_s23, %s86_s23 }
  0x2f   :  { %p6353_p5 = scmp.ne.s32.totalorder %s86_s23, %s6352_s4  ;;  %p6358_p7 = scmp.lt.s32.totalorder %s6352_s4, %s6352_s4 }
  0x31   :  { %p6359_p8 = por %p6358_p7, %p6357_p6 }
  0x33   :  { %p6360_p9 = pnand %p6359_p8, %p6353_p5 }
  0x35   :  { %6363 = shalt.err (!%p6360_p9)
}
  0x36   :  { %88 = dma.hbm_to_vmem [thread:$0]  %s6946_s6, 32, %s86_s23, [#allocation14]  }
  0x37   :  { %s6364_s17 = scalar_lea.hbm %s6948_s8, 64 }
  0x38   :  { %p6365_p10 = scmp.ne.s32.totalorder %s6948_s8, %s6364_s17  ;;  %p6368_p11 = scmp.lt.u32.totalorder %s6364_s17, %s6948_s8 }
  0x3a   :  { %p6370_p12 = pnand %p6368_p11, %p6365_p10 }
  0x3c   :  { %6373 = shalt.err (!%p6370_p12)
}
  0x3d   :  { %s6374_s22 = scalar_lea.vmem %s108_s25, 64  ;;  %p6379_p0 = scmp.lt.s32.totalorder %s108_s25, %s108_s25 }
  0x3e   :  { %p6375_p13 = scmp.ne.s32.totalorder %s108_s25, %s6374_s22  ;;  %p6380_p1 = scmp.lt.s32.totalorder %s6374_s22, %s6374_s22 }
  0x40   :  { %p6381_p2 = por %p6380_p1, %p6379_p0 }
  0x42   :  { %p6382_p3 = pnand %p6381_p2, %p6375_p13 }
  0x44   :  { %6385 = shalt.err (!%p6382_p3)
}
  0x45   :  { %110 = dma.hbm_to_vmem [thread:$0]  %s6948_s8, 64, %s108_s25, [#allocation17]  }
  0x46   :  { %s6558_s24 = smov [#allocation4]   ;;  %s6559_s27 = smov [#allocation9]  }
  0x47   :  { %s31_s26 = sshll.u32 %s6558_s24, 4  ;;  %s50_s28 = sshll.u32 %s6559_s27, 4  ;;  %s32_s26 = int_to_ptr.vmem [resolvable:$true] %s31_s26  ;;  %s6686_s28 = int_to_ptr.vmem [resolvable:$true] %s50_s28 }
  0x48   :  { %s6386_s12 = scalar_lea.hbm %s6941_s1, 32 }
  0x49   :  { %p6387_p4 = scmp.ne.s32.totalorder %s6941_s1, %s6386_s12  ;;  %p6390_p5 = scmp.lt.u32.totalorder %s6386_s12, %s6941_s1 }
  0x4b   :  { %p6392_p6 = pnand %p6390_p5, %p6387_p4 }
  0x4d   :  { %6395 = shalt.err (!%p6392_p6)
}
  0x4e   :  { %s6396_s8 = scalar_lea.vmem %s32_s26, 32  ;;  %p6401_p8 = scmp.lt.s32.totalorder %s32_s26, %s32_s26 }
  0x4f   :  { %p6397_p7 = scmp.ne.s32.totalorder %s32_s26, %s6396_s8  ;;  %p6402_p9 = scmp.lt.s32.totalorder %s6396_s8, %s6396_s8 }
  0x51   :  { %p6403_p10 = por %p6402_p9, %p6401_p8 }
  0x53   :  { %p6404_p11 = pnand %p6403_p10, %p6397_p7 }
  0x55   :  { %6407 = shalt.err (!%p6404_p11)
}
  0x56   :  { %34 = dma.hbm_to_vmem [thread:$0]  %s6941_s1, 32, %s32_s26, [#allocation5]  }
  0x57   :  { %s6408_s19 = scalar_lea.hbm %s6943_s3, 2048 }
  0x58   :  { %p6409_p12 = scmp.ne.s32.totalorder %s6943_s3, %s6408_s19  ;;  %p6412_p13 = scmp.lt.u32.totalorder %s6408_s19, %s6943_s3 }
  0x5a   :  { %p6414_p0 = pnand %p6412_p13, %p6409_p12 }
  0x5c   :  { %6417 = shalt.err (!%p6414_p0)
}
  0x5d   :  { %s6418_s6 = scalar_lea.vmem %s6686_s28, 2048  ;;  %p6423_p2 = scmp.lt.s32.totalorder %s6686_s28, %s6686_s28 }
  0x5e   :  { %p6419_p1 = scmp.ne.s32.totalorder %s6686_s28, %s6418_s6  ;;  %p6424_p3 = scmp.lt.s32.totalorder %s6418_s6, %s6418_s6 }
  0x60   :  { %p6425_p4 = por %p6424_p3, %p6423_p2 }
  0x62   :  { %p6426_p5 = pnand %p6425_p4, %p6419_p1 }
  0x64   :  { %6429 = shalt.err (!%p6426_p5)
}
  0x65   :  { %s6560_s1 = smov 128   ;;  %s6561_s23 = smov 8  }
  0x66   :  { %56 = dma.hbm_to_vmem [thread:$0]  %s6943_s3, 2048, %s6686_s28, [#allocation8], %s6560_s1, %s6560_s1, %s6561_s23  }
  0x67   :  { %s6562_s27 = smov [#allocation12]   ;;  %s6563_s30 = smov [#allocation15]  }
  0x68   :  { %s72_s29 = sshll.u32 %s6562_s27, 4  ;;  %s94_s12 = sshll.u32 %s6563_s30, 4  ;;  %s73_s29 = int_to_ptr.vmem [resolvable:$true] %s72_s29  ;;  %s6720_s12 = int_to_ptr.vmem [resolvable:$true] %s94_s12 }
  0x69   :  { %s6430_s20 = scalar_lea.hbm %s6945_s5, 4096 }
  0x6a   :  { %p6431_p6 = scmp.ne.s32.totalorder %s6945_s5, %s6430_s20  ;;  %p6434_p7 = scmp.lt.u32.totalorder %s6430_s20, %s6945_s5 }
  0x6c   :  { %p6436_p8 = pnand %p6434_p7, %p6431_p6 }
  0x6e   :  { %6439 = shalt.err (!%p6436_p8)
}
  0x6f   :  { %s6440_s3 = scalar_lea.vmem %s73_s29, 4096  ;;  %p6445_p10 = scmp.lt.s32.totalorder %s73_s29, %s73_s29 }
  0x70   :  { %p6441_p9 = scmp.ne.s32.totalorder %s73_s29, %s6440_s3  ;;  %p6446_p11 = scmp.lt.s32.totalorder %s6440_s3, %s6440_s3 }
  0x72   :  { %p6447_p12 = por %p6446_p11, %p6445_p10 }
  0x74   :  { %p6448_p13 = pnand %p6447_p12, %p6441_p9 }
  0x76   :  { %6451 = shalt.err (!%p6448_p13)
}
  0x77   :  { %78 = dma.hbm_to_vmem [thread:$0]  %s6945_s5, 4096, %s73_s29, [#allocation11], %s6560_s1, %s6560_s1, %s6561_s23  }
  0x78   :  { %s6452_s21 = scalar_lea.hbm %s6947_s7, 57344 }
  0x79   :  { %p6453_p0 = scmp.ne.s32.totalorder %s6947_s7, %s6452_s21  ;;  %p6456_p1 = scmp.lt.u32.totalorder %s6452_s21, %s6947_s7 }
  0x7b   :  { %p6458_p2 = pnand %p6456_p1, %p6453_p0 }
  0x7d   :  { %6461 = shalt.err (!%p6458_p2)
}
  0x7e   :  { %s6462_s24 = scalar_lea.vmem %s6720_s12, 57344  ;;  %p6467_p4 = scmp.lt.s32.totalorder %s6720_s12, %s6720_s12 }
  0x7f   :  { %p6463_p3 = scmp.ne.s32.totalorder %s6720_s12, %s6462_s24  ;;  %p6468_p5 = scmp.lt.s32.totalorder %s6462_s24, %s6462_s24 }
  0x81   :  { %p6469_p6 = por %p6468_p5, %p6467_p4 }
  0x83   :  { %p6470_p7 = pnand %p6469_p6, %p6463_p3 }
  0x85   :  { %6473 = shalt.err (!%p6470_p7)
}
  0x86   :  { %s6564_s5 = smov 256   ;;  %s6565_s26 = smov 16  }
  0x87   :  { %100 = dma.hbm_to_vmem [thread:$0]  %s6947_s7, 57344, %s6720_s12, [#allocation14], %s6564_s5, %s6564_s5, %s6565_s26  }
  0x88   :  { %s6566_s30 = smov [#allocation18]   ;;  %s6474_s14 = scalar_lea.hbm %s6949_s9, 4096 }
  0x89   :  { %s116_s13 = sshll.u32 %s6566_s30, 4  ;;  %p6475_p8 = scmp.ne.s32.totalorder %s6949_s9, %s6474_s14  ;;  %s117_s13 = int_to_ptr.vmem [resolvable:$true] %s116_s13 }
  0x8a   :  { %p6478_p9 = scmp.lt.u32.totalorder %s6474_s14, %s6949_s9 }
  0x8c   :  { %p6480_p10 = pnand %p6478_p9, %p6475_p8 }
  0x8e   :  { %6483 = shalt.err (!%p6480_p10)
}
  0x8f   :  { %s6484_s28 = scalar_lea.vmem %s117_s13, 4096  ;;  %p6489_p12 = scmp.lt.s32.totalorder %s117_s13, %s117_s13 }
  0x90   :  { %p6485_p11 = scmp.ne.s32.totalorder %s117_s13, %s6484_s28  ;;  %p6490_p13 = scmp.lt.s32.totalorder %s6484_s28, %s6484_s28 }
  0x92   :  { %p6491_p0 = por %p6490_p13, %p6489_p12 }
  0x94   :  { %p6492_p1 = pnand %p6491_p0, %p6485_p11 }
  0x96   :  { %6495 = shalt.err (!%p6492_p1)
}
  0x97   :  { %s6567_s7 = smov 64   ;;  %s6568_s12 = smov 4  }
  0x98   :  { %122 = dma.hbm_to_vmem [thread:$0]  %s6949_s9, 4096, %s117_s13, [#allocation17], %s6567_s7, %s6567_s7, %s6568_s12  }
  0x99   :  { %s6569_s19 = smov [#allocation19]   ;;  %s6496_s22 = scalar_lea.hbm %s6950_s10, 16 }
  0x9a   :  { %s129_s21 = sshll.u32 %s6569_s19, 4  ;;  %p6497_p2 = scmp.ne.s32.totalorder %s6950_s10, %s6496_s22  ;;  %s130_s21 = int_to_ptr.vmem [resolvable:$true] %s129_s21 }
  0x9b   :  { %p6500_p3 = scmp.lt.u32.totalorder %s6496_s22, %s6950_s10 }
  0x9d   :  { %p6502_p4 = pnand %p6500_p3, %p6497_p2 }
  0x9f   :  { %6505 = shalt.err (!%p6502_p4)
}
  0xa0   :  { %s6506_s27 = scalar_lea.vmem %s130_s21, 16  ;;  %s6510_s9 = scalar_lea.vmem %s130_s21, 32 }
  0xa1   :  { %p6507_p5 = scmp.ne.s32.totalorder %s130_s21, %s6506_s27  ;;  %p6511_p6 = scmp.lt.s32.totalorder %s130_s21, %s130_s21 }
  0xa2   :  { %p6512_p7 = scmp.lt.s32.totalorder %s6510_s9, %s6506_s27 }
  0xa4   :  { %p6513_p8 = por %p6512_p7, %p6511_p6 }
  0xa6   :  { %p6514_p9 = pnand %p6513_p8, %p6507_p5 }
  0xa8   :  { %6517 = shalt.err (!%p6514_p9)
}
  0xa9   :  { %132 = dma.hbm_to_vmem [thread:$0]  %s6950_s10, 16, %s130_s21, [#allocation20]  }
  0xaa   :  { %6540 = dma.done.wait [#allocation5], 32  }
  0xab   :  { %6541 = vsyncadd [#allocation5], 4294967264 }
  0xac   :  { %6542 = dma.done.wait [#allocation8], 2080  }
  0xad   :  { %6543 = vsyncadd [#allocation8], 4294965216 }
  0xae   :  { %6544 = dma.done.wait [#allocation11], 4128  }
  0xaf   :  { %6545 = vsyncadd [#allocation11], 4294963168 }
  0xb0   :  { %6546 = dma.done.wait [#allocation14], 57376  }
  0xb1   :  { %6547 = vsyncadd [#allocation14], 4294909920 }
  0xb2   :  { %6548 = dma.done.wait [#allocation17], 4160  }
  0xb3   :  { %6549 = vsyncadd [#allocation17], 4294963136 }
  0xb4   :  { %6550 = dma.done.wait [#allocation20], 16  }
  0xb5   :  { %6551 = vsyncadd [#allocation20], 4294967280  ;;  %v6570_v0 = vmov 0   ;;  %v6571_v1 = vmov 1   ;;  %v6783_v2 = vld [vmem:[%s6940_s0] sm:$0xff]  ;;  %v165_v3 = vld [vmem:[%s6940_s0 + $0x8] sm:$0xff] }
  0xb6   :  { %5503 = vset.pattern.permute.xlu0 %v6570_v0  ;;  %5504 = vset.pattern.permute.xlu1 %v6571_v1  ;;  %v5514_v4 = vld [vmem:[#allocation9 + $0x4] ss:$8 sps:$4 sm:$0xff]   ;;  %v5516_v5 = vld [vmem:[#allocation9] ss:$8 sps:$4 sm:$0xff]   ;;  %v5517_v6 = vld [vmem:[#allocation9 + $0x14] ss:$8 sps:$4 sm:$0xff]  }
  0xb7   :  { %497 = vmatprep.mubr.bf16.mxu0 %v6570_v0  ;;  %170 = vperm.xlu0 %5503, %v6783_v2   ;;  %v5519_v7 = vld [vmem:[#allocation9 + $0x10] ss:$8 sps:$4 sm:$0xff]   ;;  %v5520_v8 = vld [vmem:[#allocation9 + $0x24] ss:$8 sps:$4 sm:$0xff]   ;;  %v5522_v9 = vld [vmem:[#allocation9 + $0x20] ss:$8 sps:$4 sm:$0xff]  }
  0xb8   :  { %197 = vperm.xlu1 %5504, %v6783_v2   ;;  %465 = vmatprep.subr.bf16.mxu0 %v5514_v4  ;;  %v5523_v10 = vld [vmem:[#allocation9 + $0x34] ss:$8 sps:$4 sm:$0xff]   ;;  %v6572_v11 = vmov 2   ;;  %v5525_v12 = vld [vmem:[#allocation9 + $0x30] ss:$8 sps:$4 sm:$0xff]   ;;  %v6573_v15 = vmov 3  }
  0xb9   :  { %466 = vmatpush1.bf16.msra.mxu0 %v5516_v5  ;;  %v5526_v13 = vld [vmem:[#allocation9 + $0x44] ss:$8 sps:$4 sm:$0xff]   ;;  %v5528_v14 = vld [vmem:[#allocation9 + $0x40] ss:$8 sps:$4 sm:$0xff]   ;;  %v5529_v16 = vld [vmem:[#allocation9 + $0x54] ss:$8 sps:$4 sm:$0xff]  }
  0xba   :  { %467 = vmatprep.subr.bf16.mxu0 %v5517_v6  ;;  %v5531_v17 = vld [vmem:[#allocation9 + $0x50] ss:$8 sps:$4 sm:$0xff]   ;;  %v5532_v18 = vld [vmem:[#allocation9 + $0x64] ss:$8 sps:$4 sm:$0xff]   ;;  %v5534_v19 = vld [vmem:[#allocation9 + $0x60] ss:$8 sps:$4 sm:$0xff]  }
  0xbb   :  { %175 = vperm.xlu0 %5503, %v165_v3   ;;  %v6574_v20 = vmov 4   ;;  %v6575_v21 = vmov 5   ;;  %v5535_v22 = vld [vmem:[#allocation9 + $0x74] ss:$8 sps:$4 sm:$0xff]   ;;  %v5537_v23 = vld [vmem:[#allocation9 + $0x70] ss:$8 sps:$4 sm:$0xff]  }
  0xbc   :  { %201 = vperm.xlu1 %5504, %v165_v3   ;;  %v6576_v24 = vmov 6   ;;  %v5538_v25 = vld [vmem:[#allocation12 + $0x4] ss:$8 sps:$4 sm:$0xff]   ;;  %v5540_v26 = vld [vmem:[#allocation12] ss:$8 sps:$4 sm:$0xff]   ;;  %s6577_s0 = smov [#allocation21]  }
  0xbd   :  { %468 = vmatpush1.bf16.msra.mxu0 %v5519_v7  ;;  %v5541_v27 = vld [vmem:[#allocation12 + $0x14] ss:$8 sps:$4 sm:$0xff]   ;;  %814 = vmatprep.subr.bf16.mxu1 %v5538_v25  ;;  %v5543_v28 = vld [vmem:[#allocation12 + $0x10] ss:$8 sps:$4 sm:$0xff]   ;;  %v5544_v29 = vld [vmem:[#allocation12 + $0x24] ss:$8 sps:$4 sm:$0xff]  }
  0xbe   :  { %469 = vmatprep.subr.bf16.mxu0 %v5520_v8  ;;  %815 = vmatpush1.bf16.msra.mxu1 %v5540_v26  ;;  %v5546_v30 = vld [vmem:[#allocation12 + $0x20] ss:$8 sps:$4 sm:$0xff]   ;;  %v5547_v31 = vld [vmem:[#allocation12 + $0x34] ss:$8 sps:$4 sm:$0xff]   ;;  %v5549_v32 = vld [vmem:[#allocation12 + $0x30] ss:$8 sps:$4 sm:$0xff]  }
  0xbf   :  { %5505 = vset.pattern.permute.xlu0 %v6572_v11  ;;  %816 = vmatprep.subr.bf16.mxu1 %v5541_v27  ;;  %v5550_v33 = vld [vmem:[#allocation12 + $0x44] ss:$8 sps:$4 sm:$0xff]   ;;  %v5552_v34 = vld [vmem:[#allocation12 + $0x40] ss:$8 sps:$4 sm:$0xff]   ;;  %v5553_v35 = vld [vmem:[#allocation12 + $0x54] ss:$8 sps:$4 sm:$0xff]  }
  0xc0   :  { %5506 = vset.pattern.permute.xlu1 %v6572_v11  ;;  %223 = vperm.xlu0 %5505, %v6783_v2   ;;  %v5555_v36 = vld [vmem:[#allocation12 + $0x50] ss:$8 sps:$4 sm:$0xff]   ;;  %v5556_v37 = vld [vmem:[#allocation12 + $0x64] ss:$8 sps:$4 sm:$0xff]   ;;  %v5558_v38 = vld [vmem:[#allocation12 + $0x60] ss:$8 sps:$4 sm:$0xff]  }
  0xc1   :  { %227 = vperm.xlu1 %5506, %v165_v3   ;;  %470 = vmatpush1.bf16.msra.mxu0 %v5522_v9  ;;  %v5559_v39 = vld [vmem:[#allocation12 + $0x74] ss:$8 sps:$4 sm:$0xff]   ;;  %v5561_v40 = vld [vmem:[#allocation12 + $0x70] ss:$8 sps:$4 sm:$0xff]   ;;  %v5562_v41 = vld [vmem:[#allocation12 + $0x84] ss:$8 sps:$4 sm:$0xff]  }
  0xc2   :  { %471 = vmatprep.subr.bf16.mxu0 %v5523_v10  ;;  %817 = vmatpush1.bf16.msra.mxu1 %v5543_v28  ;;  %v5564_v42 = vld [vmem:[#allocation12 + $0x80] ss:$8 sps:$4 sm:$0xff]   ;;  %v5565_v43 = vld [vmem:[#allocation12 + $0x94] ss:$8 sps:$4 sm:$0xff]   ;;  %v5567_v44 = vld [vmem:[#allocation12 + $0x90] ss:$8 sps:$4 sm:$0xff]  }
  0xc3   :  { %818 = vmatprep.subr.bf16.mxu1 %v5544_v29  ;;  %v5568_v45 = vld [vmem:[#allocation12 + $0xa4] ss:$8 sps:$4 sm:$0xff]   ;;  %v5570_v46 = vld [vmem:[#allocation12 + $0xa0] ss:$8 sps:$4 sm:$0xff]   ;;  %v5571_v47 = vld [vmem:[#allocation12 + $0xb4] ss:$8 sps:$4 sm:$0xff]  }
  0xc4   :  { %5508 = vset.pattern.permute.xlu0 %v6573_v15  ;;  %v5573_v48 = vld [vmem:[#allocation12 + $0xb0] ss:$8 sps:$4 sm:$0xff]   ;;  %v5574_v49 = vld [vmem:[#allocation12 + $0xc4] ss:$8 sps:$4 sm:$0xff]   ;;  %v5576_v50 = vld [vmem:[#allocation12 + $0xc0] ss:$8 sps:$4 sm:$0xff]  }
  0xc5   :  { %5507 = vset.pattern.permute.xlu1 %v6573_v15  ;;  %472 = vmatpush1.bf16.msra.mxu0 %v5525_v12  ;;  %v5577_v51 = vld [vmem:[#allocation12 + $0xd4] ss:$8 sps:$4 sm:$0xff]   ;;  %v4844_v52 = vld [vmem:[#allocation4] ss:$0 sm:$0xff]  ;;  %s4827_s14 = sshll.u32 %s6577_s0, 4  ;;  %s4828_s14 = int_to_ptr.vmem [resolvable:$true] %s4827_s14 }
  0xc6   :  { %249 = vperm.xlu1 %5507, %v6783_v2   ;;  %253 = vperm.xlu0 %5508, %v165_v3   ;;  %v4845_v53 = vld [vmem:[#allocation7] ss:$0 sm:$0xff]  ;;  %s6518_s8 = scalar_lea.vmem %s4828_s14, 256  ;;  %p6523_p11 = scmp.lt.s32.totalorder %s4828_s14, %s4828_s14 }
  0xc7   :  { %473 = vmatprep.subr.bf16.mxu0 %v5526_v13  ;;  %819 = vmatpush1.bf16.msra.mxu1 %v5546_v30  ;;  %v4854_v30 = vld [vmem:[#allocation4 + $0x1] ss:$0 sm:$0xff]  ;;  %p6519_p10 = scmp.ne.s32.totalorder %s4828_s14, %s6518_s8  ;;  %p6524_p12 = scmp.lt.s32.totalorder %s6518_s8, %s6518_s8 }
  0xc8   :  { %820 = vmatprep.subr.bf16.mxu1 %v5547_v31 }
  0xc9   :  { %474 = vmatpush1.bf16.msra.mxu0 %v5528_v14  ;;  %p6525_p13 = por %p6524_p12, %p6523_p11 }
  0xca   :  { %475 = vmatprep.subr.bf16.mxu0 %v5529_v16  ;;  %5509 = vset.pattern.permute.xlu1 %v6574_v20 }
  0xcb   :  { %5510 = vset.pattern.permute.xlu0 %v6575_v21  ;;  %275 = vperm.xlu1 %5509, %v6783_v2   ;;  %p6526_p0 = pnand %p6525_p13, %p6519_p10 }
  0xcc   :  { %301 = vperm.xlu0 %5510, %v6783_v2   ;;  %821 = vmatpush1.bf16.msra.mxu1 %v5549_v32 }
  0xcd   :  { %476 = vmatpush1.bf16.msra.mxu0 %v5531_v17  ;;  %822 = vmatprep.subr.bf16.mxu1 %v5550_v33 }
  0xce   :  { %477 = vmatprep.subr.bf16.mxu0 %v5532_v18 }
  0xcf   :  { %279 = vperm.xlu1 %5509, %v165_v3  }
  0xd0   :  { %5513 = vset.pattern.permute.xlu0 %v6576_v24  ;;  %823 = vmatpush1.bf16.msra.mxu1 %v5552_v34 }
  0xd1   :  { %478 = vmatpush1.bf16.msra.mxu0 %v5534_v19  ;;  %331 = vperm.xlu0 %5513, %v165_v3  }
  0xd2   :  { %479 = vmatprep.subr.bf16.mxu0 %v5535_v22  ;;  %824 = vmatprep.subr.bf16.mxu1 %v5553_v35 }
  0xd3   :  { %5511 = vset.pattern.permute.xlu1 %v6575_v21 }
  0xd4   :  { %305 = vperm.xlu1 %5511, %v165_v3   ;;  %825 = vmatpush1.bf16.msra.mxu1 %v5555_v36  ;;  %v4855_v36 = vld [vmem:[#allocation7 + $0x1] ss:$0 sm:$0xff] }
  0xd5   :  { %480 = vmatpush1.bf16.msra.mxu0 %v5537_v23  ;;  %826 = vmatprep.subr.bf16.mxu1 %v5556_v37 }
  0xd8   :  { %5512 = vset.pattern.permute.xlu1 %v6576_v24  ;;  %827 = vmatpush1.bf16.msra.mxu1 %v5558_v38 }
  0xd9   :  { %327 = vperm.xlu1 %5512, %v6783_v2   ;;  %828 = vmatprep.subr.bf16.mxu1 %v5559_v39 }
  0xdc   :  { %829 = vmatpush1.bf16.msra.mxu1 %v5561_v40 }
  0xdd   :  { %830 = vmatprep.subr.bf16.mxu1 %v5562_v41 }
  0xe0   :  { %831 = vmatpush1.bf16.msra.mxu1 %v5564_v42 }
  0xe1   :  { %832 = vmatprep.subr.bf16.mxu1 %v5565_v43 }
  0xe4   :  { %833 = vmatpush1.bf16.msra.mxu1 %v5567_v44 }
  0xe5   :  { %834 = vmatprep.subr.bf16.mxu1 %v5568_v45 }
  0xe8   :  { %835 = vmatpush1.bf16.msra.mxu1 %v5570_v46 }
  0xe9   :  { %836 = vmatprep.subr.bf16.mxu1 %v5571_v47 }
  0xec   :  { %837 = vmatpush1.bf16.msra.mxu1 %v5573_v48 }
  0xed   :  { %838 = vmatprep.subr.bf16.mxu1 %v5574_v49 }
  0xf0   :  { %839 = vmatpush1.bf16.msra.mxu1 %v5576_v50 }
  0xf1   :  { %840 = vmatprep.subr.bf16.mxu1 %v5577_v51 }
 0x136   :  { %v171_v54 = vpop.permute.xlu0 %170 }
 0x137   :  { %v198_v55 = vpop.permute.xlu1 %197  ;;  %v182_v56 = vmul.f32 %v4844_v52, %v171_v54 }
 0x138   :  { %v208_v61 = vmul.f32 %v4844_v52, %v198_v55  ;;  %v5579_v55 = vld [vmem:[#allocation12 + $0xd0] ss:$8 sps:$4 sm:$0xff]  }
 0x139   :  { %v188_v59 = vadd.f32 %v4845_v53, %v182_v56  ;;  %841 = vmatpush1.bf16.msra.mxu1 %v5579_v55 }
 0x13a   :  { %v176_v57 = vpop.permute.xlu0 %175  ;;  %v214_v3 = vadd.f32 %v4845_v53, %v208_v61  ;;  %v5588_v61 = vld [vmem:[#allocation15 + $0x4] ss:$16 sps:$4 sm:$0xff]  }
 0x13b   :  { %v202_v58 = vpop.permute.xlu1 %201  ;;  %v183_v60 = vmul.f32 %v4844_v52, %v176_v57  ;;  %v190_v1 = vmax.f32 %v188_v59, 0.0  ;;  %v5580_v57 = vld [vmem:[#allocation12 + $0xe4] ss:$8 sps:$4 sm:$0xff]   ;;  %v5583_v59 = vld [vmem:[#allocation12 + $0xf4] ss:$8 sps:$4 sm:$0xff]   ;;  %1343 = vmatprep.subr.bf16.mxu0 %v5588_v61 }
 0x13c   :  { %v209_v62 = vmul.f32 %v4844_v52, %v202_v58  ;;  %v216_v8 = vmax.f32 %v214_v3, 0.0  ;;  %v5582_v58 = vld [vmem:[#allocation12 + $0xe0] ss:$8 sps:$4 sm:$0xff]   ;;  %842 = vmatprep.subr.bf16.mxu1 %v5580_v57 }
 0x13d   :  { %v189_v63 = vadd.f32 %v4845_v53, %v183_v60  ;;  %843 = vmatpush1.bf16.msra.mxu1 %v5582_v58  ;;  %v5585_v60 = vld [vmem:[#allocation12 + $0xf0] ss:$8 sps:$4 sm:$0xff]  }
 0x13e   :  { %v215_v4 = vadd.f32 %v4845_v53, %v209_v62  ;;  %844 = vmatprep.subr.bf16.mxu1 %v5583_v59  ;;  %v5591_v62 = vld [vmem:[#allocation15 + $0xc] ss:$16 sps:$4 sm:$0xff]   ;;  %v5598_v3 = vld [vmem:[#allocation15 + $0x40] ss:$16 sps:$4 sm:$0xff]   ;;  %v5595_v59 = vld [vmem:[#allocation15 + $0x28] ss:$16 sps:$4 sm:$0xff]  }
 0x13f   :  { %v191_v2 = vmax.f32 %v189_v63, 0.0  ;;  %v224_v6 = vpop.permute.xlu0 %223  ;;  %v5594_v63 = vld [vmem:[#allocation15 + $0x24] ss:$16 sps:$4 sm:$0xff]  }
 0x140   :  { %v228_v5 = vpop.permute.xlu1 %227  ;;  %v217_v9 = vmax.f32 %v215_v4, 0.0  ;;  %v234_v11 = vmul.f32 %v4844_v52, %v224_v6  ;;  %v5606_v4 = vld [vmem:[#allocation15 + $0x64] ss:$16 sps:$4 sm:$0xff]  }
 0x141   :  { %v192_v7 = vpack.c.bf16 %v191_v2, %v190_v1  ;;  %v235_v10 = vmul.f32 %v4844_v52, %v228_v5  ;;  %845 = vmatpush1.bf16.msra.mxu1 %v5585_v60  ;;  %v5592_v1 = vld [vmem:[#allocation15 + $0x20] ss:$16 sps:$4 sm:$0xff]   ;;  %v5600_v2 = vld [vmem:[#allocation15 + $0x44] ss:$16 sps:$4 sm:$0xff]  }
 0x142   :  { %v218_v12 = vpack.c.bf16 %v217_v9, %v216_v8  ;;  %v240_v14 = vadd.f32 %v4845_v53, %v234_v11  ;;  %1386 = vmatprep.subr.bf16.mxu1 %v5591_v62  ;;  %v5604_v5 = vld [vmem:[#allocation15 + $0x60] ss:$16 sps:$4 sm:$0xff]   ;;  %v5612_v6 = vld [vmem:[#allocation15 + $0x84] ss:$16 sps:$4 sm:$0xff]  }
 0x143   :  { %498 = vmatmul.mubr.bf16.vlgmr.msra.gmra.mrb[0].mxu0 %v192_v7  ;;  %v241_v13 = vadd.f32 %v4845_v53, %v235_v10  ;;  %v5610_v7 = vld [vmem:[#allocation15 + $0x80] ss:$16 sps:$4 sm:$0xff]   ;;  %v5618_v8 = vld [vmem:[#allocation15 + $0xa4] ss:$16 sps:$4 sm:$0xff]  }
 0x144   :  { %507 = vmatprep.mubr.bf16.mxu0 %v6570_v0  ;;  %v242_v18 = vmax.f32 %v240_v14, 0.0  ;;  %v5616_v9 = vld [vmem:[#allocation15 + $0xa0] ss:$16 sps:$4 sm:$0xff]   ;;  %v5624_v10 = vld [vmem:[#allocation15 + $0xc4] ss:$16 sps:$4 sm:$0xff]  }
 0x145   :  { %v250_v15 = vpop.permute.xlu1 %249  ;;  %v254_v16 = vpop.permute.xlu0 %253  ;;  %v243_v17 = vmax.f32 %v241_v13, 0.0  ;;  %v5622_v11 = vld [vmem:[#allocation15 + $0xc0] ss:$16 sps:$4 sm:$0xff]   ;;  %v5636_v14 = vld [vmem:[#allocation15 + $0x104] ss:$16 sps:$4 sm:$0xff]  }
 0x146   :  { %v260_v19 = vmul.f32 %v4844_v52, %v250_v15  ;;  %v261_v20 = vmul.f32 %v4844_v52, %v254_v16  ;;  %v5628_v13 = vld [vmem:[#allocation15 + $0xe0] ss:$16 sps:$4 sm:$0xff]   ;;  %v5642_v16 = vld [vmem:[#allocation15 + $0x124] ss:$16 sps:$4 sm:$0xff]  }
 0x147   :  { %v244_v22 = vpack.c.bf16 %v243_v17, %v242_v18  ;;  %v5634_v15 = vld [vmem:[#allocation15 + $0x100] ss:$16 sps:$4 sm:$0xff]   ;;  %v5648_v18 = vld [vmem:[#allocation15 + $0x144] ss:$16 sps:$4 sm:$0xff]  }
 0x148   :  { %v266_v23 = vadd.f32 %v4845_v53, %v260_v19  ;;  %v267_v24 = vadd.f32 %v4845_v53, %v261_v20  ;;  %v5640_v17 = vld [vmem:[#allocation15 + $0x120] ss:$16 sps:$4 sm:$0xff]   ;;  %v5654_v20 = vld [vmem:[#allocation15 + $0x164] ss:$16 sps:$4 sm:$0xff]  }
 0x149   :  { %v5646_v19 = vld [vmem:[#allocation15 + $0x140] ss:$16 sps:$4 sm:$0xff]  }
 0x14a   :  { %v276_v21 = vpop.permute.xlu1 %275  ;;  %v268_v26 = vmax.f32 %v266_v23, 0.0  ;;  %v269_v27 = vmax.f32 %v267_v24, 0.0  ;;  %v5660_v23 = vld [vmem:[#allocation15 + $0x184] ss:$16 sps:$4 sm:$0xff]  }
 0x14b   :  { %508 = vmatmul.mubr.bf16.gmra.mrb[4].mxu0 %v218_v12  ;;  %v286_v28 = vmul.f32 %v4844_v52, %v276_v21  ;;  %v302_v35 = vpop.permute.xlu0 %301  ;;  %v5630_v12 = vld [vmem:[#allocation15 + $0xe4] ss:$16 sps:$4 sm:$0xff]   ;;  %v5652_v21 = vld [vmem:[#allocation15 + $0x160] ss:$16 sps:$4 sm:$0xff]  }
 0x14c   :  { %517 = vmatprep.mubr.bf16.mxu0 %v6570_v0  ;;  %v270_v32 = vpack.c.bf16 %v269_v27, %v268_v26  ;;  %v312_v40 = vmul.f32 %v4854_v30, %v302_v35  ;;  %v5666_v24 = vld [vmem:[#allocation15 + $0x1a4] ss:$16 sps:$4 sm:$0xff]   ;;  %v375_v26 = vlaneseq }
 0x14d   :  { %v292_v31 = vadd.f32 %v4845_v53, %v286_v28 }
 0x14e   :  { %v280_v25 = vpop.permute.xlu1 %279  ;;  %v318_v42 = vadd.f32 %v4855_v36, %v312_v40  ;;  %v6801_v27 = vshrl.u32 %v375_v26, 7 }
 0x14f   :  { %v287_v29 = vmul.f32 %v4844_v52, %v280_v25  ;;  %v294_v37 = vmax.f32 %v292_v31, 0.0  ;;  %v5664_v25 = vld [vmem:[#allocation15 + $0x1a0] ss:$16 sps:$4 sm:$0xff]  }
 0x150   :  { %v320_v45 = vmax.f32 %v318_v42, 0.0  ;;  %v332_v48 = vpop.permute.xlu0 %331  ;;  %v6804_v28 = vsub.s32 0, %v6801_v27 }
 0x151   :  { %v293_v33 = vadd.f32 %v4845_v53, %v287_v29  ;;  %v339_v50 = vmul.f32 %v4854_v30, %v332_v48  ;;  %v373_v29 = vld [vmem:[#allocation10] sm:$0x3]  ;;  %v5589_v48 = vld [vmem:[#allocation15 + $0x8] ss:$16 sps:$4 sm:$0xff]  }
 0x152   :  { %v6810_v31 = vrot.slane %v373_v29, %v6804_v28 }
 0x153   :  { %518 = vmatmul.mubr.bf16.gmra.mrb[8].mxu0 %v244_v22  ;;  %v306_v34 = vpop.permute.xlu1 %305  ;;  %v295_v38 = vmax.f32 %v293_v33, 0.0  ;;  %v345_v52 = vadd.f32 %v4855_v36, %v339_v50  ;;  %v5658_v22 = vld [vmem:[#allocation15 + $0x180] ss:$16 sps:$4 sm:$0xff]  }
 0x154   :  { %527 = vmatprep.mubr.bf16.mxu0 %v6570_v0  ;;  %v313_v39 = vmul.f32 %v4854_v30, %v306_v34 }
 0x155   :  { %v296_v43 = vpack.c.bf16 %v295_v38, %v294_v37  ;;  %v347_v54 = vmax.f32 %v345_v52, 0.0 }
 0x156   :  { %v319_v41 = vadd.f32 %v4855_v36, %v313_v39 }
 0x158   :  { %v321_v44 = vmax.f32 %v319_v41, 0.0  ;;  %v328_v47 = vpop.permute.xlu1 %327 }
 0x159   :  { %v338_v49 = vmul.f32 %v4854_v30, %v328_v47  ;;  %v6807_v30 = vsub.s32 1, %v6801_v27 }
 0x15a   :  { %v322_v46 = vpack.c.bf16 %v321_v44, %v320_v45 }
 0x15b   :  { %528 = vmatmul.mubr.bf16.gmra.mrb[12].mxu0 %v270_v32  ;;  %v344_v51 = vadd.f32 %v4855_v36, %v338_v49  ;;  %v6813_v32 = vrot.slane %v373_v29, %v6807_v30 }
 0x15c   :  { %537 = vmatprep.mubr.bf16.mxu0 %v6570_v0 }
 0x15d   :  { %v346_v53 = vmax.f32 %v344_v51, 0.0  ;;  %v5597_v51 = vld [vmem:[#allocation15 + $0x2c] ss:$16 sps:$4 sm:$0xff]  }
 0x15f   :  { %v348_v56 = vpack.c.bf16 %v347_v54, %v346_v53 }
 0x163   :  { %538 = vmatmul.mubr.bf16.gmra.mrb[16].mxu0 %v296_v43 }
 0x164   :  { %547 = vmatprep.mubr.bf16.mxu0 %v6570_v0 }
 0x16b   :  { %548 = vmatmul.mubr.bf16.gmra.mrb[20].mxu0 %v322_v46 }
 0x16c   :  { %557 = vmatprep.mubr.bf16.mxu0 %v6570_v0  ;;  %v5586_v0 = vld [vmem:[#allocation15] ss:$16 sps:$4 sm:$0xff]  }
 0x16d   :  { %1344 = vmatpush1.bf16.msra.mxu0 %v5586_v0  ;;  %v5603_v0 = vld [vmem:[#allocation15 + $0x4c] ss:$16 sps:$4 sm:$0xff]  }
 0x16e   :  { %1345 = vmatprep.subr.bf16.mxu0 %v5594_v63 }
 0x171   :  { %1346 = vmatpush1.bf16.msra.mxu0 %v5592_v1 }
 0x172   :  { %1347 = vmatprep.subr.bf16.mxu0 %v5600_v2  ;;  %v5601_v2 = vld [vmem:[#allocation15 + $0x48] ss:$16 sps:$4 sm:$0xff]  }
 0x173   :  { %558 = vmatmul.mubr.bf16.gmra.mrb[24].mxu0 %v348_v56 }
 0x175   :  { %1348 = vmatpush1.bf16.msra.mxu0 %v5598_v3 }
 0x176   :  { %1349 = vmatprep.subr.bf16.mxu0 %v5606_v4 }
 0x179   :  { %1350 = vmatpush1.bf16.msra.mxu0 %v5604_v5  ;;  %v5609_v5 = vld [vmem:[#allocation15 + $0x6c] ss:$16 sps:$4 sm:$0xff]  }
 0x17a   :  { %1351 = vmatprep.subr.bf16.mxu0 %v5612_v6 }
 0x17d   :  { %1352 = vmatpush1.bf16.msra.mxu0 %v5610_v7 }
 0x17e   :  { %1353 = vmatprep.subr.bf16.mxu0 %v5618_v8 }
 0x181   :  { %1354 = vmatpush1.bf16.msra.mxu0 %v5616_v9 }
 0x182   :  { %1355 = vmatprep.subr.bf16.mxu0 %v5624_v10 }
 0x185   :  { %1356 = vmatpush1.bf16.msra.mxu0 %v5622_v11 }
 0x186   :  { %1357 = vmatprep.subr.bf16.mxu0 %v5630_v12 }
 0x189   :  { %1358 = vmatpush1.bf16.msra.mxu0 %v5628_v13  ;;  %v5607_v13 = vld [vmem:[#allocation15 + $0x68] ss:$16 sps:$4 sm:$0xff]  }
 0x18a   :  { %1359 = vmatprep.subr.bf16.mxu0 %v5636_v14 }
 0x18d   :  { %1360 = vmatpush1.bf16.msra.mxu0 %v5634_v15  ;;  %v5615_v15 = vld [vmem:[#allocation15 + $0x8c] ss:$16 sps:$4 sm:$0xff]  }
 0x18e   :  { %1361 = vmatprep.subr.bf16.mxu0 %v5642_v16 }
 0x191   :  { %1362 = vmatpush1.bf16.msra.mxu0 %v5640_v17 }
 0x192   :  { %1363 = vmatprep.subr.bf16.mxu0 %v5648_v18 }
 0x195   :  { %1364 = vmatpush1.bf16.msra.mxu0 %v5646_v19  ;;  %v5613_v19 = vld [vmem:[#allocation15 + $0x88] ss:$16 sps:$4 sm:$0xff]  }
 0x196   :  { %1365 = vmatprep.subr.bf16.mxu0 %v5654_v20 }
 0x199   :  { %1366 = vmatpush1.bf16.msra.mxu0 %v5652_v21 }
 0x19a   :  { %1367 = vmatprep.subr.bf16.mxu0 %v5660_v23  ;;  %v5621_v23 = vld [vmem:[#allocation15 + $0xac] ss:$16 sps:$4 sm:$0xff]  }
 0x19d   :  { %1368 = vmatpush1.bf16.msra.mxu0 %v5658_v22 }
 0x19e   :  { %1369 = vmatprep.subr.bf16.mxu0 %v5666_v24 }
 0x1a1   :  { %1370 = vmatpush1.bf16.msra.mxu0 %v5664_v25 }
 0x216   :  { %v499_v33 = vpop.f32.mrb[0].mxu0 }
 0x217   :  { %v500_v34 = vadd.f32 %v499_v33, %v6810_v31  ;;  %v501_v35 = vpop.f32.mrb[1].mxu0 }
 0x218   :  { %v502_v36 = vadd.f32 %v501_v35, %v6813_v32  ;;  %v503_v37 = vpop.f32.mrb[2].mxu0 }
 0x219   :  { %v504_v38 = vadd.f32 %v503_v37, %v6810_v31  ;;  %v505_v39 = vpop.f32.mrb[3].mxu0  ;;  %v568_v41 = vmax.f32 %v500_v34, 0.0 }
 0x21a   :  { %v506_v40 = vadd.f32 %v505_v39, %v6813_v32  ;;  %v569_v43 = vmax.f32 %v502_v36, 0.0  ;;  %v5619_v36 = vld [vmem:[#allocation15 + $0xa8] ss:$16 sps:$4 sm:$0xff]  }
 0x21b   :  { %v570_v42 = vmax.f32 %v504_v38, 0.0  ;;  %v5627_v38 = vld [vmem:[#allocation15 + $0xcc] ss:$16 sps:$4 sm:$0xff]  }
 0x21c   :  { %v571_v44 = vmax.f32 %v506_v40, 0.0 }
 0x21d   :  { %v596_v45 = vpack.c.bf16 %v570_v42, %v568_v41  ;;  %v5625_v42 = vld [vmem:[#allocation15 + $0xc8] ss:$16 sps:$4 sm:$0xff]  }
 0x21e   :  { %v597_v46 = vpack.c.bf16 %v571_v44, %v569_v43  ;;  %v509_v47 = vpop.f32.mrb[4].mxu0  ;;  %v5633_v44 = vld [vmem:[#allocation15 + $0xec] ss:$16 sps:$4 sm:$0xff]  }
 0x21f   :  { %v510_v49 = vadd.f32 %v509_v47, %v6810_v31  ;;  %v511_v50 = vpop.f32.mrb[5].mxu0 }
 0x220   :  { %846 = vmatprep.mubr.bf16.mxu1 %v597_v46  ;;  %v512_v52 = vadd.f32 %v511_v50, %v6813_v32  ;;  %v513_v53 = vpop.f32.mrb[6].mxu0 }
 0x221   :  { %847 = vmatmul.mubr.bf16.vlgmr.msra.gmra.mrb[0].mxu1 %v596_v45  ;;  %v572_v54 = vmax.f32 %v510_v49, 0.0  ;;  %v514_v55 = vadd.f32 %v513_v53, %v6810_v31  ;;  %v515_v56 = vpop.f32.mrb[7].mxu0 }
 0x222   :  { %v573_v57 = vmax.f32 %v512_v52, 0.0  ;;  %v516_v58 = vadd.f32 %v515_v56, %v6813_v32  ;;  %1387 = vmatpush1.bf16.msra.mxu1 %v5589_v48  ;;  %v5631_v52 = vld [vmem:[#allocation15 + $0xe8] ss:$16 sps:$4 sm:$0xff]   ;;  %v5639_v56 = vld [vmem:[#allocation15 + $0x10c] ss:$16 sps:$4 sm:$0xff]  }
 0x223   :  { %v574_v60 = vmax.f32 %v514_v55, 0.0  ;;  %1388 = vmatprep.subr.bf16.mxu1 %v5597_v51 }
 0x224   :  { %v575_v61 = vmax.f32 %v516_v58, 0.0 }
 0x225   :  { %v598_v62 = vpack.c.bf16 %v574_v60, %v572_v54 }
 0x226   :  { %v599_v63 = vpack.c.bf16 %v575_v61, %v573_v57  ;;  %v519_v1 = vpop.f32.mrb[8].mxu0  ;;  %1389 = vmatpush1.bf16.msra.mxu1 %v5595_v59  ;;  %v5637_v59 = vld [vmem:[#allocation15 + $0x108] ss:$16 sps:$4 sm:$0xff]   ;;  %v5645_v61 = vld [vmem:[#allocation15 + $0x12c] ss:$16 sps:$4 sm:$0xff]  }
 0x227   :  { %v520_v3 = vadd.f32 %v519_v1, %v6810_v31  ;;  %v521_v4 = vpop.f32.mrb[9].mxu0  ;;  %1390 = vmatprep.subr.bf16.mxu1 %v5603_v0 }
 0x228   :  { %856 = vmatprep.mubr.bf16.mxu1 %v599_v63  ;;  %v522_v6 = vadd.f32 %v521_v4, %v6813_v32  ;;  %v523_v7 = vpop.f32.mrb[10].mxu0 }
 0x229   :  { %857 = vmatmul.mubr.bf16.gmra.mrb[4].mxu1 %v598_v62  ;;  %v576_v8 = vmax.f32 %v520_v3, 0.0  ;;  %v524_v9 = vadd.f32 %v523_v7, %v6810_v31  ;;  %v525_v10 = vpop.f32.mrb[11].mxu0 }
 0x22a   :  { %v577_v11 = vmax.f32 %v522_v6, 0.0  ;;  %v526_v12 = vadd.f32 %v525_v10, %v6813_v32  ;;  %1391 = vmatpush1.bf16.msra.mxu1 %v5601_v2  ;;  %v5643_v6 = vld [vmem:[#allocation15 + $0x128] ss:$16 sps:$4 sm:$0xff]   ;;  %v5651_v10 = vld [vmem:[#allocation15 + $0x14c] ss:$16 sps:$4 sm:$0xff]  }
 0x22b   :  { %v578_v14 = vmax.f32 %v524_v9, 0.0  ;;  %1392 = vmatprep.subr.bf16.mxu1 %v5609_v5 }
 0x22c   :  { %v579_v16 = vmax.f32 %v526_v12, 0.0 }
 0x22d   :  { %v600_v17 = vpack.c.bf16 %v578_v14, %v576_v8 }
 0x22e   :  { %v601_v18 = vpack.c.bf16 %v579_v16, %v577_v11  ;;  %1393 = vmatpush1.bf16.msra.mxu1 %v5607_v13  ;;  %v529_v20 = vpop.f32.mrb[12].mxu0  ;;  %v5649_v13 = vld [vmem:[#allocation15 + $0x148] ss:$16 sps:$4 sm:$0xff]  }
 0x22f   :  { %1394 = vmatprep.subr.bf16.mxu1 %v5615_v15  ;;  %v530_v21 = vadd.f32 %v529_v20, %v6810_v31  ;;  %v531_v22 = vpop.f32.mrb[13].mxu0  ;;  %v5657_v15 = vld [vmem:[#allocation15 + $0x16c] ss:$16 sps:$4 sm:$0xff]   ;;  %v5655_v16 = vld [vmem:[#allocation15 + $0x168] ss:$16 sps:$4 sm:$0xff]  }
 0x230   :  { %866 = vmatprep.mubr.bf16.mxu1 %v601_v18  ;;  %v532_v24 = vadd.f32 %v531_v22, %v6813_v32  ;;  %v533_v25 = vpop.f32.mrb[14].mxu0  ;;  %v5661_v18 = vld [vmem:[#allocation15 + $0x188] ss:$16 sps:$4 sm:$0xff]  }
 0x231   :  { %867 = vmatmul.mubr.bf16.gmra.mrb[8].mxu1 %v600_v17  ;;  %v580_v26 = vmax.f32 %v530_v21, 0.0  ;;  %v534_v29 = vadd.f32 %v533_v25, %v6810_v31  ;;  %v535_v33 = vpop.f32.mrb[15].mxu0  ;;  %v5663_v17 = vld [vmem:[#allocation15 + $0x18c] ss:$16 sps:$4 sm:$0xff]   ;;  %v5667_v20 = vld [vmem:[#allocation15 + $0x1a8] ss:$16 sps:$4 sm:$0xff]  }
 0x232   :  { %1395 = vmatpush1.bf16.msra.mxu1 %v5613_v19  ;;  %v581_v34 = vmax.f32 %v532_v24, 0.0  ;;  %v536_v35 = vadd.f32 %v535_v33, %v6813_v32  ;;  %v5669_v19 = vld [vmem:[#allocation15 + $0x1ac] ss:$16 sps:$4 sm:$0xff]  }
 0x233   :  { %v582_v37 = vmax.f32 %v534_v29, 0.0  ;;  %1396 = vmatprep.subr.bf16.mxu1 %v5621_v23 }
 0x234   :  { %v583_v39 = vmax.f32 %v536_v35, 0.0 }
 0x235   :  { %v602_v40 = vpack.c.bf16 %v582_v37, %v580_v26 }
 0x236   :  { %v603_v41 = vpack.c.bf16 %v583_v39, %v581_v34  ;;  %1397 = vmatpush1.bf16.msra.mxu1 %v5619_v36  ;;  %v539_v43 = vpop.f32.mrb[16].mxu0 }
 0x237   :  { %1398 = vmatprep.subr.bf16.mxu1 %v5627_v38  ;;  %v540_v45 = vadd.f32 %v539_v43, %v6810_v31  ;;  %v541_v46 = vpop.f32.mrb[17].mxu0  ;;  %v5673_v43 = vld [vmem:[#allocation15 + $0x1c8] ss:$16 sps:$4 sm:$0xff]  }
 0x238   :  { %876 = vmatprep.mubr.bf16.mxu1 %v603_v41  ;;  %v542_v47 = vadd.f32 %v541_v46, %v6813_v32  ;;  %v543_v48 = vpop.f32.mrb[18].mxu0  ;;  %v5675_v41 = vld [vmem:[#allocation15 + $0x1cc] ss:$16 sps:$4 sm:$0xff]   ;;  %v5679_v46 = vld [vmem:[#allocation15 + $0x1e8] ss:$16 sps:$4 sm:$0xff]  }
 0x239   :  { %877 = vmatmul.mubr.bf16.gmra.mrb[12].mxu1 %v602_v40  ;;  %v584_v49 = vmax.f32 %v540_v45, 0.0  ;;  %v544_v50 = vadd.f32 %v543_v48, %v6810_v31  ;;  %v545_v51 = vpop.f32.mrb[19].mxu0  ;;  %v5672_v40 = vld [vmem:[#allocation15 + $0x1c4] ss:$16 sps:$4 sm:$0xff]   ;;  %v5676_v45 = vld [vmem:[#allocation15 + $0x1e0] ss:$16 sps:$4 sm:$0xff]  }
 0x23a   :  { %1399 = vmatpush1.bf16.msra.mxu1 %v5625_v42  ;;  %v585_v53 = vmax.f32 %v542_v47, 0.0  ;;  %v546_v54 = vadd.f32 %v545_v51, %v6813_v32  ;;  %v5670_v42 = vld [vmem:[#allocation15 + $0x1c0] ss:$16 sps:$4 sm:$0xff]   ;;  %1371 = vmatprep.subr.bf16.mxu0 %v5672_v40  ;;  %v5687_v47 = vld [vmem:[#allocation15 + $0x20c] ss:$16 sps:$4 sm:$0xff]  }
 0x23b   :  { %1400 = vmatprep.subr.bf16.mxu1 %v5633_v44  ;;  %v586_v55 = vmax.f32 %v544_v50, 0.0  ;;  %1372 = vmatpush1.bf16.msra.mxu0 %v5670_v42  ;;  %v5678_v44 = vld [vmem:[#allocation15 + $0x1e4] ss:$16 sps:$4 sm:$0xff]   ;;  %v642_v48 = vld [vmem:[#allocation13] sm:$0x3] }
 0x23c   :  { %v587_v57 = vmax.f32 %v546_v54, 0.0  ;;  %1373 = vmatprep.subr.bf16.mxu0 %v5678_v44  ;;  %v6847_v50 = vrot.slane %v642_v48, %v6807_v30  ;;  %v5700_v40 = vld [vmem:[#allocation15 + $0x260] ss:$16 sps:$4 sm:$0xff]   ;;  %v5708_v44 = vld [vmem:[#allocation15 + $0x284] ss:$16 sps:$4 sm:$0xff]  }
 0x23d   :  { %v604_v58 = vpack.c.bf16 %v586_v55, %v584_v49  ;;  %v6844_v49 = vrot.slane %v642_v48, %v6804_v28  ;;  %v5709_v48 = vld [vmem:[#allocation15 + $0x288] ss:$16 sps:$4 sm:$0xff]  }
 0x23e   :  { %1401 = vmatpush1.bf16.msra.mxu1 %v5631_v52  ;;  %v605_v60 = vpack.c.bf16 %v587_v57, %v585_v53  ;;  %v549_v0 = vpop.f32.mrb[20].mxu0 }
 0x23f   :  { %1402 = vmatprep.subr.bf16.mxu1 %v5639_v56  ;;  %v550_v62 = vadd.f32 %v549_v0, %v6810_v31  ;;  %v551_v63 = vpop.f32.mrb[21].mxu0  ;;  %1374 = vmatpush1.bf16.msra.mxu0 %v5676_v45 }
 0x240   :  { %v552_v1 = vadd.f32 %v551_v63, %v6813_v32  ;;  %v553_v2 = vpop.f32.mrb[22].mxu0  ;;  %886 = vmatprep.mubr.bf16.mxu1 %v605_v60 }
 0x241   :  { %v588_v3 = vmax.f32 %v550_v62, 0.0  ;;  %v554_v4 = vadd.f32 %v553_v2, %v6810_v31  ;;  %v555_v5 = vpop.f32.mrb[23].mxu0  ;;  %887 = vmatmul.mubr.bf16.gmra.mrb[16].mxu1 %v604_v58  ;;  %v5685_v2 = vld [vmem:[#allocation15 + $0x208] ss:$16 sps:$4 sm:$0xff]  }
 0x242   :  { %1403 = vmatpush1.bf16.msra.mxu1 %v5637_v59  ;;  %v589_v7 = vmax.f32 %v552_v1, 0.0  ;;  %v556_v8 = vadd.f32 %v555_v5, %v6813_v32  ;;  %v5682_v1 = vld [vmem:[#allocation15 + $0x200] ss:$16 sps:$4 sm:$0xff]   ;;  %v5693_v5 = vld [vmem:[#allocation15 + $0x22c] ss:$16 sps:$4 sm:$0xff]  }
 0x243   :  { %1404 = vmatprep.subr.bf16.mxu1 %v5645_v61  ;;  %v590_v9 = vmax.f32 %v554_v4, 0.0  ;;  %v5690_v4 = vld [vmem:[#allocation15 + $0x224] ss:$16 sps:$4 sm:$0xff]  }
 0x244   :  { %v591_v11 = vmax.f32 %v556_v8, 0.0 }
 0x245   :  { %v606_v12 = vpack.c.bf16 %v590_v9, %v588_v3 }
 0x246   :  { %1405 = vmatpush1.bf16.msra.mxu1 %v5643_v6  ;;  %v607_v14 = vpack.c.bf16 %v591_v11, %v589_v7  ;;  %v559_v21 = vpop.f32.mrb[24].mxu0 }
 0x247   :  { %1406 = vmatprep.subr.bf16.mxu1 %v5651_v10  ;;  %v560_v22 = vadd.f32 %v559_v21, %v6810_v31  ;;  %v561_v23 = vpop.f32.mrb[25].mxu0 }
 0x248   :  { %896 = vmatprep.mubr.bf16.mxu1 %v607_v14  ;;  %v562_v24 = vadd.f32 %v561_v23, %v6813_v32  ;;  %v563_v25 = vpop.f32.mrb[26].mxu0  ;;  %v5691_v14 = vld [vmem:[#allocation15 + $0x228] ss:$16 sps:$4 sm:$0xff]  }
 0x249   :  { %897 = vmatmul.mubr.bf16.gmra.mrb[20].mxu1 %v606_v12  ;;  %v592_v26 = vmax.f32 %v560_v22, 0.0  ;;  %v564_v29 = vadd.f32 %v563_v25, %v6810_v31  ;;  %v565_v33 = vpop.f32.mrb[27].mxu0  ;;  %v5681_v31 = vld [vmem:[#allocation15 + $0x1ec] ss:$16 sps:$4 sm:$0xff]   ;;  %v5694_v22 = vld [vmem:[#allocation15 + $0x240] ss:$16 sps:$4 sm:$0xff]  }
 0x24a   :  { %1407 = vmatpush1.bf16.msra.mxu1 %v5649_v13  ;;  %v593_v34 = vmax.f32 %v562_v24, 0.0  ;;  %v566_v35 = vadd.f32 %v565_v33, %v6813_v32  ;;  %v5684_v32 = vld [vmem:[#allocation15 + $0x204] ss:$16 sps:$4 sm:$0xff]   ;;  %v5688_v13 = vld [vmem:[#allocation15 + $0x220] ss:$16 sps:$4 sm:$0xff]  }
 0x24b   :  { %1408 = vmatprep.subr.bf16.mxu1 %v5657_v15  ;;  %v594_v36 = vmax.f32 %v564_v29, 0.0  ;;  %1830 = vmatprep.subr.bf16.mxu0 %v5684_v32  ;;  %v5697_v23 = vld [vmem:[#allocation15 + $0x248] ss:$16 sps:$4 sm:$0xff]   ;;  %v5705_v29 = vld [vmem:[#allocation15 + $0x26c] ss:$16 sps:$4 sm:$0xff]  }
 0x24c   :  { %v595_v37 = vmax.f32 %v566_v35, 0.0 }
 0x24d   :  { %v608_v38 = vpack.c.bf16 %v594_v36, %v592_v26  ;;  %v5702_v26 = vld [vmem:[#allocation15 + $0x264] ss:$16 sps:$4 sm:$0xff]  }
 0x24e   :  { %1409 = vmatpush1.bf16.msra.mxu1 %v5655_v16  ;;  %v609_v39 = vpack.c.bf16 %v595_v37, %v593_v34 }
 0x24f   :  { %1410 = vmatprep.subr.bf16.mxu1 %v5663_v17  ;;  %v5696_v17 = vld [vmem:[#allocation15 + $0x244] ss:$16 sps:$4 sm:$0xff]  }
 0x250   :  { %906 = vmatprep.mubr.bf16.mxu1 %v609_v39 }
 0x251   :  { %907 = vmatmul.mubr.bf16.gmra.mrb[24].mxu1 %v608_v38 }
 0x252   :  { %1411 = vmatpush1.bf16.msra.mxu1 %v5661_v18  ;;  %v5699_v18 = vld [vmem:[#allocation15 + $0x24c] ss:$16 sps:$4 sm:$0xff]  }
 0x253   :  { %1412 = vmatprep.subr.bf16.mxu1 %v5669_v19 }
 0x256   :  { %1413 = vmatpush1.bf16.msra.mxu1 %v5667_v20 }
 0x257   :  { %1414 = vmatprep.subr.bf16.mxu1 %v5675_v41  ;;  %v5703_v41 = vld [vmem:[#allocation15 + $0x268] ss:$16 sps:$4 sm:$0xff]  }
 0x25a   :  { %1415 = vmatpush1.bf16.msra.mxu1 %v5673_v43 }
 0x25b   :  { %1416 = vmatprep.subr.bf16.mxu1 %v5681_v31  ;;  %v5711_v31 = vld [vmem:[#allocation15 + $0x28c] ss:$16 sps:$4 sm:$0xff]  }
 0x25e   :  { %1417 = vmatpush1.bf16.msra.mxu1 %v5679_v46 }
 0x25f   :  { %1873 = vmatprep.subr.bf16.mxu1 %v5687_v47  ;;  %v5706_v47 = vld [vmem:[#allocation15 + $0x280] ss:$16 sps:$4 sm:$0xff]  }
 0x2f4   :  { %v848_v51 = vpop.f32.mrb[0].mxu1 }
 0x2f5   :  { %v849_v52 = vadd.f32 %v848_v51, %v6844_v49  ;;  %v850_v53 = vpop.f32.mrb[1].mxu1 }
 0x2f6   :  { %v851_v54 = vadd.f32 %v850_v53, %v6847_v50  ;;  %v852_v55 = vpop.f32.mrb[2].mxu1  ;;  %v5717_v53 = vld [vmem:[#allocation15 + $0x2ac] ss:$16 sps:$4 sm:$0xff]  }
 0x2f7   :  { %v853_v56 = vadd.f32 %v852_v55, %v6844_v49  ;;  %v854_v57 = vpop.f32.mrb[3].mxu1  ;;  %v917_v59 = vmax.f32 %v849_v52, 0.0  ;;  %v5714_v52 = vld [vmem:[#allocation15 + $0x2a4] ss:$16 sps:$4 sm:$0xff]   ;;  %v5715_v55 = vld [vmem:[#allocation15 + $0x2a8] ss:$16 sps:$4 sm:$0xff]  }
 0x2f8   :  { %v855_v58 = vadd.f32 %v854_v57, %v6847_v50  ;;  %v918_v0 = vmax.f32 %v851_v54, 0.0  ;;  %v5712_v54 = vld [vmem:[#allocation15 + $0x2a0] ss:$16 sps:$4 sm:$0xff]   ;;  %v5723_v57 = vld [vmem:[#allocation15 + $0x2cc] ss:$16 sps:$4 sm:$0xff]  }
 0x2f9   :  { %v919_v60 = vmax.f32 %v853_v56, 0.0  ;;  %v5720_v56 = vld [vmem:[#allocation15 + $0x2c4] ss:$16 sps:$4 sm:$0xff]  }
 0x2fa   :  { %v920_v61 = vmax.f32 %v855_v58, 0.0  ;;  %v5718_v58 = vld [vmem:[#allocation15 + $0x2c0] ss:$16 sps:$4 sm:$0xff]  }
 0x2fb   :  { %v945_v62 = vpack.c.bf16 %v919_v60, %v917_v59  ;;  %v5721_v59 = vld [vmem:[#allocation15 + $0x2c8] ss:$16 sps:$4 sm:$0xff]   ;;  %v5726_v60 = vld [vmem:[#allocation15 + $0x2e4] ss:$16 sps:$4 sm:$0xff]  }
 0x2fc   :  { %v946_v63 = vpack.c.bf16 %v920_v61, %v918_v0  ;;  %v858_v3 = vpop.f32.mrb[4].mxu1  ;;  %v5729_v0 = vld [vmem:[#allocation15 + $0x2ec] ss:$16 sps:$4 sm:$0xff]   ;;  %v5724_v61 = vld [vmem:[#allocation15 + $0x2e0] ss:$16 sps:$4 sm:$0xff]  }
 0x2fd   :  { %v859_v6 = vadd.f32 %v858_v3, %v6844_v49  ;;  %v860_v7 = vpop.f32.mrb[5].mxu1  ;;  %v5733_v3 = vld [vmem:[#allocation15 + $0x308] ss:$16 sps:$4 sm:$0xff]  }
 0x2fe   :  { %1375 = vmatprep.mubr.bf16.mxu0 %v946_v63  ;;  %1418 = vmatprep.mubr.bf16.mxu1 %v946_v63  ;;  %v861_v8 = vadd.f32 %v860_v7, %v6847_v50  ;;  %v862_v9 = vpop.f32.mrb[6].mxu1  ;;  %v5732_v63 = vld [vmem:[#allocation15 + $0x304] ss:$16 sps:$4 sm:$0xff]   ;;  %v5739_v7 = vld [vmem:[#allocation15 + $0x328] ss:$16 sps:$4 sm:$0xff]  }
 0x2ff   :  { %1376 = vmatmul.mubr.bf16.vlgmr.msra.gmra.mrb[28].mxu0 %v945_v62  ;;  %1419 = vmatmul.mubr.bf16.vlgmr.msra.gmra.mrb[28].mxu1 %v945_v62  ;;  %v921_v10 = vmax.f32 %v859_v6, 0.0  ;;  %v863_v11 = vadd.f32 %v862_v9, %v6844_v49  ;;  %v864_v12 = vpop.f32.mrb[7].mxu1  ;;  %v5727_v62 = vld [vmem:[#allocation15 + $0x2e8] ss:$16 sps:$4 sm:$0xff]   ;;  %v5736_v6 = vld [vmem:[#allocation15 + $0x320] ss:$16 sps:$4 sm:$0xff]  }
 0x300   :  { %1831 = vmatpush1.bf16.msra.mxu0 %v5682_v1  ;;  %1874 = vmatpush1.bf16.msra.mxu1 %v5685_v2  ;;  %v922_v15 = vmax.f32 %v861_v8, 0.0  ;;  %v865_v16 = vadd.f32 %v864_v12, %v6847_v50  ;;  %v5735_v1 = vld [vmem:[#allocation15 + $0x30c] ss:$16 sps:$4 sm:$0xff]   ;;  %v5730_v2 = vld [vmem:[#allocation15 + $0x300] ss:$16 sps:$4 sm:$0xff]  }
 0x301   :  { %1832 = vmatprep.subr.bf16.mxu0 %v5690_v4  ;;  %1875 = vmatprep.subr.bf16.mxu1 %v5693_v5  ;;  %v923_v19 = vmax.f32 %v863_v11, 0.0  ;;  %v5738_v4 = vld [vmem:[#allocation15 + $0x324] ss:$16 sps:$4 sm:$0xff]   ;;  %v5741_v5 = vld [vmem:[#allocation15 + $0x32c] ss:$16 sps:$4 sm:$0xff]  }
 0x302   :  { %v924_v20 = vmax.f32 %v865_v16, 0.0  ;;  %v5744_v8 = vld [vmem:[#allocation15 + $0x344] ss:$16 sps:$4 sm:$0xff]   ;;  %v5747_v9 = vld [vmem:[#allocation15 + $0x34c] ss:$16 sps:$4 sm:$0xff]  }
 0x303   :  { %v6857_v21 = vpack.c.bf16 %v923_v19, %v921_v10  ;;  %v5742_v10 = vld [vmem:[#allocation15 + $0x340] ss:$16 sps:$4 sm:$0xff]   ;;  %v5745_v11 = vld [vmem:[#allocation15 + $0x348] ss:$16 sps:$4 sm:$0xff]   ;;  %v5750_v12 = vld [vmem:[#allocation15 + $0x364] ss:$16 sps:$4 sm:$0xff]  }
 0x304   :  { %1833 = vmatpush1.bf16.msra.mxu0 %v5688_v13  ;;  %1876 = vmatpush1.bf16.msra.mxu1 %v5691_v14  ;;  %v948_v24 = vpack.c.bf16 %v924_v20, %v922_v15  ;;  %v868_v25 = vpop.f32.mrb[8].mxu1  ;;  %v5753_v13 = vld [vmem:[#allocation15 + $0x36c] ss:$16 sps:$4 sm:$0xff]   ;;  %v5748_v14 = vld [vmem:[#allocation15 + $0x360] ss:$16 sps:$4 sm:$0xff]  }
 0x305   :  { %1834 = vmatprep.subr.bf16.mxu0 %v5696_v17  ;;  %1877 = vmatprep.subr.bf16.mxu1 %v5699_v18  ;;  %v869_v33 = vadd.f32 %v868_v25, %v6844_v49  ;;  %v870_v34 = vpop.f32.mrb[9].mxu1  ;;  %v5751_v15 = vld [vmem:[#allocation15 + $0x368] ss:$16 sps:$4 sm:$0xff]   ;;  %v5756_v16 = vld [vmem:[#allocation15 + $0x384] ss:$16 sps:$4 sm:$0xff]  }
 0x306   :  { %1862 = vmatprep.mubr.bf16.mxu0 %v948_v24  ;;  %1905 = vmatprep.mubr.bf16.mxu1 %v948_v24  ;;  %v871_v35 = vadd.f32 %v870_v34, %v6847_v50  ;;  %v872_v36 = vpop.f32.mrb[10].mxu1  ;;  %v5759_v17 = vld [vmem:[#allocation15 + $0x38c] ss:$16 sps:$4 sm:$0xff]   ;;  %v5754_v18 = vld [vmem:[#allocation15 + $0x380] ss:$16 sps:$4 sm:$0xff]  }
 0x307   :  { %v925_v37 = vmax.f32 %v869_v33, 0.0  ;;  %v873_v38 = vadd.f32 %v872_v36, %v6844_v49  ;;  %v874_v39 = vpop.f32.mrb[11].mxu1  ;;  %v5757_v19 = vld [vmem:[#allocation15 + $0x388] ss:$16 sps:$4 sm:$0xff]  }
 0x308   :  { %1835 = vmatpush1.bf16.msra.mxu0 %v5694_v22  ;;  %1878 = vmatpush1.bf16.msra.mxu1 %v5697_v23  ;;  %v926_v42 = vmax.f32 %v871_v35, 0.0  ;;  %v875_v43 = vadd.f32 %v874_v39, %v6847_v50  ;;  %v5762_v22 = vld [vmem:[#allocation15 + $0x3a4] ss:$16 sps:$4 sm:$0xff]   ;;  %v5765_v23 = vld [vmem:[#allocation15 + $0x3ac] ss:$16 sps:$4 sm:$0xff]  }
 0x309   :  { %1836 = vmatprep.subr.bf16.mxu0 %v5702_v26  ;;  %1879 = vmatprep.subr.bf16.mxu1 %v5705_v29  ;;  %v927_v45 = vmax.f32 %v873_v38, 0.0  ;;  %v5760_v35 = vld [vmem:[#allocation15 + $0x3a0] ss:$16 sps:$4 sm:$0xff]   ;;  %v5763_v36 = vld [vmem:[#allocation15 + $0x3a8] ss:$16 sps:$4 sm:$0xff]  }
 0x30a   :  { %v928_v46 = vmax.f32 %v875_v43, 0.0  ;;  %v5768_v38 = vld [vmem:[#allocation15 + $0x3c4] ss:$16 sps:$4 sm:$0xff]   ;;  %v5771_v39 = vld [vmem:[#allocation15 + $0x3cc] ss:$16 sps:$4 sm:$0xff]  }
 0x30b   :  { %v6863_v32 = vpack.c.bf16 %v927_v45, %v925_v37  ;;  %v5769_v45 = vld [vmem:[#allocation15 + $0x3c8] ss:$16 sps:$4 sm:$0xff]  }
 0x30c   :  { %1837 = vmatpush1.bf16.msra.mxu0 %v5700_v40  ;;  %1880 = vmatpush1.bf16.msra.mxu1 %v5703_v41  ;;  %v6865_v51 = vpack.c.bf16 %v928_v46, %v926_v42  ;;  %v878_v20 = vpop.f32.mrb[12].mxu1  ;;  %v5774_v46 = vld [vmem:[#allocation15 + $0x3e4] ss:$16 sps:$4 sm:$0xff]  }
 0x30d   :  { %1838 = vmatprep.subr.bf16.mxu0 %v5708_v44  ;;  %1881 = vmatprep.subr.bf16.mxu1 %v5711_v31  ;;  %v879_v24 = vadd.f32 %v878_v20, %v6844_v49  ;;  %v880_v25 = vpop.f32.mrb[13].mxu1  ;;  %v5766_v31 = vld [vmem:[#allocation15 + $0x3c0] ss:$16 sps:$4 sm:$0xff]  }
 0x30e   :  { %v881_v26 = vadd.f32 %v880_v25, %v6847_v50  ;;  %v882_v29 = vpop.f32.mrb[14].mxu1 }
 0x30f   :  { %v929_v33 = vmax.f32 %v879_v24, 0.0  ;;  %v883_v34 = vadd.f32 %v882_v29, %v6844_v49  ;;  %v884_v37 = vpop.f32.mrb[15].mxu1  ;;  %v5817_v29 = vld [vmem:[#allocation15 + $0x4c8] ss:$16 sps:$4 sm:$0xff]  }
 0x310   :  { %1839 = vmatpush1.bf16.msra.mxu0 %v5706_v47  ;;  %1882 = vmatpush1.bf16.msra.mxu1 %v5709_v48  ;;  %v930_v40 = vmax.f32 %v881_v26, 0.0  ;;  %v885_v42 = vadd.f32 %v884_v37, %v6847_v50  ;;  %v5777_v47 = vld [vmem:[#allocation15 + $0x3ec] ss:$16 sps:$4 sm:$0xff]   ;;  %v5814_v26 = vld [vmem:[#allocation15 + $0x4c0] ss:$16 sps:$4 sm:$0xff]  }
 0x311   :  { %1840 = vmatprep.subr.bf16.mxu0 %v5714_v52  ;;  %1883 = vmatprep.subr.bf16.mxu1 %v5717_v53  ;;  %v931_v41 = vmax.f32 %v883_v34, 0.0  ;;  %v5772_v52 = vld [vmem:[#allocation15 + $0x3e0] ss:$16 sps:$4 sm:$0xff]   ;;  %v5775_v53 = vld [vmem:[#allocation15 + $0x3e8] ss:$16 sps:$4 sm:$0xff]  }
 0x312   :  { %v932_v44 = vmax.f32 %v885_v42, 0.0  ;;  %v5822_v34 = vld [vmem:[#allocation15 + $0x4e4] ss:$16 sps:$4 sm:$0xff]   ;;  %v5831_v42 = vld [vmem:[#allocation15 + $0x50c] ss:$16 sps:$4 sm:$0xff]  }
 0x313   :  { %v6871_v43 = vpack.c.bf16 %v931_v41, %v929_v33  ;;  %v5828_v41 = vld [vmem:[#allocation15 + $0x504] ss:$16 sps:$4 sm:$0xff]  }
 0x314   :  { %1841 = vmatpush1.bf16.msra.mxu0 %v5712_v54  ;;  %1884 = vmatpush1.bf16.msra.mxu1 %v5715_v55  ;;  %v6873_v48 = vpack.c.bf16 %v932_v44, %v930_v40  ;;  %v5780_v54 = vld [vmem:[#allocation15 + $0x404] ss:$16 sps:$4 sm:$0xff]   ;;  %v5783_v55 = vld [vmem:[#allocation15 + $0x40c] ss:$16 sps:$4 sm:$0xff]  }
 0x315   :  { %1842 = vmatprep.subr.bf16.mxu0 %v5720_v56  ;;  %1885 = vmatprep.subr.bf16.mxu1 %v5723_v57  ;;  %v5778_v56 = vld [vmem:[#allocation15 + $0x400] ss:$16 sps:$4 sm:$0xff]   ;;  %v5781_v57 = vld [vmem:[#allocation15 + $0x408] ss:$16 sps:$4 sm:$0xff]  }
 0x318   :  { %1843 = vmatpush1.bf16.msra.mxu0 %v5718_v58  ;;  %1886 = vmatpush1.bf16.msra.mxu1 %v5721_v59  ;;  %v5786_v58 = vld [vmem:[#allocation15 + $0x424] ss:$16 sps:$4 sm:$0xff]   ;;  %v5789_v59 = vld [vmem:[#allocation15 + $0x42c] ss:$16 sps:$4 sm:$0xff]  }
 0x319   :  { %1844 = vmatprep.subr.bf16.mxu0 %v5726_v60  ;;  %1887 = vmatprep.subr.bf16.mxu1 %v5729_v0  ;;  %v5784_v60 = vld [vmem:[#allocation15 + $0x420] ss:$16 sps:$4 sm:$0xff]   ;;  %v5787_v0 = vld [vmem:[#allocation15 + $0x428] ss:$16 sps:$4 sm:$0xff]  }
 0x31c   :  { %1845 = vmatpush1.bf16.msra.mxu0 %v5724_v61  ;;  %1888 = vmatpush1.bf16.msra.mxu1 %v5727_v62  ;;  %v5792_v61 = vld [vmem:[#allocation15 + $0x444] ss:$16 sps:$4 sm:$0xff]   ;;  %v5795_v62 = vld [vmem:[#allocation15 + $0x44c] ss:$16 sps:$4 sm:$0xff]  }
 0x31d   :  { %1846 = vmatprep.subr.bf16.mxu0 %v5732_v63  ;;  %1889 = vmatprep.subr.bf16.mxu1 %v5735_v1  ;;  %v5790_v63 = vld [vmem:[#allocation15 + $0x440] ss:$16 sps:$4 sm:$0xff]   ;;  %v5793_v1 = vld [vmem:[#allocation15 + $0x448] ss:$16 sps:$4 sm:$0xff]  }
 0x320   :  { %1847 = vmatpush1.bf16.msra.mxu0 %v5730_v2  ;;  %1890 = vmatpush1.bf16.msra.mxu1 %v5733_v3  ;;  %v5798_v2 = vld [vmem:[#allocation15 + $0x464] ss:$16 sps:$4 sm:$0xff]   ;;  %v5796_v3 = vld [vmem:[#allocation15 + $0x460] ss:$16 sps:$4 sm:$0xff]  }
 0x321   :  { %1848 = vmatprep.subr.bf16.mxu0 %v5738_v4  ;;  %1891 = vmatprep.subr.bf16.mxu1 %v5741_v5  ;;  %v5799_v4 = vld [vmem:[#allocation15 + $0x468] ss:$16 sps:$4 sm:$0xff]   ;;  %v5804_v5 = vld [vmem:[#allocation15 + $0x484] ss:$16 sps:$4 sm:$0xff]  }
 0x324   :  { %1849 = vmatpush1.bf16.msra.mxu0 %v5736_v6  ;;  %1892 = vmatpush1.bf16.msra.mxu1 %v5739_v7  ;;  %v5807_v6 = vld [vmem:[#allocation15 + $0x48c] ss:$16 sps:$4 sm:$0xff]   ;;  %v5802_v7 = vld [vmem:[#allocation15 + $0x480] ss:$16 sps:$4 sm:$0xff]  }
 0x325   :  { %1850 = vmatprep.subr.bf16.mxu0 %v5744_v8  ;;  %1893 = vmatprep.subr.bf16.mxu1 %v5747_v9  ;;  %v888_v8 = vpop.f32.mrb[16].mxu1  ;;  %v5810_v9 = vld [vmem:[#allocation15 + $0x4a4] ss:$16 sps:$4 sm:$0xff]  }
 0x328   :  { %1851 = vmatpush1.bf16.msra.mxu0 %v5742_v10  ;;  %1894 = vmatpush1.bf16.msra.mxu1 %v5745_v11  ;;  %v5813_v10 = vld [vmem:[#allocation15 + $0x4ac] ss:$16 sps:$4 sm:$0xff]   ;;  %v889_v11 = vadd.f32 %v888_v8, %v6844_v49 }
 0x329   :  { %1852 = vmatprep.subr.bf16.mxu0 %v5750_v12  ;;  %1895 = vmatprep.subr.bf16.mxu1 %v5753_v13  ;;  %v890_v12 = vpop.f32.mrb[17].mxu1 }
 0x32a   :  { %v891_v13 = vadd.f32 %v890_v12, %v6847_v50 }
 0x32c   :  { %1853 = vmatpush1.bf16.msra.mxu0 %v5748_v14  ;;  %1896 = vmatpush1.bf16.msra.mxu1 %v5751_v15  ;;  %v5808_v14 = vld [vmem:[#allocation15 + $0x4a0] ss:$16 sps:$4 sm:$0xff]   ;;  %v5811_v15 = vld [vmem:[#allocation15 + $0x4a8] ss:$16 sps:$4 sm:$0xff]  }
 0x32d   :  { %1854 = vmatprep.subr.bf16.mxu0 %v5756_v16  ;;  %1897 = vmatprep.subr.bf16.mxu1 %v5759_v17  ;;  %v892_v16 = vpop.f32.mrb[18].mxu1  ;;  %v5816_v17 = vld [vmem:[#allocation15 + $0x4c4] ss:$16 sps:$4 sm:$0xff]  }
 0x32e   :  { %v893_v20 = vadd.f32 %v892_v16, %v6844_v49 }
 0x330   :  { %1855 = vmatpush1.bf16.msra.mxu0 %v5754_v18  ;;  %1898 = vmatpush1.bf16.msra.mxu1 %v5757_v19  ;;  %v5819_v18 = vld [vmem:[#allocation15 + $0x4cc] ss:$16 sps:$4 sm:$0xff]   ;;  %v933_v19 = vmax.f32 %v889_v11, 0.0  ;;  %v935_v25 = vmax.f32 %v893_v20, 0.0  ;;  %v5852_v20 = vld [vmem:[#allocation15 + $0x584] ss:$16 sps:$4 sm:$0xff]  }
 0x331   :  { %1856 = vmatprep.subr.bf16.mxu0 %v5762_v22  ;;  %1899 = vmatprep.subr.bf16.mxu1 %v5765_v23  ;;  %v894_v22 = vpop.f32.mrb[19].mxu1  ;;  %v934_v23 = vmax.f32 %v891_v13, 0.0 }
 0x332   :  { %v895_v24 = vadd.f32 %v894_v22, %v6847_v50  ;;  %v898_v40 = vpop.f32.mrb[20].mxu1  ;;  %v5855_v22 = vld [vmem:[#allocation15 + $0x58c] ss:$16 sps:$4 sm:$0xff]  }
 0x333   :  { %v899_v44 = vadd.f32 %v898_v40, %v6844_v49  ;;  %v5870_v40 = vld [vmem:[#allocation15 + $0x5e4] ss:$16 sps:$4 sm:$0xff]  }
 0x334   :  { %1857 = vmatpush1.bf16.msra.mxu0 %v5760_v35  ;;  %1900 = vmatpush1.bf16.msra.mxu1 %v5763_v36  ;;  %v936_v33 = vmax.f32 %v895_v24, 0.0  ;;  %v5825_v35 = vld [vmem:[#allocation15 + $0x4ec] ss:$16 sps:$4 sm:$0xff]   ;;  %v6883_v36 = vpack.c.bf16 %v935_v25, %v933_v19  ;;  %v5853_v25 = vld [vmem:[#allocation15 + $0x588] ss:$16 sps:$4 sm:$0xff]  }
 0x335   :  { %1858 = vmatprep.subr.bf16.mxu0 %v5768_v38  ;;  %1901 = vmatprep.subr.bf16.mxu1 %v5771_v39  ;;  %v5820_v38 = vld [vmem:[#allocation15 + $0x4e0] ss:$16 sps:$4 sm:$0xff]   ;;  %v5823_v39 = vld [vmem:[#allocation15 + $0x4e8] ss:$16 sps:$4 sm:$0xff]  }
 0x336   :  { %v6885_v37 = vpack.c.bf16 %v936_v33, %v934_v23  ;;  %v5859_v33 = vld [vmem:[#allocation15 + $0x5a8] ss:$16 sps:$4 sm:$0xff]  }
 0x338   :  { %1859 = vmatpush1.bf16.msra.mxu0 %v5766_v31  ;;  %1902 = vmatpush1.bf16.msra.mxu1 %v5769_v45  ;;  %v900_v31 = vpop.f32.mrb[21].mxu1 }
 0x339   :  { %1860 = vmatprep.subr.bf16.mxu0 %v5774_v46  ;;  %1903 = vmatprep.subr.bf16.mxu1 %v5777_v47  ;;  %v901_v45 = vadd.f32 %v900_v31, %v6847_v50  ;;  %v5826_v46 = vld [vmem:[#allocation15 + $0x500] ss:$16 sps:$4 sm:$0xff]   ;;  %v5829_v47 = vld [vmem:[#allocation15 + $0x508] ss:$16 sps:$4 sm:$0xff]   ;;  %v5876_v31 = vld [vmem:[#allocation15 + $0x604] ss:$16 sps:$4 sm:$0xff]  }
 0x33c   :  { %1861 = vmatpush1.bf16.msra.mxu0 %v5772_v52  ;;  %1904 = vmatpush1.bf16.msra.mxu1 %v5775_v53  ;;  %v902_v52 = vpop.f32.mrb[22].mxu1  ;;  %v5834_v53 = vld [vmem:[#allocation15 + $0x524] ss:$16 sps:$4 sm:$0xff]  }
 0x33d   :  { %2325 = vmatprep.subr.bf16.mxu0 %v5780_v54  ;;  %2368 = vmatprep.subr.bf16.mxu1 %v5783_v55  ;;  %v5837_v54 = vld [vmem:[#allocation15 + $0x52c] ss:$16 sps:$4 sm:$0xff]   ;;  %v937_v55 = vmax.f32 %v899_v44, 0.0  ;;  %v5871_v44 = vld [vmem:[#allocation15 + $0x5e8] ss:$16 sps:$4 sm:$0xff]  }
 0x33f   :  { %1863 = vmatmul.mubr.bf16.vlgmr.msra.gmra.mrb[28].mxu0 %v6857_v21  ;;  %1906 = vmatmul.mubr.bf16.vlgmr.msra.gmra.mrb[28].mxu1 %v6857_v21  ;;  %v5801_v21 = vld [vmem:[#allocation15 + $0x46c] ss:$16 sps:$4 sm:$0xff]  }
 0x340   :  { %2326 = vmatpush1.bf16.msra.mxu0 %v5778_v56  ;;  %2369 = vmatpush1.bf16.msra.mxu1 %v5781_v57  ;;  %v903_v56 = vadd.f32 %v902_v52, %v6844_v49  ;;  %v904_v57 = vpop.f32.mrb[23].mxu1  ;;  %v5882_v52 = vld [vmem:[#allocation15 + $0x624] ss:$16 sps:$4 sm:$0xff]  }
 0x341   :  { %2327 = vmatprep.subr.bf16.mxu0 %v5786_v58  ;;  %2370 = vmatprep.subr.bf16.mxu1 %v5789_v59  ;;  %v938_v58 = vmax.f32 %v901_v45, 0.0  ;;  %v905_v59 = vadd.f32 %v904_v57, %v6847_v50  ;;  %v5879_v45 = vld [vmem:[#allocation15 + $0x60c] ss:$16 sps:$4 sm:$0xff]  }
 0x342   :  { %2357 = vmatprep.mubr.bf16.mxu0 %v6865_v51  ;;  %2400 = vmatprep.mubr.bf16.mxu1 %v6865_v51  ;;  %v5805_v51 = vld [vmem:[#allocation15 + $0x488] ss:$16 sps:$4 sm:$0xff]   ;;  %v5891_v57 = vld [vmem:[#allocation15 + $0x64c] ss:$16 sps:$4 sm:$0xff]  }
 0x344   :  { %2328 = vmatpush1.bf16.msra.mxu0 %v5784_v60  ;;  %2371 = vmatpush1.bf16.msra.mxu1 %v5787_v0  ;;  %v939_v60 = vmax.f32 %v903_v56, 0.0  ;;  %v5832_v0 = vld [vmem:[#allocation15 + $0x520] ss:$16 sps:$4 sm:$0xff]   ;;  %v5888_v56 = vld [vmem:[#allocation15 + $0x644] ss:$16 sps:$4 sm:$0xff]  }
 0x345   :  { %2329 = vmatprep.subr.bf16.mxu0 %v5792_v61  ;;  %2372 = vmatprep.subr.bf16.mxu1 %v5795_v62  ;;  %v5835_v61 = vld [vmem:[#allocation15 + $0x528] ss:$16 sps:$4 sm:$0xff]   ;;  %v940_v62 = vmax.f32 %v905_v59, 0.0 }
 0x346   :  { %v5889_v59 = vld [vmem:[#allocation15 + $0x648] ss:$16 sps:$4 sm:$0xff]  }
 0x348   :  { %2330 = vmatpush1.bf16.msra.mxu0 %v5790_v63  ;;  %2373 = vmatpush1.bf16.msra.mxu1 %v5793_v1  ;;  %v908_v63 = vpop.f32.mrb[24].mxu1  ;;  %v5840_v1 = vld [vmem:[#allocation15 + $0x544] ss:$16 sps:$4 sm:$0xff]  }
 0x349   :  { %2331 = vmatprep.subr.bf16.mxu0 %v5798_v2  ;;  %2374 = vmatprep.subr.bf16.mxu1 %v5801_v21  ;;  %v5843_v2 = vld [vmem:[#allocation15 + $0x54c] ss:$16 sps:$4 sm:$0xff]   ;;  %v6891_v21 = vpack.c.bf16 %v939_v60, %v937_v55  ;;  %v5883_v55 = vld [vmem:[#allocation15 + $0x628] ss:$16 sps:$4 sm:$0xff]   ;;  %v5894_v60 = vld [vmem:[#allocation15 + $0x664] ss:$16 sps:$4 sm:$0xff]  }
 0x34c   :  { %2332 = vmatpush1.bf16.msra.mxu0 %v5796_v3  ;;  %2375 = vmatpush1.bf16.msra.mxu1 %v5799_v4  ;;  %v909_v3 = vadd.f32 %v908_v63, %v6844_v49  ;;  %v910_v4 = vpop.f32.mrb[25].mxu1  ;;  %v5903_v63 = vld [vmem:[#allocation15 + $0x68c] ss:$16 sps:$4 sm:$0xff]  }
 0x34d   :  { %2333 = vmatprep.subr.bf16.mxu0 %v5804_v5  ;;  %2376 = vmatprep.subr.bf16.mxu1 %v5807_v6  ;;  %v6894_v5 = vpack.c.bf16 %v940_v62, %v938_v58  ;;  %v911_v6 = vadd.f32 %v910_v4, %v6847_v50  ;;  %v912_v8 = vpop.f32.mrb[26].mxu1  ;;  %v5886_v58 = vld [vmem:[#allocation15 + $0x640] ss:$16 sps:$4 sm:$0xff]   ;;  %v5900_v62 = vld [vmem:[#allocation15 + $0x684] ss:$16 sps:$4 sm:$0xff]  }
 0x34e   :  { %v941_v11 = vmax.f32 %v909_v3, 0.0  ;;  %v913_v12 = vadd.f32 %v912_v8, %v6844_v49  ;;  %v914_v13 = vpop.f32.mrb[27].mxu1  ;;  %v5850_v49 = vld [vmem:[#allocation15 + $0x580] ss:$16 sps:$4 sm:$0xff]   ;;  %v5909_v3 = vld [vmem:[#allocation15 + $0x6ac] ss:$16 sps:$4 sm:$0xff]  }
 0x34f   :  { %v5904_v4 = vld [vmem:[#allocation15 + $0x6a0] ss:$16 sps:$4 sm:$0xff]  }
 0x350   :  { %2334 = vmatpush1.bf16.msra.mxu0 %v5802_v7  ;;  %2377 = vmatpush1.bf16.msra.mxu1 %v5805_v51  ;;  %v5838_v7 = vld [vmem:[#allocation15 + $0x540] ss:$16 sps:$4 sm:$0xff]   ;;  %v5841_v51 = vld [vmem:[#allocation15 + $0x548] ss:$16 sps:$4 sm:$0xff]   ;;  %v943_v16 = vmax.f32 %v913_v12, 0.0 }
 0x351   :  { %2335 = vmatprep.subr.bf16.mxu0 %v5810_v9  ;;  %2378 = vmatprep.subr.bf16.mxu1 %v5813_v10  ;;  %v5846_v9 = vld [vmem:[#allocation15 + $0x564] ss:$16 sps:$4 sm:$0xff]   ;;  %v5849_v10 = vld [vmem:[#allocation15 + $0x56c] ss:$16 sps:$4 sm:$0xff]   ;;  %v5910_v8 = vld [vmem:[#allocation15 + $0x6c0] ss:$16 sps:$4 sm:$0xff]  }
 0x352   :  { %v6899_v23 = vpack.c.bf16 %v943_v16, %v941_v11  ;;  %v5921_v11 = vld [vmem:[#allocation15 + $0x6ec] ss:$16 sps:$4 sm:$0xff]   ;;  %v5916_v12 = vld [vmem:[#allocation15 + $0x6e0] ss:$16 sps:$4 sm:$0xff]  }
 0x353   :  { %v5922_v16 = vld [vmem:[#allocation15 + $0x700] ss:$16 sps:$4 sm:$0xff]  }
 0x354   :  { %2336 = vmatpush1.bf16.msra.mxu0 %v5808_v14  ;;  %2379 = vmatpush1.bf16.msra.mxu1 %v5811_v15  ;;  %v942_v14 = vmax.f32 %v911_v6, 0.0  ;;  %v915_v15 = vadd.f32 %v914_v13, %v6847_v50  ;;  %v5858_v50 = vld [vmem:[#allocation15 + $0x5a4] ss:$16 sps:$4 sm:$0xff]   ;;  %v5907_v6 = vld [vmem:[#allocation15 + $0x6a8] ss:$16 sps:$4 sm:$0xff]  }
 0x355   :  { %2337 = vmatprep.subr.bf16.mxu0 %v5816_v17  ;;  %2380 = vmatprep.subr.bf16.mxu1 %v5819_v18  ;;  %v5844_v17 = vld [vmem:[#allocation15 + $0x560] ss:$16 sps:$4 sm:$0xff]   ;;  %v5847_v18 = vld [vmem:[#allocation15 + $0x568] ss:$16 sps:$4 sm:$0xff]  }
 0x356   :  { %v944_v19 = vmax.f32 %v915_v15, 0.0  ;;  %v5919_v13 = vld [vmem:[#allocation15 + $0x6e8] ss:$16 sps:$4 sm:$0xff]   ;;  %v5927_v15 = vld [vmem:[#allocation15 + $0x70c] ss:$16 sps:$4 sm:$0xff]  }
 0x358   :  { %2338 = vmatpush1.bf16.msra.mxu0 %v5814_v26  ;;  %2381 = vmatpush1.bf16.msra.mxu1 %v5817_v29  ;;  %v6901_v24 = vpack.c.bf16 %v944_v19, %v942_v14  ;;  %v5861_v26 = vld [vmem:[#allocation15 + $0x5ac] ss:$16 sps:$4 sm:$0xff]   ;;  %v5856_v29 = vld [vmem:[#allocation15 + $0x5a0] ss:$16 sps:$4 sm:$0xff]   ;;  %v5924_v14 = vld [vmem:[#allocation15 + $0x704] ss:$16 sps:$4 sm:$0xff]  }
 0x359   :  { %2339 = vmatprep.subr.bf16.mxu0 %v5822_v34  ;;  %2382 = vmatprep.subr.bf16.mxu1 %v5825_v35  ;;  %v5864_v34 = vld [vmem:[#allocation15 + $0x5c4] ss:$16 sps:$4 sm:$0xff]   ;;  %v5867_v35 = vld [vmem:[#allocation15 + $0x5cc] ss:$16 sps:$4 sm:$0xff]  }
 0x35a   :  { %v5933_v19 = vld [vmem:[#allocation15 + $0x72c] ss:$16 sps:$4 sm:$0xff]  }
 0x35c   :  { %2340 = vmatpush1.bf16.msra.mxu0 %v5820_v38  ;;  %2383 = vmatpush1.bf16.msra.mxu1 %v5823_v39  ;;  %v5862_v38 = vld [vmem:[#allocation15 + $0x5c0] ss:$16 sps:$4 sm:$0xff]   ;;  %v5865_v39 = vld [vmem:[#allocation15 + $0x5c8] ss:$16 sps:$4 sm:$0xff]  }
 0x35d   :  { %2341 = vmatprep.subr.bf16.mxu0 %v5828_v41  ;;  %2384 = vmatprep.subr.bf16.mxu1 %v5831_v42  ;;  %v5873_v41 = vld [vmem:[#allocation15 + $0x5ec] ss:$16 sps:$4 sm:$0xff]   ;;  %v5868_v42 = vld [vmem:[#allocation15 + $0x5e0] ss:$16 sps:$4 sm:$0xff]  }
 0x360   :  { %2342 = vmatpush1.bf16.msra.mxu0 %v5826_v46  ;;  %2385 = vmatpush1.bf16.msra.mxu1 %v5829_v47  ;;  %v5874_v46 = vld [vmem:[#allocation15 + $0x600] ss:$16 sps:$4 sm:$0xff]   ;;  %v5877_v47 = vld [vmem:[#allocation15 + $0x608] ss:$16 sps:$4 sm:$0xff]  }
 0x361   :  { %2343 = vmatprep.subr.bf16.mxu0 %v5834_v53  ;;  %2386 = vmatprep.subr.bf16.mxu1 %v5837_v54  ;;  %v5885_v53 = vld [vmem:[#allocation15 + $0x62c] ss:$16 sps:$4 sm:$0xff]   ;;  %v5880_v54 = vld [vmem:[#allocation15 + $0x620] ss:$16 sps:$4 sm:$0xff]  }
 0x364   :  { %2344 = vmatpush1.bf16.msra.mxu0 %v5832_v0  ;;  %2387 = vmatpush1.bf16.msra.mxu1 %v5835_v61  ;;  %v5892_v0 = vld [vmem:[#allocation15 + $0x660] ss:$16 sps:$4 sm:$0xff]   ;;  %v5895_v61 = vld [vmem:[#allocation15 + $0x668] ss:$16 sps:$4 sm:$0xff]  }
 0x365   :  { %2345 = vmatprep.subr.bf16.mxu0 %v5840_v1  ;;  %2388 = vmatprep.subr.bf16.mxu1 %v5843_v2  ;;  %v5898_v1 = vld [vmem:[#allocation15 + $0x680] ss:$16 sps:$4 sm:$0xff]   ;;  %v5906_v2 = vld [vmem:[#allocation15 + $0x6a4] ss:$16 sps:$4 sm:$0xff]  }
 0x368   :  { %2346 = vmatpush1.bf16.msra.mxu0 %v5838_v7  ;;  %2389 = vmatpush1.bf16.msra.mxu1 %v5841_v51  ;;  %v5912_v7 = vld [vmem:[#allocation15 + $0x6c4] ss:$16 sps:$4 sm:$0xff]   ;;  %v5915_v51 = vld [vmem:[#allocation15 + $0x6cc] ss:$16 sps:$4 sm:$0xff]  }
 0x369   :  { %2347 = vmatprep.subr.bf16.mxu0 %v5846_v9  ;;  %2390 = vmatprep.subr.bf16.mxu1 %v5849_v10  ;;  %v5913_v9 = vld [vmem:[#allocation15 + $0x6c8] ss:$16 sps:$4 sm:$0xff]   ;;  %v5918_v10 = vld [vmem:[#allocation15 + $0x6e4] ss:$16 sps:$4 sm:$0xff]  }
 0x36c   :  { %2348 = vmatpush1.bf16.msra.mxu0 %v5844_v17  ;;  %2391 = vmatpush1.bf16.msra.mxu1 %v5847_v18  ;;  %v5925_v17 = vld [vmem:[#allocation15 + $0x708] ss:$16 sps:$4 sm:$0xff]   ;;  %v5930_v18 = vld [vmem:[#allocation15 + $0x724] ss:$16 sps:$4 sm:$0xff]  }
 0x36d   :  { %2349 = vmatprep.subr.bf16.mxu0 %v5852_v20  ;;  %2392 = vmatprep.subr.bf16.mxu1 %v5855_v22  ;;  %v5928_v20 = vld [vmem:[#allocation15 + $0x720] ss:$16 sps:$4 sm:$0xff]   ;;  %v5931_v22 = vld [vmem:[#allocation15 + $0x728] ss:$16 sps:$4 sm:$0xff]  }
 0x370   :  { %2350 = vmatpush1.bf16.msra.mxu0 %v5850_v49  ;;  %2393 = vmatpush1.bf16.msra.mxu1 %v5853_v25  ;;  %v5936_v49 = vld [vmem:[#allocation15 + $0x744] ss:$16 sps:$4 sm:$0xff]   ;;  %v5939_v25 = vld [vmem:[#allocation15 + $0x74c] ss:$16 sps:$4 sm:$0xff]  }
 0x371   :  { %2351 = vmatprep.subr.bf16.mxu0 %v5858_v50  ;;  %2394 = vmatprep.subr.bf16.mxu1 %v5861_v26  ;;  %v5934_v50 = vld [vmem:[#allocation15 + $0x740] ss:$16 sps:$4 sm:$0xff]   ;;  %v5937_v26 = vld [vmem:[#allocation15 + $0x748] ss:$16 sps:$4 sm:$0xff]  }
 0x374   :  { %2352 = vmatpush1.bf16.msra.mxu0 %v5856_v29  ;;  %2395 = vmatpush1.bf16.msra.mxu1 %v5859_v33  ;;  %v5942_v29 = vld [vmem:[#allocation15 + $0x764] ss:$16 sps:$4 sm:$0xff]   ;;  %v5945_v33 = vld [vmem:[#allocation15 + $0x76c] ss:$16 sps:$4 sm:$0xff]  }
 0x375   :  { %2353 = vmatprep.subr.bf16.mxu0 %v5864_v34  ;;  %2396 = vmatprep.subr.bf16.mxu1 %v5867_v35  ;;  %v5940_v34 = vld [vmem:[#allocation15 + $0x760] ss:$16 sps:$4 sm:$0xff]   ;;  %v5943_v35 = vld [vmem:[#allocation15 + $0x768] ss:$16 sps:$4 sm:$0xff]  }
 0x378   :  { %2354 = vmatpush1.bf16.msra.mxu0 %v5862_v38  ;;  %2397 = vmatpush1.bf16.msra.mxu1 %v5865_v39  ;;  %v5948_v38 = vld [vmem:[#allocation15 + $0x784] ss:$16 sps:$4 sm:$0xff]   ;;  %v5951_v39 = vld [vmem:[#allocation15 + $0x78c] ss:$16 sps:$4 sm:$0xff]  }
 0x379   :  { %2355 = vmatprep.subr.bf16.mxu0 %v5870_v40  ;;  %2398 = vmatprep.subr.bf16.mxu1 %v5873_v41  ;;  %v5946_v40 = vld [vmem:[#allocation15 + $0x780] ss:$16 sps:$4 sm:$0xff]   ;;  %v5949_v41 = vld [vmem:[#allocation15 + $0x788] ss:$16 sps:$4 sm:$0xff]  }
 0x37c   :  { %2356 = vmatpush1.bf16.msra.mxu0 %v5868_v42  ;;  %2399 = vmatpush1.bf16.msra.mxu1 %v5871_v44  ;;  %v5954_v42 = vld [vmem:[#allocation15 + $0x7a4] ss:$16 sps:$4 sm:$0xff]   ;;  %v5957_v44 = vld [vmem:[#allocation15 + $0x7ac] ss:$16 sps:$4 sm:$0xff]  }
 0x37d   :  { %2820 = vmatprep.subr.bf16.mxu0 %v5876_v31  ;;  %2863 = vmatprep.subr.bf16.mxu1 %v5879_v45  ;;  %v5952_v31 = vld [vmem:[#allocation15 + $0x7a0] ss:$16 sps:$4 sm:$0xff]   ;;  %v5955_v45 = vld [vmem:[#allocation15 + $0x7a8] ss:$16 sps:$4 sm:$0xff]  }
 0x37f   :  { %2358 = vmatmul.mubr.bf16.vlgmr.msra.gmra.mrb[28].mxu0 %v6863_v32  ;;  %2401 = vmatmul.mubr.bf16.vlgmr.msra.gmra.mrb[28].mxu1 %v6863_v32  ;;  %v5897_v32 = vld [vmem:[#allocation15 + $0x66c] ss:$16 sps:$4 sm:$0xff]  }
 0x380   :  { %2821 = vmatpush1.bf16.msra.mxu0 %v5874_v46  ;;  %2864 = vmatpush1.bf16.msra.mxu1 %v5877_v47  ;;  %v5960_v46 = vld [vmem:[#allocation15 + $0x7c4] ss:$16 sps:$4 sm:$0xff]   ;;  %v5963_v47 = vld [vmem:[#allocation15 + $0x7cc] ss:$16 sps:$4 sm:$0xff]  }
 0x381   :  { %2822 = vmatprep.subr.bf16.mxu0 %v5882_v52  ;;  %2865 = vmatprep.subr.bf16.mxu1 %v5885_v53  ;;  %v5958_v52 = vld [vmem:[#allocation15 + $0x7c0] ss:$16 sps:$4 sm:$0xff]   ;;  %v5961_v53 = vld [vmem:[#allocation15 + $0x7c8] ss:$16 sps:$4 sm:$0xff]  }
 0x382   :  { %2852 = vmatprep.mubr.bf16.mxu0 %v6873_v48  ;;  %2895 = vmatprep.mubr.bf16.mxu1 %v6873_v48  ;;  %v5901_v48 = vld [vmem:[#allocation15 + $0x688] ss:$16 sps:$4 sm:$0xff]  }
 0x384   :  { %2823 = vmatpush1.bf16.msra.mxu0 %v5880_v54  ;;  %2866 = vmatpush1.bf16.msra.mxu1 %v5883_v55  ;;  %v5966_v54 = vld [vmem:[#allocation15 + $0x7e4] ss:$16 sps:$4 sm:$0xff]   ;;  %v5969_v55 = vld [vmem:[#allocation15 + $0x7ec] ss:$16 sps:$4 sm:$0xff]  }
 0x385   :  { %2824 = vmatprep.subr.bf16.mxu0 %v5888_v56  ;;  %2867 = vmatprep.subr.bf16.mxu1 %v5891_v57  ;;  %v5964_v56 = vld [vmem:[#allocation15 + $0x7e0] ss:$16 sps:$4 sm:$0xff]   ;;  %v5967_v57 = vld [vmem:[#allocation15 + $0x7e8] ss:$16 sps:$4 sm:$0xff]  }
 0x388   :  { %2825 = vmatpush1.bf16.msra.mxu0 %v5886_v58  ;;  %2868 = vmatpush1.bf16.msra.mxu1 %v5889_v59  ;;  %v5972_v58 = vld [vmem:[#allocation15 + $0x804] ss:$16 sps:$4 sm:$0xff]   ;;  %v5975_v59 = vld [vmem:[#allocation15 + $0x80c] ss:$16 sps:$4 sm:$0xff]  }
 0x389   :  { %2826 = vmatprep.subr.bf16.mxu0 %v5894_v60  ;;  %2869 = vmatprep.subr.bf16.mxu1 %v5897_v32  ;;  %v5970_v60 = vld [vmem:[#allocation15 + $0x800] ss:$16 sps:$4 sm:$0xff]   ;;  %v5973_v32 = vld [vmem:[#allocation15 + $0x808] ss:$16 sps:$4 sm:$0xff]  }
 0x38c   :  { %2827 = vmatpush1.bf16.msra.mxu0 %v5892_v0  ;;  %2870 = vmatpush1.bf16.msra.mxu1 %v5895_v61  ;;  %v5978_v0 = vld [vmem:[#allocation15 + $0x824] ss:$16 sps:$4 sm:$0xff]   ;;  %v5981_v61 = vld [vmem:[#allocation15 + $0x82c] ss:$16 sps:$4 sm:$0xff]  }
 0x38d   :  { %2828 = vmatprep.subr.bf16.mxu0 %v5900_v62  ;;  %2871 = vmatprep.subr.bf16.mxu1 %v5903_v63  ;;  %v5976_v62 = vld [vmem:[#allocation15 + $0x820] ss:$16 sps:$4 sm:$0xff]   ;;  %v5979_v63 = vld [vmem:[#allocation15 + $0x828] ss:$16 sps:$4 sm:$0xff]  }
 0x390   :  { %2829 = vmatpush1.bf16.msra.mxu0 %v5898_v1  ;;  %2872 = vmatpush1.bf16.msra.mxu1 %v5901_v48  ;;  %v5984_v1 = vld [vmem:[#allocation15 + $0x844] ss:$16 sps:$4 sm:$0xff]   ;;  %v5987_v48 = vld [vmem:[#allocation15 + $0x84c] ss:$16 sps:$4 sm:$0xff]  }
 0x391   :  { %2830 = vmatprep.subr.bf16.mxu0 %v5906_v2  ;;  %2873 = vmatprep.subr.bf16.mxu1 %v5909_v3  ;;  %v5982_v2 = vld [vmem:[#allocation15 + $0x840] ss:$16 sps:$4 sm:$0xff]   ;;  %v5985_v3 = vld [vmem:[#allocation15 + $0x848] ss:$16 sps:$4 sm:$0xff]  }
 0x394   :  { %2831 = vmatpush1.bf16.msra.mxu0 %v5904_v4  ;;  %2874 = vmatpush1.bf16.msra.mxu1 %v5907_v6  ;;  %v5990_v4 = vld [vmem:[#allocation15 + $0x864] ss:$16 sps:$4 sm:$0xff]   ;;  %v5988_v6 = vld [vmem:[#allocation15 + $0x860] ss:$16 sps:$4 sm:$0xff]  }
 0x395   :  { %2832 = vmatprep.subr.bf16.mxu0 %v5912_v7  ;;  %2875 = vmatprep.subr.bf16.mxu1 %v5915_v51  ;;  %v5991_v7 = vld [vmem:[#allocation15 + $0x868] ss:$16 sps:$4 sm:$0xff]   ;;  %v5996_v51 = vld [vmem:[#allocation15 + $0x884] ss:$16 sps:$4 sm:$0xff]  }
 0x398   :  { %2833 = vmatpush1.bf16.msra.mxu0 %v5910_v8  ;;  %2876 = vmatpush1.bf16.msra.mxu1 %v5913_v9  ;;  %v5999_v8 = vld [vmem:[#allocation15 + $0x88c] ss:$16 sps:$4 sm:$0xff]   ;;  %v5994_v9 = vld [vmem:[#allocation15 + $0x880] ss:$16 sps:$4 sm:$0xff]  }
 0x399   :  { %2834 = vmatprep.subr.bf16.mxu0 %v5918_v10  ;;  %2877 = vmatprep.subr.bf16.mxu1 %v5921_v11  ;;  %v6002_v10 = vld [vmem:[#allocation15 + $0x8a4] ss:$16 sps:$4 sm:$0xff]   ;;  %v6005_v11 = vld [vmem:[#allocation15 + $0x8ac] ss:$16 sps:$4 sm:$0xff]  }
 0x39c   :  { %2835 = vmatpush1.bf16.msra.mxu0 %v5916_v12  ;;  %2878 = vmatpush1.bf16.msra.mxu1 %v5919_v13  ;;  %v6000_v12 = vld [vmem:[#allocation15 + $0x8a0] ss:$16 sps:$4 sm:$0xff]   ;;  %v6003_v13 = vld [vmem:[#allocation15 + $0x8a8] ss:$16 sps:$4 sm:$0xff]  }
 0x39d   :  { %2836 = vmatprep.subr.bf16.mxu0 %v5924_v14  ;;  %2879 = vmatprep.subr.bf16.mxu1 %v5927_v15  ;;  %v6008_v14 = vld [vmem:[#allocation15 + $0x8c4] ss:$16 sps:$4 sm:$0xff]   ;;  %v6011_v15 = vld [vmem:[#allocation15 + $0x8cc] ss:$16 sps:$4 sm:$0xff]  }
 0x3a0   :  { %2837 = vmatpush1.bf16.msra.mxu0 %v5922_v16  ;;  %2880 = vmatpush1.bf16.msra.mxu1 %v5925_v17  ;;  %v6006_v16 = vld [vmem:[#allocation15 + $0x8c0] ss:$16 sps:$4 sm:$0xff]   ;;  %v6009_v17 = vld [vmem:[#allocation15 + $0x8c8] ss:$16 sps:$4 sm:$0xff]  }
 0x3a1   :  { %2838 = vmatprep.subr.bf16.mxu0 %v5930_v18  ;;  %2881 = vmatprep.subr.bf16.mxu1 %v5933_v19  ;;  %v6014_v18 = vld [vmem:[#allocation15 + $0x8e4] ss:$16 sps:$4 sm:$0xff]   ;;  %v6017_v19 = vld [vmem:[#allocation15 + $0x8ec] ss:$16 sps:$4 sm:$0xff]  }
 0x3a4   :  { %2839 = vmatpush1.bf16.msra.mxu0 %v5928_v20  ;;  %2882 = vmatpush1.bf16.msra.mxu1 %v5931_v22  ;;  %v6012_v20 = vld [vmem:[#allocation15 + $0x8e0] ss:$16 sps:$4 sm:$0xff]   ;;  %v6015_v22 = vld [vmem:[#allocation15 + $0x8e8] ss:$16 sps:$4 sm:$0xff]  }
 0x3a5   :  { %2840 = vmatprep.subr.bf16.mxu0 %v5936_v49  ;;  %2883 = vmatprep.subr.bf16.mxu1 %v5939_v25  ;;  %v6020_v49 = vld [vmem:[#allocation15 + $0x904] ss:$16 sps:$4 sm:$0xff]   ;;  %v6023_v25 = vld [vmem:[#allocation15 + $0x90c] ss:$16 sps:$4 sm:$0xff]  }
 0x3a8   :  { %2841 = vmatpush1.bf16.msra.mxu0 %v5934_v50  ;;  %2884 = vmatpush1.bf16.msra.mxu1 %v5937_v26  ;;  %v6018_v50 = vld [vmem:[#allocation15 + $0x900] ss:$16 sps:$4 sm:$0xff]   ;;  %v6021_v26 = vld [vmem:[#allocation15 + $0x908] ss:$16 sps:$4 sm:$0xff]  }
 0x3a9   :  { %2842 = vmatprep.subr.bf16.mxu0 %v5942_v29  ;;  %2885 = vmatprep.subr.bf16.mxu1 %v5945_v33  ;;  %v6026_v29 = vld [vmem:[#allocation15 + $0x924] ss:$16 sps:$4 sm:$0xff]   ;;  %v6029_v33 = vld [vmem:[#allocation15 + $0x92c] ss:$16 sps:$4 sm:$0xff]  }
 0x3ac   :  { %2843 = vmatpush1.bf16.msra.mxu0 %v5940_v34  ;;  %2886 = vmatpush1.bf16.msra.mxu1 %v5943_v35  ;;  %v6024_v34 = vld [vmem:[#allocation15 + $0x920] ss:$16 sps:$4 sm:$0xff]   ;;  %v6027_v35 = vld [vmem:[#allocation15 + $0x928] ss:$16 sps:$4 sm:$0xff]  }
 0x3ad   :  { %2844 = vmatprep.subr.bf16.mxu0 %v5948_v38  ;;  %2887 = vmatprep.subr.bf16.mxu1 %v5951_v39  ;;  %v6032_v38 = vld [vmem:[#allocation15 + $0x944] ss:$16 sps:$4 sm:$0xff]   ;;  %v6035_v39 = vld [vmem:[#allocation15 + $0x94c] ss:$16 sps:$4 sm:$0xff]  }
 0x3b0   :  { %2845 = vmatpush1.bf16.msra.mxu0 %v5946_v40  ;;  %2888 = vmatpush1.bf16.msra.mxu1 %v5949_v41  ;;  %v6030_v40 = vld [vmem:[#allocation15 + $0x940] ss:$16 sps:$4 sm:$0xff]   ;;  %v6033_v41 = vld [vmem:[#allocation15 + $0x948] ss:$16 sps:$4 sm:$0xff]  }
 0x3b1   :  { %2846 = vmatprep.subr.bf16.mxu0 %v5954_v42  ;;  %2889 = vmatprep.subr.bf16.mxu1 %v5957_v44  ;;  %v6038_v42 = vld [vmem:[#allocation15 + $0x964] ss:$16 sps:$4 sm:$0xff]   ;;  %v6041_v44 = vld [vmem:[#allocation15 + $0x96c] ss:$16 sps:$4 sm:$0xff]  }
 0x3b4   :  { %2847 = vmatpush1.bf16.msra.mxu0 %v5952_v31  ;;  %2890 = vmatpush1.bf16.msra.mxu1 %v5955_v45  ;;  %v6036_v31 = vld [vmem:[#allocation15 + $0x960] ss:$16 sps:$4 sm:$0xff]   ;;  %v6039_v45 = vld [vmem:[#allocation15 + $0x968] ss:$16 sps:$4 sm:$0xff]  }
 0x3b5   :  { %2848 = vmatprep.subr.bf16.mxu0 %v5960_v46  ;;  %2891 = vmatprep.subr.bf16.mxu1 %v5963_v47  ;;  %v6044_v46 = vld [vmem:[#allocation15 + $0x984] ss:$16 sps:$4 sm:$0xff]   ;;  %v6047_v47 = vld [vmem:[#allocation15 + $0x98c] ss:$16 sps:$4 sm:$0xff]  }
 0x3b8   :  { %2849 = vmatpush1.bf16.msra.mxu0 %v5958_v52  ;;  %2892 = vmatpush1.bf16.msra.mxu1 %v5961_v53  ;;  %v6042_v52 = vld [vmem:[#allocation15 + $0x980] ss:$16 sps:$4 sm:$0xff]   ;;  %v6045_v53 = vld [vmem:[#allocation15 + $0x988] ss:$16 sps:$4 sm:$0xff]  }
 0x3b9   :  { %2850 = vmatprep.subr.bf16.mxu0 %v5966_v54  ;;  %2893 = vmatprep.subr.bf16.mxu1 %v5969_v55  ;;  %v6050_v54 = vld [vmem:[#allocation15 + $0x9a4] ss:$16 sps:$4 sm:$0xff]   ;;  %v6053_v55 = vld [vmem:[#allocation15 + $0x9ac] ss:$16 sps:$4 sm:$0xff]  }
 0x3bc   :  { %2851 = vmatpush1.bf16.msra.mxu0 %v5964_v56  ;;  %2894 = vmatpush1.bf16.msra.mxu1 %v5967_v57  ;;  %v6048_v56 = vld [vmem:[#allocation15 + $0x9a0] ss:$16 sps:$4 sm:$0xff]   ;;  %v6051_v57 = vld [vmem:[#allocation15 + $0x9a8] ss:$16 sps:$4 sm:$0xff]  }
 0x3bd   :  { %3315 = vmatprep.subr.bf16.mxu0 %v5972_v58  ;;  %3358 = vmatprep.subr.bf16.mxu1 %v5975_v59  ;;  %v6056_v58 = vld [vmem:[#allocation15 + $0x9c4] ss:$16 sps:$4 sm:$0xff]   ;;  %v6059_v59 = vld [vmem:[#allocation15 + $0x9cc] ss:$16 sps:$4 sm:$0xff]  }
 0x3bf   :  { %2853 = vmatmul.mubr.bf16.vlgmr.msra.gmra.mrb[28].mxu0 %v6871_v43  ;;  %2896 = vmatmul.mubr.bf16.vlgmr.msra.gmra.mrb[28].mxu1 %v6871_v43  ;;  %v5993_v43 = vld [vmem:[#allocation15 + $0x86c] ss:$16 sps:$4 sm:$0xff]  }
 0x3c0   :  { %3316 = vmatpush1.bf16.msra.mxu0 %v5970_v60  ;;  %3359 = vmatpush1.bf16.msra.mxu1 %v5973_v32  ;;  %v6054_v60 = vld [vmem:[#allocation15 + $0x9c0] ss:$16 sps:$4 sm:$0xff]   ;;  %v6057_v32 = vld [vmem:[#allocation15 + $0x9c8] ss:$16 sps:$4 sm:$0xff]  }
 0x3c1   :  { %3317 = vmatprep.subr.bf16.mxu0 %v5978_v0  ;;  %3360 = vmatprep.subr.bf16.mxu1 %v5981_v61  ;;  %v6062_v0 = vld [vmem:[#allocation15 + $0x9e4] ss:$16 sps:$4 sm:$0xff]   ;;  %v6065_v61 = vld [vmem:[#allocation15 + $0x9ec] ss:$16 sps:$4 sm:$0xff]  }
 0x3c2   :  { %3347 = vmatprep.mubr.bf16.mxu0 %v6885_v37  ;;  %3390 = vmatprep.mubr.bf16.mxu1 %v6885_v37  ;;  %v5997_v37 = vld [vmem:[#allocation15 + $0x888] ss:$16 sps:$4 sm:$0xff]  }
 0x3c4   :  { %3318 = vmatpush1.bf16.msra.mxu0 %v5976_v62  ;;  %3361 = vmatpush1.bf16.msra.mxu1 %v5979_v63  ;;  %v6060_v62 = vld [vmem:[#allocation15 + $0x9e0] ss:$16 sps:$4 sm:$0xff]   ;;  %v6063_v63 = vld [vmem:[#allocation15 + $0x9e8] ss:$16 sps:$4 sm:$0xff]  }
 0x3c5   :  { %3319 = vmatprep.subr.bf16.mxu0 %v5984_v1  ;;  %3362 = vmatprep.subr.bf16.mxu1 %v5987_v48  ;;  %v6068_v1 = vld [vmem:[#allocation15 + $0xa04] ss:$16 sps:$4 sm:$0xff]   ;;  %v6071_v48 = vld [vmem:[#allocation15 + $0xa0c] ss:$16 sps:$4 sm:$0xff]  }
 0x3c8   :  { %3320 = vmatpush1.bf16.msra.mxu0 %v5982_v2  ;;  %3363 = vmatpush1.bf16.msra.mxu1 %v5985_v3  ;;  %v6066_v2 = vld [vmem:[#allocation15 + $0xa00] ss:$16 sps:$4 sm:$0xff]   ;;  %v6069_v3 = vld [vmem:[#allocation15 + $0xa08] ss:$16 sps:$4 sm:$0xff]  }
 0x3c9   :  { %3321 = vmatprep.subr.bf16.mxu0 %v5990_v4  ;;  %3364 = vmatprep.subr.bf16.mxu1 %v5993_v43  ;;  %v6074_v4 = vld [vmem:[#allocation15 + $0xa24] ss:$16 sps:$4 sm:$0xff]   ;;  %v6077_v43 = vld [vmem:[#allocation15 + $0xa2c] ss:$16 sps:$4 sm:$0xff]  }
 0x3cc   :  { %3322 = vmatpush1.bf16.msra.mxu0 %v5988_v6  ;;  %3365 = vmatpush1.bf16.msra.mxu1 %v5991_v7  ;;  %v6072_v6 = vld [vmem:[#allocation15 + $0xa20] ss:$16 sps:$4 sm:$0xff]   ;;  %v6075_v7 = vld [vmem:[#allocation15 + $0xa28] ss:$16 sps:$4 sm:$0xff]  }
 0x3cd   :  { %3323 = vmatprep.subr.bf16.mxu0 %v5996_v51  ;;  %3366 = vmatprep.subr.bf16.mxu1 %v5999_v8  ;;  %v6080_v51 = vld [vmem:[#allocation15 + $0xa44] ss:$16 sps:$4 sm:$0xff]   ;;  %v6083_v8 = vld [vmem:[#allocation15 + $0xa4c] ss:$16 sps:$4 sm:$0xff]  }
 0x3d0   :  { %3324 = vmatpush1.bf16.msra.mxu0 %v5994_v9  ;;  %3367 = vmatpush1.bf16.msra.mxu1 %v5997_v37  ;;  %v6078_v9 = vld [vmem:[#allocation15 + $0xa40] ss:$16 sps:$4 sm:$0xff]   ;;  %v6081_v37 = vld [vmem:[#allocation15 + $0xa48] ss:$16 sps:$4 sm:$0xff]  }
 0x3d1   :  { %3325 = vmatprep.subr.bf16.mxu0 %v6002_v10  ;;  %3368 = vmatprep.subr.bf16.mxu1 %v6005_v11  ;;  %v6086_v10 = vld [vmem:[#allocation15 + $0xa64] ss:$16 sps:$4 sm:$0xff]   ;;  %v6084_v11 = vld [vmem:[#allocation15 + $0xa60] ss:$16 sps:$4 sm:$0xff]  }
 0x3d4   :  { %3326 = vmatpush1.bf16.msra.mxu0 %v6000_v12  ;;  %3369 = vmatpush1.bf16.msra.mxu1 %v6003_v13  ;;  %v6087_v12 = vld [vmem:[#allocation15 + $0xa68] ss:$16 sps:$4 sm:$0xff]   ;;  %v6092_v13 = vld [vmem:[#allocation15 + $0xa84] ss:$16 sps:$4 sm:$0xff]  }
 0x3d5   :  { %3327 = vmatprep.subr.bf16.mxu0 %v6008_v14  ;;  %3370 = vmatprep.subr.bf16.mxu1 %v6011_v15  ;;  %v6090_v14 = vld [vmem:[#allocation15 + $0xa80] ss:$16 sps:$4 sm:$0xff]   ;;  %v6093_v15 = vld [vmem:[#allocation15 + $0xa88] ss:$16 sps:$4 sm:$0xff]  }
 0x3d8   :  { %3328 = vmatpush1.bf16.msra.mxu0 %v6006_v16  ;;  %3371 = vmatpush1.bf16.msra.mxu1 %v6009_v17  ;;  %v6098_v16 = vld [vmem:[#allocation15 + $0xaa4] ss:$16 sps:$4 sm:$0xff]   ;;  %v6101_v17 = vld [vmem:[#allocation15 + $0xaac] ss:$16 sps:$4 sm:$0xff]  }
 0x3d9   :  { %3329 = vmatprep.subr.bf16.mxu0 %v6014_v18  ;;  %3372 = vmatprep.subr.bf16.mxu1 %v6017_v19  ;;  %v6096_v18 = vld [vmem:[#allocation15 + $0xaa0] ss:$16 sps:$4 sm:$0xff]   ;;  %v6099_v19 = vld [vmem:[#allocation15 + $0xaa8] ss:$16 sps:$4 sm:$0xff]  }
 0x3dc   :  { %3330 = vmatpush1.bf16.msra.mxu0 %v6012_v20  ;;  %3373 = vmatpush1.bf16.msra.mxu1 %v6015_v22  ;;  %v6104_v20 = vld [vmem:[#allocation15 + $0xac4] ss:$16 sps:$4 sm:$0xff]   ;;  %v6107_v22 = vld [vmem:[#allocation15 + $0xacc] ss:$16 sps:$4 sm:$0xff]  }
 0x3dd   :  { %3331 = vmatprep.subr.bf16.mxu0 %v6020_v49  ;;  %3374 = vmatprep.subr.bf16.mxu1 %v6023_v25  ;;  %v6102_v49 = vld [vmem:[#allocation15 + $0xac0] ss:$16 sps:$4 sm:$0xff]   ;;  %v6105_v25 = vld [vmem:[#allocation15 + $0xac8] ss:$16 sps:$4 sm:$0xff]  }
 0x3e0   :  { %3332 = vmatpush1.bf16.msra.mxu0 %v6018_v50  ;;  %3375 = vmatpush1.bf16.msra.mxu1 %v6021_v26  ;;  %v6110_v50 = vld [vmem:[#allocation15 + $0xae4] ss:$16 sps:$4 sm:$0xff]   ;;  %v6113_v26 = vld [vmem:[#allocation15 + $0xaec] ss:$16 sps:$4 sm:$0xff]  }
 0x3e1   :  { %3333 = vmatprep.subr.bf16.mxu0 %v6026_v29  ;;  %3376 = vmatprep.subr.bf16.mxu1 %v6029_v33  ;;  %v6108_v29 = vld [vmem:[#allocation15 + $0xae0] ss:$16 sps:$4 sm:$0xff]   ;;  %v6111_v33 = vld [vmem:[#allocation15 + $0xae8] ss:$16 sps:$4 sm:$0xff]  }
 0x3e4   :  { %3334 = vmatpush1.bf16.msra.mxu0 %v6024_v34  ;;  %3377 = vmatpush1.bf16.msra.mxu1 %v6027_v35  ;;  %v6116_v34 = vld [vmem:[#allocation15 + $0xb04] ss:$16 sps:$4 sm:$0xff]   ;;  %v6119_v35 = vld [vmem:[#allocation15 + $0xb0c] ss:$16 sps:$4 sm:$0xff]  }
 0x3e5   :  { %3335 = vmatprep.subr.bf16.mxu0 %v6032_v38  ;;  %3378 = vmatprep.subr.bf16.mxu1 %v6035_v39  ;;  %v6114_v38 = vld [vmem:[#allocation15 + $0xb00] ss:$16 sps:$4 sm:$0xff]   ;;  %v6117_v39 = vld [vmem:[#allocation15 + $0xb08] ss:$16 sps:$4 sm:$0xff]  }
 0x3e8   :  { %3336 = vmatpush1.bf16.msra.mxu0 %v6030_v40  ;;  %3379 = vmatpush1.bf16.msra.mxu1 %v6033_v41  ;;  %v6122_v40 = vld [vmem:[#allocation15 + $0xb24] ss:$16 sps:$4 sm:$0xff]   ;;  %v6125_v41 = vld [vmem:[#allocation15 + $0xb2c] ss:$16 sps:$4 sm:$0xff]  }
 0x3e9   :  { %3337 = vmatprep.subr.bf16.mxu0 %v6038_v42  ;;  %3380 = vmatprep.subr.bf16.mxu1 %v6041_v44  ;;  %v6120_v42 = vld [vmem:[#allocation15 + $0xb20] ss:$16 sps:$4 sm:$0xff]   ;;  %v6123_v44 = vld [vmem:[#allocation15 + $0xb28] ss:$16 sps:$4 sm:$0xff]  }
 0x3ec   :  { %3338 = vmatpush1.bf16.msra.mxu0 %v6036_v31  ;;  %3381 = vmatpush1.bf16.msra.mxu1 %v6039_v45  ;;  %v6128_v31 = vld [vmem:[#allocation15 + $0xb44] ss:$16 sps:$4 sm:$0xff]   ;;  %v6131_v45 = vld [vmem:[#allocation15 + $0xb4c] ss:$16 sps:$4 sm:$0xff]  }
 0x3ed   :  { %3339 = vmatprep.subr.bf16.mxu0 %v6044_v46  ;;  %3382 = vmatprep.subr.bf16.mxu1 %v6047_v47  ;;  %v6126_v46 = vld [vmem:[#allocation15 + $0xb40] ss:$16 sps:$4 sm:$0xff]   ;;  %v6129_v47 = vld [vmem:[#allocation15 + $0xb48] ss:$16 sps:$4 sm:$0xff]  }
 0x3f0   :  { %3340 = vmatpush1.bf16.msra.mxu0 %v6042_v52  ;;  %3383 = vmatpush1.bf16.msra.mxu1 %v6045_v53  ;;  %v6134_v52 = vld [vmem:[#allocation15 + $0xb64] ss:$16 sps:$4 sm:$0xff]   ;;  %v6137_v53 = vld [vmem:[#allocation15 + $0xb6c] ss:$16 sps:$4 sm:$0xff]  }
 0x3f1   :  { %3341 = vmatprep.subr.bf16.mxu0 %v6050_v54  ;;  %3384 = vmatprep.subr.bf16.mxu1 %v6053_v55  ;;  %v6132_v54 = vld [vmem:[#allocation15 + $0xb60] ss:$16 sps:$4 sm:$0xff]   ;;  %v6135_v55 = vld [vmem:[#allocation15 + $0xb68] ss:$16 sps:$4 sm:$0xff]  }
 0x3f4   :  { %3342 = vmatpush1.bf16.msra.mxu0 %v6048_v56  ;;  %3385 = vmatpush1.bf16.msra.mxu1 %v6051_v57  ;;  %v6140_v56 = vld [vmem:[#allocation15 + $0xb84] ss:$16 sps:$4 sm:$0xff]   ;;  %v6143_v57 = vld [vmem:[#allocation15 + $0xb8c] ss:$16 sps:$4 sm:$0xff]  }
 0x3f5   :  { %3343 = vmatprep.subr.bf16.mxu0 %v6056_v58  ;;  %3386 = vmatprep.subr.bf16.mxu1 %v6059_v59  ;;  %v6138_v58 = vld [vmem:[#allocation15 + $0xb80] ss:$16 sps:$4 sm:$0xff]   ;;  %v6141_v59 = vld [vmem:[#allocation15 + $0xb88] ss:$16 sps:$4 sm:$0xff]  }
 0x3f8   :  { %3344 = vmatpush1.bf16.msra.mxu0 %v6054_v60  ;;  %3387 = vmatpush1.bf16.msra.mxu1 %v6057_v32  ;;  %v6146_v60 = vld [vmem:[#allocation15 + $0xba4] ss:$16 sps:$4 sm:$0xff]   ;;  %v6149_v32 = vld [vmem:[#allocation15 + $0xbac] ss:$16 sps:$4 sm:$0xff]  }
 0x3f9   :  { %3345 = vmatprep.subr.bf16.mxu0 %v6062_v0  ;;  %3388 = vmatprep.subr.bf16.mxu1 %v6065_v61  ;;  %v6144_v0 = vld [vmem:[#allocation15 + $0xba0] ss:$16 sps:$4 sm:$0xff]   ;;  %v6147_v61 = vld [vmem:[#allocation15 + $0xba8] ss:$16 sps:$4 sm:$0xff]  }
 0x3fc   :  { %3346 = vmatpush1.bf16.msra.mxu0 %v6060_v62  ;;  %3389 = vmatpush1.bf16.msra.mxu1 %v6063_v63  ;;  %v6152_v62 = vld [vmem:[#allocation15 + $0xbc4] ss:$16 sps:$4 sm:$0xff]   ;;  %v6155_v63 = vld [vmem:[#allocation15 + $0xbcc] ss:$16 sps:$4 sm:$0xff]  }
 0x3fd   :  { %3810 = vmatprep.subr.bf16.mxu0 %v6068_v1  ;;  %3853 = vmatprep.subr.bf16.mxu1 %v6071_v48  ;;  %v6150_v1 = vld [vmem:[#allocation15 + $0xbc0] ss:$16 sps:$4 sm:$0xff]   ;;  %v6153_v48 = vld [vmem:[#allocation15 + $0xbc8] ss:$16 sps:$4 sm:$0xff]  }
 0x3ff   :  { %3348 = vmatmul.mubr.bf16.vlgmr.msra.gmra.mrb[28].mxu0 %v6883_v36  ;;  %3391 = vmatmul.mubr.bf16.vlgmr.msra.gmra.mrb[28].mxu1 %v6883_v36  ;;  %v6089_v36 = vld [vmem:[#allocation15 + $0xa6c] ss:$16 sps:$4 sm:$0xff]  }
 0x400   :  { %3811 = vmatpush1.bf16.msra.mxu0 %v6066_v2  ;;  %3842 = vmatprep.mubr.bf16.mxu0 %v6894_v5  ;;  %v6158_v2 = vld [vmem:[#allocation15 + $0xbe4] ss:$16 sps:$4 sm:$0xff]  }
 0x401   :  { %3854 = vmatpush1.bf16.msra.mxu1 %v6069_v3  ;;  %3885 = vmatprep.mubr.bf16.mxu1 %v6894_v5  ;;  %v6095_v5 = vld [vmem:[#allocation15 + $0xa8c] ss:$16 sps:$4 sm:$0xff]  }
 0x402   :  { %3812 = vmatprep.subr.bf16.mxu0 %v6074_v4  ;;  %3855 = vmatprep.subr.bf16.mxu1 %v6077_v43  ;;  %v6161_v3 = vld [vmem:[#allocation15 + $0xbec] ss:$16 sps:$4 sm:$0xff]   ;;  %v6156_v4 = vld [vmem:[#allocation15 + $0xbe0] ss:$16 sps:$4 sm:$0xff]   ;;  %v6159_v43 = vld [vmem:[#allocation15 + $0xbe8] ss:$16 sps:$4 sm:$0xff]  }
 0x404   :  { %3813 = vmatpush1.bf16.msra.mxu0 %v6072_v6  ;;  %v6164_v6 = vld [vmem:[#allocation15 + $0xc04] ss:$16 sps:$4 sm:$0xff]  }
 0x405   :  { %3856 = vmatpush1.bf16.msra.mxu1 %v6075_v7  ;;  %3814 = vmatprep.subr.bf16.mxu0 %v6080_v51  ;;  %v6167_v7 = vld [vmem:[#allocation15 + $0xc0c] ss:$16 sps:$4 sm:$0xff]   ;;  %v6162_v51 = vld [vmem:[#allocation15 + $0xc00] ss:$16 sps:$4 sm:$0xff]  }
 0x406   :  { %3857 = vmatprep.subr.bf16.mxu1 %v6083_v8  ;;  %v6165_v8 = vld [vmem:[#allocation15 + $0xc08] ss:$16 sps:$4 sm:$0xff]  }
 0x408   :  { %3815 = vmatpush1.bf16.msra.mxu0 %v6078_v9  ;;  %v6170_v9 = vld [vmem:[#allocation15 + $0xc24] ss:$16 sps:$4 sm:$0xff]  }
 0x409   :  { %3858 = vmatpush1.bf16.msra.mxu1 %v6081_v37  ;;  %3816 = vmatprep.subr.bf16.mxu0 %v6086_v10  ;;  %v6173_v37 = vld [vmem:[#allocation15 + $0xc2c] ss:$16 sps:$4 sm:$0xff]   ;;  %v6168_v10 = vld [vmem:[#allocation15 + $0xc20] ss:$16 sps:$4 sm:$0xff]  }
 0x40a   :  { %3859 = vmatprep.subr.bf16.mxu1 %v6089_v36  ;;  %v6171_v36 = vld [vmem:[#allocation15 + $0xc28] ss:$16 sps:$4 sm:$0xff]  }
 0x40c   :  { %3817 = vmatpush1.bf16.msra.mxu0 %v6084_v11  ;;  %v6176_v11 = vld [vmem:[#allocation15 + $0xc44] ss:$16 sps:$4 sm:$0xff]  }
 0x40d   :  { %3860 = vmatpush1.bf16.msra.mxu1 %v6087_v12  ;;  %3818 = vmatprep.subr.bf16.mxu0 %v6092_v13  ;;  %v6179_v12 = vld [vmem:[#allocation15 + $0xc4c] ss:$16 sps:$4 sm:$0xff]   ;;  %v6174_v13 = vld [vmem:[#allocation15 + $0xc40] ss:$16 sps:$4 sm:$0xff]  }
 0x40e   :  { %3861 = vmatprep.subr.bf16.mxu1 %v6095_v5  ;;  %v6177_v5 = vld [vmem:[#allocation15 + $0xc48] ss:$16 sps:$4 sm:$0xff]  }
 0x410   :  { %3819 = vmatpush1.bf16.msra.mxu0 %v6090_v14  ;;  %v6182_v14 = vld [vmem:[#allocation15 + $0xc64] ss:$16 sps:$4 sm:$0xff]  }
 0x411   :  { %3862 = vmatpush1.bf16.msra.mxu1 %v6093_v15  ;;  %3820 = vmatprep.subr.bf16.mxu0 %v6098_v16  ;;  %v6180_v15 = vld [vmem:[#allocation15 + $0xc60] ss:$16 sps:$4 sm:$0xff]   ;;  %v6183_v16 = vld [vmem:[#allocation15 + $0xc68] ss:$16 sps:$4 sm:$0xff]  }
 0x412   :  { %3863 = vmatprep.subr.bf16.mxu1 %v6101_v17  ;;  %v6188_v17 = vld [vmem:[#allocation15 + $0xc84] ss:$16 sps:$4 sm:$0xff]  }
 0x414   :  { %3821 = vmatpush1.bf16.msra.mxu0 %v6096_v18  ;;  %v6191_v18 = vld [vmem:[#allocation15 + $0xc8c] ss:$16 sps:$4 sm:$0xff]  }
 0x415   :  { %3864 = vmatpush1.bf16.msra.mxu1 %v6099_v19  ;;  %3822 = vmatprep.subr.bf16.mxu0 %v6104_v20  ;;  %v6189_v19 = vld [vmem:[#allocation15 + $0xc88] ss:$16 sps:$4 sm:$0xff]   ;;  %v6194_v20 = vld [vmem:[#allocation15 + $0xca4] ss:$16 sps:$4 sm:$0xff]  }
 0x416   :  { %3865 = vmatprep.subr.bf16.mxu1 %v6107_v22  ;;  %v6197_v22 = vld [vmem:[#allocation15 + $0xcac] ss:$16 sps:$4 sm:$0xff]  }
 0x418   :  { %3823 = vmatpush1.bf16.msra.mxu0 %v6102_v49  ;;  %v6192_v49 = vld [vmem:[#allocation15 + $0xca0] ss:$16 sps:$4 sm:$0xff]  }
 0x419   :  { %3866 = vmatpush1.bf16.msra.mxu1 %v6105_v25  ;;  %3824 = vmatprep.subr.bf16.mxu0 %v6110_v50  ;;  %v6195_v25 = vld [vmem:[#allocation15 + $0xca8] ss:$16 sps:$4 sm:$0xff]   ;;  %v6200_v50 = vld [vmem:[#allocation15 + $0xcc4] ss:$16 sps:$4 sm:$0xff]  }
 0x41a   :  { %3867 = vmatprep.subr.bf16.mxu1 %v6113_v26  ;;  %v6203_v26 = vld [vmem:[#allocation15 + $0xccc] ss:$16 sps:$4 sm:$0xff]  }
 0x41c   :  { %3825 = vmatpush1.bf16.msra.mxu0 %v6108_v29  ;;  %v6198_v29 = vld [vmem:[#allocation15 + $0xcc0] ss:$16 sps:$4 sm:$0xff]  }
 0x41d   :  { %3868 = vmatpush1.bf16.msra.mxu1 %v6111_v33  ;;  %3826 = vmatprep.subr.bf16.mxu0 %v6116_v34  ;;  %v6201_v33 = vld [vmem:[#allocation15 + $0xcc8] ss:$16 sps:$4 sm:$0xff]   ;;  %v6206_v34 = vld [vmem:[#allocation15 + $0xce4] ss:$16 sps:$4 sm:$0xff]  }
 0x41e   :  { %3869 = vmatprep.subr.bf16.mxu1 %v6119_v35  ;;  %v6209_v35 = vld [vmem:[#allocation15 + $0xcec] ss:$16 sps:$4 sm:$0xff]  }
 0x420   :  { %3827 = vmatpush1.bf16.msra.mxu0 %v6114_v38  ;;  %v6204_v38 = vld [vmem:[#allocation15 + $0xce0] ss:$16 sps:$4 sm:$0xff]  }
 0x421   :  { %3870 = vmatpush1.bf16.msra.mxu1 %v6117_v39  ;;  %3828 = vmatprep.subr.bf16.mxu0 %v6122_v40  ;;  %v6207_v39 = vld [vmem:[#allocation15 + $0xce8] ss:$16 sps:$4 sm:$0xff]   ;;  %v6212_v40 = vld [vmem:[#allocation15 + $0xd04] ss:$16 sps:$4 sm:$0xff]  }
 0x422   :  { %3871 = vmatprep.subr.bf16.mxu1 %v6125_v41  ;;  %v6215_v41 = vld [vmem:[#allocation15 + $0xd0c] ss:$16 sps:$4 sm:$0xff]  }
 0x424   :  { %3829 = vmatpush1.bf16.msra.mxu0 %v6120_v42  ;;  %v6210_v42 = vld [vmem:[#allocation15 + $0xd00] ss:$16 sps:$4 sm:$0xff]  }
 0x425   :  { %3872 = vmatpush1.bf16.msra.mxu1 %v6123_v44  ;;  %3830 = vmatprep.subr.bf16.mxu0 %v6128_v31  ;;  %v6213_v44 = vld [vmem:[#allocation15 + $0xd08] ss:$16 sps:$4 sm:$0xff]   ;;  %v6218_v31 = vld [vmem:[#allocation15 + $0xd24] ss:$16 sps:$4 sm:$0xff]  }
 0x426   :  { %3873 = vmatprep.subr.bf16.mxu1 %v6131_v45  ;;  %v6221_v45 = vld [vmem:[#allocation15 + $0xd2c] ss:$16 sps:$4 sm:$0xff]  }
 0x428   :  { %3831 = vmatpush1.bf16.msra.mxu0 %v6126_v46  ;;  %v6216_v46 = vld [vmem:[#allocation15 + $0xd20] ss:$16 sps:$4 sm:$0xff]  }
 0x429   :  { %3874 = vmatpush1.bf16.msra.mxu1 %v6129_v47  ;;  %3832 = vmatprep.subr.bf16.mxu0 %v6134_v52  ;;  %v6219_v47 = vld [vmem:[#allocation15 + $0xd28] ss:$16 sps:$4 sm:$0xff]   ;;  %v6224_v52 = vld [vmem:[#allocation15 + $0xd44] ss:$16 sps:$4 sm:$0xff]  }
 0x42a   :  { %3875 = vmatprep.subr.bf16.mxu1 %v6137_v53  ;;  %v6227_v53 = vld [vmem:[#allocation15 + $0xd4c] ss:$16 sps:$4 sm:$0xff]  }
 0x42c   :  { %3833 = vmatpush1.bf16.msra.mxu0 %v6132_v54  ;;  %v6222_v54 = vld [vmem:[#allocation15 + $0xd40] ss:$16 sps:$4 sm:$0xff]  }
 0x42d   :  { %3876 = vmatpush1.bf16.msra.mxu1 %v6135_v55  ;;  %3834 = vmatprep.subr.bf16.mxu0 %v6140_v56  ;;  %v6225_v55 = vld [vmem:[#allocation15 + $0xd48] ss:$16 sps:$4 sm:$0xff]   ;;  %v6230_v56 = vld [vmem:[#allocation15 + $0xd64] ss:$16 sps:$4 sm:$0xff]  }
 0x42e   :  { %3877 = vmatprep.subr.bf16.mxu1 %v6143_v57  ;;  %v6233_v57 = vld [vmem:[#allocation15 + $0xd6c] ss:$16 sps:$4 sm:$0xff]  }
 0x430   :  { %3835 = vmatpush1.bf16.msra.mxu0 %v6138_v58  ;;  %v6228_v58 = vld [vmem:[#allocation15 + $0xd60] ss:$16 sps:$4 sm:$0xff]  }
 0x431   :  { %3878 = vmatpush1.bf16.msra.mxu1 %v6141_v59  ;;  %3836 = vmatprep.subr.bf16.mxu0 %v6146_v60  ;;  %v6231_v59 = vld [vmem:[#allocation15 + $0xd68] ss:$16 sps:$4 sm:$0xff]   ;;  %v6236_v60 = vld [vmem:[#allocation15 + $0xd84] ss:$16 sps:$4 sm:$0xff]  }
 0x432   :  { %3879 = vmatprep.subr.bf16.mxu1 %v6149_v32  ;;  %v6239_v32 = vld [vmem:[#allocation15 + $0xd8c] ss:$16 sps:$4 sm:$0xff]  }
 0x434   :  { %3837 = vmatpush1.bf16.msra.mxu0 %v6144_v0  ;;  %v6234_v0 = vld [vmem:[#allocation15 + $0xd80] ss:$16 sps:$4 sm:$0xff]  }
 0x435   :  { %3880 = vmatpush1.bf16.msra.mxu1 %v6147_v61  ;;  %3838 = vmatprep.subr.bf16.mxu0 %v6152_v62  ;;  %v6237_v61 = vld [vmem:[#allocation15 + $0xd88] ss:$16 sps:$4 sm:$0xff]   ;;  %v6242_v62 = vld [vmem:[#allocation15 + $0xda4] ss:$16 sps:$4 sm:$0xff]  }
 0x436   :  { %3881 = vmatprep.subr.bf16.mxu1 %v6155_v63  ;;  %v6245_v63 = vld [vmem:[#allocation15 + $0xdac] ss:$16 sps:$4 sm:$0xff]  }
 0x438   :  { %3839 = vmatpush1.bf16.msra.mxu0 %v6150_v1  ;;  %v6240_v1 = vld [vmem:[#allocation15 + $0xda0] ss:$16 sps:$4 sm:$0xff]  }
 0x439   :  { %3882 = vmatpush1.bf16.msra.mxu1 %v6153_v48  ;;  %3840 = vmatprep.subr.bf16.mxu0 %v6158_v2  ;;  %v6243_v48 = vld [vmem:[#allocation15 + $0xda8] ss:$16 sps:$4 sm:$0xff]   ;;  %v6248_v2 = vld [vmem:[#allocation15 + $0xdc4] ss:$16 sps:$4 sm:$0xff]  }
 0x43a   :  { %3883 = vmatprep.subr.bf16.mxu1 %v6161_v3  ;;  %v6251_v3 = vld [vmem:[#allocation15 + $0xdcc] ss:$16 sps:$4 sm:$0xff]  }
 0x43c   :  { %3841 = vmatpush1.bf16.msra.mxu0 %v6156_v4  ;;  %v6246_v4 = vld [vmem:[#allocation15 + $0xdc0] ss:$16 sps:$4 sm:$0xff]  }
 0x43d   :  { %3884 = vmatpush1.bf16.msra.mxu1 %v6159_v43  ;;  %4305 = vmatprep.subr.bf16.mxu0 %v6164_v6  ;;  %v6249_v43 = vld [vmem:[#allocation15 + $0xdc8] ss:$16 sps:$4 sm:$0xff]   ;;  %v6254_v6 = vld [vmem:[#allocation15 + $0xde4] ss:$16 sps:$4 sm:$0xff]  }
 0x43e   :  { %4348 = vmatprep.subr.bf16.mxu1 %v6167_v7  ;;  %v6257_v7 = vld [vmem:[#allocation15 + $0xdec] ss:$16 sps:$4 sm:$0xff]  }
 0x43f   :  { %3843 = vmatmul.mubr.bf16.vlgmr.msra.gmra.mrb[28].mxu0 %v6891_v21 }
 0x440   :  { %3886 = vmatmul.mubr.bf16.vlgmr.msra.gmra.mrb[28].mxu1 %v6891_v21  ;;  %4306 = vmatpush1.bf16.msra.mxu0 %v6162_v51  ;;  %v6185_v21 = vld [vmem:[#allocation15 + $0xc6c] ss:$16 sps:$4 sm:$0xff]   ;;  %v6252_v51 = vld [vmem:[#allocation15 + $0xde0] ss:$16 sps:$4 sm:$0xff]  }
 0x441   :  { %4337 = vmatprep.mubr.bf16.mxu0 %v6901_v24  ;;  %4349 = vmatpush1.bf16.msra.mxu1 %v6165_v8  ;;  %v6255_v8 = vld [vmem:[#allocation15 + $0xde8] ss:$16 sps:$4 sm:$0xff]  }
 0x442   :  { %4380 = vmatprep.mubr.bf16.mxu1 %v6901_v24  ;;  %4307 = vmatprep.subr.bf16.mxu0 %v6170_v9  ;;  %v6186_v24 = vld [vmem:[#allocation15 + $0xc80] ss:$16 sps:$4 sm:$0xff]   ;;  %v6258_v9 = vld [vmem:[#allocation18 + $0x40] sm:$0xff]  }
 0x443   :  { %4350 = vmatprep.subr.bf16.mxu1 %v6173_v37  ;;  %v6259_v37 = vld [vmem:[#allocation18] sm:$0xff]  }
 0x444   :  { %4308 = vmatpush1.bf16.msra.mxu0 %v6168_v10  ;;  %v6260_v10 = vld [vmem:[#allocation18 + $0x48] sm:$0xff]  }
 0x445   :  { %4351 = vmatpush1.bf16.msra.mxu1 %v6171_v36  ;;  %4309 = vmatprep.subr.bf16.mxu0 %v6176_v11  ;;  %v6261_v36 = vld [vmem:[#allocation18 + $0x8] sm:$0xff]   ;;  %v6262_v11 = vld [vmem:[#allocation18 + $0x50] sm:$0xff]  }
 0x446   :  { %4352 = vmatprep.subr.bf16.mxu1 %v6179_v12  ;;  %v6263_v12 = vld [vmem:[#allocation18 + $0x10] sm:$0xff]  }
 0x448   :  { %4310 = vmatpush1.bf16.msra.mxu0 %v6174_v13  ;;  %v6264_v13 = vld [vmem:[#allocation18 + $0x58] sm:$0xff]  }
 0x449   :  { %4353 = vmatpush1.bf16.msra.mxu1 %v6177_v5  ;;  %4311 = vmatprep.subr.bf16.mxu0 %v6182_v14  ;;  %v6265_v5 = vld [vmem:[#allocation18 + $0x18] sm:$0xff]   ;;  %v6266_v14 = vld [vmem:[#allocation18 + $0x60] sm:$0xff]  }
 0x44a   :  { %4354 = vmatprep.subr.bf16.mxu1 %v6185_v21  ;;  %v6267_v21 = vld [vmem:[#allocation18 + $0x20] sm:$0xff]  }
 0x44c   :  { %4312 = vmatpush1.bf16.msra.mxu0 %v6180_v15  ;;  %v6268_v15 = vld [vmem:[#allocation18 + $0x68] sm:$0xff]  }
 0x44d   :  { %4355 = vmatpush1.bf16.msra.mxu1 %v6183_v16  ;;  %4313 = vmatprep.subr.bf16.mxu0 %v6188_v17  ;;  %v6269_v16 = vld [vmem:[#allocation18 + $0x28] sm:$0xff]   ;;  %v6271_v17 = vld [vmem:[#allocation18 + $0x30] sm:$0xff]  }
 0x44e   :  { %4356 = vmatprep.subr.bf16.mxu1 %v6191_v18  ;;  %v6272_v18 = vld [vmem:[#allocation18 + $0x78] sm:$0xff]  }
 0x450   :  { %4314 = vmatpush1.bf16.msra.mxu0 %v6186_v24  ;;  %v6273_v24 = vld [vmem:[#allocation18 + $0x38] sm:$0xff]  }
 0x451   :  { %4357 = vmatpush1.bf16.msra.mxu1 %v6189_v19  ;;  %4315 = vmatprep.subr.bf16.mxu0 %v6194_v20  ;;  %v6274_v19 = vld [vmem:[#allocation18 + $0xc0] sm:$0xff]   ;;  %v4415_v20 = vld [vmem:[#allocation16] sm:$0xf] }
 0x452   :  { %4358 = vmatprep.subr.bf16.mxu1 %v6197_v22  ;;  %v4427_v22 = vsub.s32 2, %v6801_v27 }
 0x454   :  { %4316 = vmatpush1.bf16.msra.mxu0 %v6192_v49  ;;  %v4431_v49 = vsub.s32 3, %v6801_v27 }
 0x455   :  { %4359 = vmatpush1.bf16.msra.mxu1 %v6195_v25  ;;  %4317 = vmatprep.subr.bf16.mxu0 %v6200_v50  ;;  %v4420_v25 = vrot.slane %v4415_v20, %v6804_v28  ;;  %v4428_v50 = vrot.slane %v4415_v20, %v4427_v22 }
 0x456   :  { %4360 = vmatprep.subr.bf16.mxu1 %v6203_v26  ;;  %v4424_v26 = vrot.slane %v4415_v20, %v6807_v30 }
 0x458   :  { %4318 = vmatpush1.bf16.msra.mxu0 %v6198_v29  ;;  %v4432_v29 = vrot.slane %v4415_v20, %v4431_v49 }
 0x459   :  { %4361 = vmatpush1.bf16.msra.mxu1 %v6201_v33  ;;  %4319 = vmatprep.subr.bf16.mxu0 %v6206_v34 }
 0x45a   :  { %4362 = vmatprep.subr.bf16.mxu1 %v6209_v35 }
 0x45c   :  { %4320 = vmatpush1.bf16.msra.mxu0 %v6204_v38 }
 0x45d   :  { %4363 = vmatpush1.bf16.msra.mxu1 %v6207_v39  ;;  %4321 = vmatprep.subr.bf16.mxu0 %v6212_v40 }
 0x45e   :  { %4364 = vmatprep.subr.bf16.mxu1 %v6215_v41 }
 0x460   :  { %4322 = vmatpush1.bf16.msra.mxu0 %v6210_v42 }
 0x461   :  { %4365 = vmatpush1.bf16.msra.mxu1 %v6213_v44  ;;  %4323 = vmatprep.subr.bf16.mxu0 %v6218_v31 }
 0x462   :  { %4366 = vmatprep.subr.bf16.mxu1 %v6221_v45 }
 0x464   :  { %4324 = vmatpush1.bf16.msra.mxu0 %v6216_v46 }
 0x465   :  { %4367 = vmatpush1.bf16.msra.mxu1 %v6219_v47  ;;  %4325 = vmatprep.subr.bf16.mxu0 %v6224_v52 }
 0x466   :  { %4368 = vmatprep.subr.bf16.mxu1 %v6227_v53 }
 0x468   :  { %4326 = vmatpush1.bf16.msra.mxu0 %v6222_v54 }
 0x469   :  { %4369 = vmatpush1.bf16.msra.mxu1 %v6225_v55  ;;  %4327 = vmatprep.subr.bf16.mxu0 %v6230_v56 }
 0x46a   :  { %4370 = vmatprep.subr.bf16.mxu1 %v6233_v57 }
 0x46c   :  { %4328 = vmatpush1.bf16.msra.mxu0 %v6228_v58 }
 0x46d   :  { %4371 = vmatpush1.bf16.msra.mxu1 %v6231_v59  ;;  %4329 = vmatprep.subr.bf16.mxu0 %v6236_v60 }
 0x46e   :  { %4372 = vmatprep.subr.bf16.mxu1 %v6239_v32 }
 0x470   :  { %4330 = vmatpush1.bf16.msra.mxu0 %v6234_v0 }
 0x471   :  { %4373 = vmatpush1.bf16.msra.mxu1 %v6237_v61  ;;  %4331 = vmatprep.subr.bf16.mxu0 %v6242_v62  ;;  %v6275_v61 = vld [vmem:[#allocation18 + $0x80] sm:$0xff]  }
 0x472   :  { %4374 = vmatprep.subr.bf16.mxu1 %v6245_v63  ;;  %v6276_v63 = vld [vmem:[#allocation18 + $0xc8] sm:$0xff]  }
 0x474   :  { %4332 = vmatpush1.bf16.msra.mxu0 %v6240_v1  ;;  %v6277_v1 = vld [vmem:[#allocation18 + $0x88] sm:$0xff]  }
 0x475   :  { %4375 = vmatpush1.bf16.msra.mxu1 %v6243_v48  ;;  %4333 = vmatprep.subr.bf16.mxu0 %v6248_v2  ;;  %v6278_v48 = vld [vmem:[#allocation18 + $0xd0] sm:$0xff]  }
 0x476   :  { %4376 = vmatprep.subr.bf16.mxu1 %v6251_v3  ;;  %v6279_v2 = vld [vmem:[#allocation18 + $0x90] sm:$0xff]   ;;  %v6280_v3 = vld [vmem:[#allocation18 + $0xd8] sm:$0xff]  }
 0x478   :  { %4334 = vmatpush1.bf16.msra.mxu0 %v6246_v4  ;;  %v6281_v4 = vld [vmem:[#allocation18 + $0x98] sm:$0xff]  }
 0x479   :  { %4377 = vmatpush1.bf16.msra.mxu1 %v6249_v43  ;;  %4335 = vmatprep.subr.bf16.mxu0 %v6254_v6  ;;  %v6282_v43 = vld [vmem:[#allocation18 + $0xe0] sm:$0xff]  }
 0x47a   :  { %4378 = vmatprep.subr.bf16.mxu1 %v6257_v7  ;;  %v6283_v6 = vld [vmem:[#allocation18 + $0xa0] sm:$0xff]   ;;  %v6284_v7 = vld [vmem:[#allocation18 + $0xe8] sm:$0xff]  }
 0x47c   :  { %4336 = vmatpush1.bf16.msra.mxu0 %v6252_v51  ;;  %v6285_v51 = vld [vmem:[#allocation18 + $0xa8] sm:$0xff]  }
 0x47d   :  { %4379 = vmatpush1.bf16.msra.mxu1 %v6255_v8  ;;  %5387 = vmatprep.subr.bf16.mxu0 %v6258_v9  ;;  %v6286_v8 = vld [vmem:[#allocation18 + $0xf0] sm:$0xff]  }
 0x47e   :  { %v6287_v9 = vld [vmem:[#allocation18 + $0xb0] sm:$0xff]  }
 0x47f   :  { %4338 = vmatmul.mubr.bf16.vlgmr.msra.gmra.mrb[28].mxu0 %v6899_v23 }
 0x480   :  { %4381 = vmatmul.mubr.bf16.vlgmr.msra.gmra.mrb[28].mxu1 %v6899_v23  ;;  %5388 = vmatpush3.bf16.msra.mxu0 %v6259_v37  ;;  %v6270_v23 = vld [vmem:[#allocation18 + $0x70] sm:$0xff]   ;;  %v6288_v37 = vld [vmem:[#allocation18 + $0xf8] sm:$0xff]  }
 0x481   :  { %5389 = vmatprep.subr.bf16.mxu0 %v6260_v10  ;;  %v6289_v10 = vld [vmem:[#allocation18 + $0xb8] sm:$0xff]  }
 0x484   :  { %5390 = vmatpush3.bf16.msra.mxu0 %v6261_v36 }
 0x485   :  { %5391 = vmatprep.subr.bf16.mxu0 %v6262_v11 }
 0x488   :  { %5392 = vmatpush3.bf16.msra.mxu0 %v6263_v12 }
 0x489   :  { %5393 = vmatprep.subr.bf16.mxu0 %v6264_v13 }
 0x48c   :  { %5394 = vmatpush3.bf16.msra.mxu0 %v6265_v5 }
 0x48d   :  { %5395 = vmatprep.subr.bf16.mxu0 %v6266_v14 }
 0x490   :  { %5396 = vmatpush3.bf16.msra.mxu0 %v6267_v21  ;;  %v5354_v21 = vld [vmem:[#allocation19] ss:$0 sm:$0xff] }
 0x491   :  { %5397 = vmatprep.subr.bf16.mxu0 %v6268_v15 }
 0x494   :  { %5398 = vmatpush3.bf16.msra.mxu0 %v6269_v16 }
 0x495   :  { %5399 = vmatprep.subr.bf16.mxu0 %v6270_v23 }
 0x498   :  { %5400 = vmatpush3.bf16.msra.mxu0 %v6271_v17 }
 0x499   :  { %5401 = vmatprep.subr.bf16.mxu0 %v6272_v18 }
 0x49c   :  { %5402 = vmatpush3.bf16.msra.mxu0 %v6273_v24 }
 0x49d   :  { %5409 = vmatprep.subr.bf16.mxu0 %v6274_v19 }
 0x552   :  { %v4339_v33 = vpop.f32.mrb[28].mxu0 }
 0x553   :  { %v4437_v34 = vadd.f32 %v4420_v25, %v4339_v33  ;;  %v4382_v35 = vpop.f32.mrb[28].mxu1  ;;  %v4341_v38 = vpop.f32.mrb[29].mxu0 }
 0x554   :  { %v4439_v39 = vadd.f32 %v4428_v50, %v4382_v35  ;;  %v4438_v40 = vadd.f32 %v4424_v26, %v4341_v38  ;;  %v4384_v41 = vpop.f32.mrb[29].mxu1  ;;  %v4343_v42 = vpop.f32.mrb[30].mxu0 }
 0x555   :  { %v4440_v44 = vadd.f32 %v4432_v29, %v4384_v41  ;;  %v4441_v31 = vadd.f32 %v4420_v25, %v4343_v42  ;;  %v4386_v45 = vpop.f32.mrb[30].mxu1  ;;  %v4345_v46 = vpop.f32.mrb[31].mxu0  ;;  %v4445_v28 = vmax.f32 %v4437_v34, 0.0 }
 0x556   :  { %v4443_v47 = vadd.f32 %v4428_v50, %v4386_v45  ;;  %v4442_v27 = vadd.f32 %v4424_v26, %v4345_v46  ;;  %v4388_v52 = vpop.f32.mrb[31].mxu1  ;;  %v4447_v30 = vmax.f32 %v4439_v39, 0.0  ;;  %v4446_v55 = vmax.f32 %v4438_v40, 0.0 }
 0x557   :  { %v4449_v53 = vmax.f32 %v4441_v31, 0.0  ;;  %v4444_v54 = vadd.f32 %v4432_v29, %v4388_v52  ;;  %v4448_v58 = vmax.f32 %v4440_v44, 0.0 }
 0x558   :  { %v4451_v56 = vmax.f32 %v4443_v47, 0.0  ;;  %v4450_v57 = vmax.f32 %v4442_v27, 0.0 }
 0x559   :  { %v4453_v59 = vpack.c.bf16 %v4449_v53, %v4445_v28  ;;  %v4452_v60 = vmax.f32 %v4444_v54, 0.0 }
 0x55a   :  { %v4455_v32 = vpack.c.bf16 %v4451_v56, %v4447_v30  ;;  %v4454_v0 = vpack.c.bf16 %v4450_v57, %v4446_v55 }
 0x55b   :  { %v4456_v62 = vpack.c.bf16 %v4452_v60, %v4448_v58 }
 0x55c   :  { %4752 = vmatprep.mubr.bf16.mxu0 %v4454_v0 }
 0x55d   :  { %4753 = vmatmul.mubr.bf16.vlgmr.msra.gmra.mrb[32].mxu0 %v4453_v59 }
 0x55e   :  { %5410 = vmatpush3.bf16.msra.mxu0 %v6275_v61  ;;  %4793 = vmatprep.mubr.bf16.mxu0 %v4456_v62 }
 0x55f   :  { %5411 = vmatprep.subr.bf16.mxu0 %v6276_v63 }
 0x562   :  { %5412 = vmatpush3.bf16.msra.mxu0 %v6277_v1 }
 0x563   :  { %5413 = vmatprep.subr.bf16.mxu0 %v6278_v48 }
 0x566   :  { %5414 = vmatpush3.bf16.msra.mxu0 %v6279_v2 }
 0x567   :  { %5415 = vmatprep.subr.bf16.mxu0 %v6280_v3 }
 0x56a   :  { %5416 = vmatpush3.bf16.msra.mxu0 %v6281_v4 }
 0x56b   :  { %5417 = vmatprep.subr.bf16.mxu0 %v6282_v43 }
 0x56e   :  { %5418 = vmatpush3.bf16.msra.mxu0 %v6283_v6 }
 0x56f   :  { %5419 = vmatprep.subr.bf16.mxu0 %v6284_v7 }
 0x572   :  { %5420 = vmatpush3.bf16.msra.mxu0 %v6285_v51 }
 0x573   :  { %5421 = vmatprep.subr.bf16.mxu0 %v6286_v8 }
 0x576   :  { %5422 = vmatpush3.bf16.msra.mxu0 %v6287_v9 }
 0x577   :  { %5423 = vmatprep.subr.bf16.mxu0 %v6288_v37 }
 0x57a   :  { %5424 = vmatpush3.bf16.msra.mxu0 %v6289_v10 }
 0x57d   :  { %4794 = vmatmul.mubr.bf16.vlgmr.msra.gmra.mrb[36].mxu0 %v4455_v32 }
 0x630   :  { %v5403_v36 = vpop.f32.mrb[32].mxu0 }
 0x631   :  { %v5404_v11 = vpop.f32.mrb[33].mxu0 }
 0x632   :  { %v5405_v12 = vadd.f32 %v5404_v11, %v5403_v36  ;;  %v5406_v13 = vpop.f32.mrb[34].mxu0 }
 0x633   :  { %v5407_v5 = vpop.f32.mrb[35].mxu0 }
 0x634   :  { %v5408_v14 = vadd.f32 %v5407_v5, %v5406_v13  ;;  %v4755_v23 = vadd.f32 %v5405_v12, %v5354_v21 }
 0x636   :  { %v4758_v19 = vadd.f32 %v5408_v14, %v5354_v21 }
 0x650   :  { %v5425_v15 = vpop.f32.mrb[36].mxu0 }
 0x651   :  { %v5426_v16 = vpop.f32.mrb[37].mxu0 }
 0x652   :  { %v5427_v17 = vadd.f32 %v5426_v16, %v5425_v15  ;;  %v5428_v18 = vpop.f32.mrb[38].mxu0 }
 0x653   :  { %v5429_v24 = vpop.f32.mrb[39].mxu0 }
 0x654   :  { %v5430_v20 = vadd.f32 %v5429_v24, %v5428_v18  ;;  %v4796_v22 = vadd.f32 %v5427_v17, %v4755_v23 }
 0x656   :  { %4802 = vmax.xlane.f32.xlu1 %v4796_v22  ;;  %v4799_v49 = vadd.f32 %v5430_v20, %v4758_v19 }
 0x658   :  { %4804 = vmax.xlane.f32.xlu0 %v4799_v49 }
 0x6e3   :  { %v4803_v25 = vpop.xlane.xlu1 %4802 }
 0x6e4   :  { %v4806_v50 = vsub.f32 %v4796_v22, %v4803_v25 }
 0x6e5   :  { %v4805_v26 = vpop.xlane.xlu0 %4804 }
 0x6e6   :  { %v4808_v29 = vmul.f32 1.442695, %v4806_v50  ;;  %v4807_v33 = vsub.f32 %v4799_v49, %v4805_v26 }
 0x6e8   :  { %6290 = vpow2.f32 %v4808_v29  ;;  %v4810_v34 = vmul.f32 1.442695, %v4807_v33 }
 0x6ea   :  { %6292 = vpow2.f32 %v4810_v34 }
 0x6f2   :  { %v6291_v35 = vpop.eup %6290 }
 0x6f3   :  { %4812 = vadd.xlane.f32.xlu1 %v6291_v35 }
 0x6f4   :  { %v6293_v38 = vpop.eup %6292 }
 0x6f5   :  { %4814 = vadd.xlane.f32.xlu0 %v6293_v38 }
 0x780   :  { %v4813_v39 = vpop.xlane.xlu1 %4812 }
 0x781   :  { %6294 = vrcp.f32 %v4813_v39 }
 0x782   :  { %v4815_v40 = vpop.xlane.xlu0 %4814 }
 0x783   :  { %6296 = vrcp.f32 %v4815_v40 }
 0x78b   :  { %v6295_v41 = vpop.eup %6294 }
 0x78c   :  { %v4818_v42 = vmul.f32 %v6295_v41, %v6291_v35 }
 0x78d   :  { %v6297_v44 = vpop.eup %6296 }
 0x78e   :  { %v4819_v31 = vmul.f32 %v6297_v44, %v6293_v38  ;;  %4820 = vst [vmem:[#allocation21] sm:$0xff] %v4818_v42 }
 0x790   :  { %4821 = vst [vmem:[#allocation21 + $0x8] sm:$0xff] %v4819_v31 }
 0x791   :  { %6529 = shalt.err (!%p6526_p0)
}
 0x792   :  { %s6530_s3 = scalar_lea.hbm %s6951_s11, 256 }
 0x793   :  { %p6531_p1 = scmp.ne.s32.totalorder %s6951_s11, %s6530_s3  ;;  %p6534_p2 = scmp.lt.u32.totalorder %s6530_s3, %s6951_s11 }
 0x795   :  { %p6536_p3 = pnand %p6534_p2, %p6531_p1 }
 0x797   :  { %6539 = shalt.err (!%p6536_p3)
}
 0x798   :  { %4833 = dma.vmem_to_hbm [thread:$0]  %s4828_s14, 256, %s6951_s11, [#allocation6], %s6560_s1, %s6560_s1, %s6561_s23  }
 0x799   :  { %6552 = dma.done.wait [#allocation6], 256  }
 0x79a   :  { %6553 = vsyncadd [#allocation6], 4294967040 }
 0x79b   :  { %4837 = vsyncpa [#allocation5], 1 }
 0x79c   :  { %4838 = vsyncpa [#allocation8], 1 }
 0x79d   :  { %4839 = vsyncpa [#allocation11], 1 }
 0x79e   :  { %4840 = vsyncpa [#allocation14], 1 }
 0x79f   :  { %4841 = vsyncpa [#allocation17], 1 }
 0x7a0   :  { %4842 = vsyncpa [#allocation20], 1 }
 0x7a1   :  { %4843 = vsyncpa [#allocation6], 1 }

</bundles_post_ra>
